<compile_context>
chip_gen: v7x
topology: tpu7x:2x2x1
jax: 0.10.0
libtpu: 0.0.40
codegen_flags: <defaults>
</compile_context>

<pallas_src>
import functools
import math

import jax
import jax.numpy as jnp
import numpy as np
from jax.experimental import pallas as pl
from jax.experimental.pallas import tpu as pltpu

# Architecture constants implied by the PyTorch module (fc1 = Linear(32*6*6, 256)
# forces an 80x80 single-channel input).
H = W = 80
K1, S1, C1 = 8, 4, 16            # conv1: Conv2d(1, 16, kernel_size=8, stride=4)
O1 = (H - K1) // S1 + 1          # 19
N1 = O1 * O1                     # 361 conv1 output pixels per image
N1P = 384                        # 361 padded to a multiple of 128 lanes
K2, S2, C2 = 4, 3, 32            # conv2: Conv2d(16, 32, kernel_size=4, stride=3)
O2 = (O1 - K2) // S2 + 1         # 6
N2 = O2 * O2                     # 36
T2 = K2 * K2                     # 16 conv2 taps
FC1_IN = C2 * N2                 # 1152
FC1_OUT = 256
NCLASS = 2


# ------------------------------ fused Pallas kernel ------------------------------ #
def _cnn_fused_kernel(p1t_ref, w1_ref, b1_ref, sel_ref, w2_ref, b2_ref,
                      wf1_ref, bf1_ref, wf2_ref, bf2_ref, out_ref, flat_ref,
                      *, batch):
    # ---- conv1 + ReLU, channel-major / lane-dense: y1[ci, b*384 + i*19 + j] ----
    y1 = jnp.dot(w1_ref[...], p1t_ref[...], preferred_element_type=jnp.float32)
    y1 = jnp.maximum(y1 + b1_ref[...], 0.0)                  # (16, B*384)

    sel = sel_ref[...]                                       # (384, 576) 0/1 selection
    w2 = w2_ref[...]                                         # (32, 256)
    b2 = b2_ref[...]                                         # (32, 1)

    for b in range(batch):
        # conv2 im2col as a matmul (no gather / strided access inside the kernel):
        #   g[ci, t*36 + s] = y1[ci, b, 3*oh + kh, 3*ow + kw]   (t = kh*4+kw, s = oh*6+ow)
        g = jnp.dot(y1[:, b * N1P:(b + 1) * N1P], sel,
                    preferred_element_type=jnp.float32)      # (16, 576)
        # p2[t*16 + ci, s]  — row order matches w2's (kh, kw, ci) column order.
        p2 = jnp.concatenate(
            [g[:, t * N2:(t + 1) * N2] for t in range(T2)], axis=0)   # (256, 36)
        # conv2 + ReLU, channel-major (32, 36)
        y2 = jnp.maximum(
            jnp.dot(w2, p2, preferred_element_type=jnp.float32) + b2, 0.0)
        # PyTorch NCHW flatten (x.reshape(B, -1)) is free in channel-major layout:
        #   flat[b, co*36 + s] = y2[co, s]
        for co in range(C2):
            flat_ref[b:b + 1, co * N2:(co + 1) * N2] = y2[co:co + 1, :]

    # ---- fc1 + ReLU ----
    h = jnp.dot(flat_ref[...], wf1_ref[...], preferred_element_type=jnp.float32)
    h = jnp.maximum(h + bf1_ref[...], 0.0)                   # (B, 256)

    # ---- fc2 + softmax(dim=1) ----
    logits = jnp.dot(h, wf2_ref[...], preferred_element_type=jnp.float32) + bf2_ref[...]
    z = logits - jnp.max(logits, axis=-1, keepdims=True)
    e = jnp.exp(z)
    out_ref[...] = (e / jnp.sum(e, axis=-1, keepdims=True)).astype(out_ref.dtype)


# --------------------------------- JAX glue -------------------------------------- #
def _conv1_patches_t(x_nchw):
    """Transposed im2col for conv1 via static strided slices (no gather).

    (B, 1, 80, 80) -> (64, B*384) with row order kh*8+kw and column order
    b*384 + i*19 + j (columns 361..383 of each image are zero padding).
    """
    Bn = x_nchw.shape[0]
    xs = x_nchw[:, 0]                                        # (B, 80, 80)
    lim = S1 * (O1 - 1) + 1                                  # 73
    taps = []
    for kh in range(K1):
        for kw in range(K1):
            sl = xs[:, kh:kh + lim:S1, kw:kw + lim:S1]       # (B, 19, 19) strided slice
            taps.append(sl.reshape(Bn, N1))
    p = jnp.stack(taps, axis=0)                              # (64, B, 361)
    p = jnp.pad(p, ((0, 0), (0, 0), (0, N1P - N1)))          # (64, B, 384)
    return p.reshape(K1 * K1, Bn * N1P)


def _build_conv2_selection():
    """Constant 0/1 matrix: sel[i*19+j, t*36+s] = 1 iff (i, j) = (3*oh+kh, 3*ow+kw)."""
    sel = np.zeros((N1P, T2 * N2), np.float32)
    for kh in range(K2):
        for kw in range(K2):
            t = kh * K2 + kw
            for oh in range(O2):
                for ow in range(O2):
                    i = S2 * oh + kh
                    j = S2 * ow + kw
                    sel[i * O1 + j, t * N2 + oh * O2 + ow] = 1.0
    return jnp.asarray(sel)


def prepare_params(params):
    """One-time re-layout of the PyTorch-style parameters for the fused kernel."""
    return dict(
        w1=params["w1"].reshape(C1, K1 * K1),                               # (16, 64)
        b1=params["b1"].reshape(C1, 1),                                     # (16, 1)
        sel=_build_conv2_selection(),                                       # (384, 576)
        w2=jnp.transpose(params["w2"], (0, 2, 3, 1)).reshape(C2, T2 * C1),  # (32, 256)
        b2=params["b2"].reshape(C2, 1),                                     # (32, 1)
        wf1=params["wf1"].T,                                                # (1152, 256)
        bf1=params["bf1"].reshape(1, FC1_OUT),                              # (1, 256)
        wf2=params["wf2"].T,                                                # (256, 2)
        bf2=params["bf2"].reshape(1, NCLASS),                               # (1, 2)
    )


@jax.jit
def cnn_net_forward(x_nchw, prep):
    """Pallas implementation of CNN_Net.forward.  x_nchw: (B, 1, 80, 80) float32."""
    B = x_nchw.shape[0]
    p1t = _conv1_patches_t(x_nchw)                           # (64, B*384)
    vmem = pl.BlockSpec(memory_space=pltpu.MemorySpace.VMEM)
    return pl.pallas_call(
        functools.partial(_cnn_fused_kernel, batch=B),
        out_shape=jax.ShapeDtypeStruct((B, NCLASS), jnp.float32),
        in_specs=[vmem] * 10,
        out_specs=vmem,
        scratch_shapes=[pltpu.VMEM((B, FC1_IN), jnp.float32)],
    )(p1t, prep["w1"], prep["b1"], prep["sel"], prep["w2"], prep["b2"],
      prep["wf1"], prep["bf1"], prep["wf2"], prep["bf2"])


# ----------------------------- pure-JAX reference -------------------------------- #
def reference_forward(x_nchw, params):
    dn = ("NCHW", "OIHW", "NCHW")
    y = jax.lax.conv_general_dilated(x_nchw, params["w1"], (S1, S1), "VALID",
                                     dimension_numbers=dn)
    y = jnp.maximum(y + params["b1"][None, :, None, None], 0.0)
    y = jax.lax.conv_general_dilated(y, params["w2"], (S2, S2), "VALID",
                                     dimension_numbers=dn)
    y = jnp.maximum(y + params["b2"][None, :, None, None], 0.0)
    y = y.reshape(y.shape[0], -1)
    y = jnp.maximum(y @ params["wf1"].T + params["bf1"], 0.0)
    y = y @ params["wf2"].T + params["bf2"]
    return jax.nn.softmax(y, axis=1)


# ------------------------------------- main --------------------------------------- #
if __name__ == "__main__":
    key = jax.random.PRNGKey(0)
    keys = jax.random.split(key, 9)
    B = 2
    # fc1 expects 32*6*6 features -> implies an 80x80 single-channel input.
    x = jax.random.normal(keys[0], (B, 1, H, W), dtype=jnp.float32)

    def uinit(k, shape, fan_in):
        bound = 1.0 / math.sqrt(fan_in)
        return jax.random.uniform(k, shape, jnp.float32, -bound, bound)

    params = dict(
        w1=uinit(keys[1], (C1, 1, K1, K1), 1 * K1 * K1),
        b1=uinit(keys[2], (C1,), 1 * K1 * K1),
        w2=uinit(keys[3], (C2, C1, K2, K2), C1 * K2 * K2),
        b2=uinit(keys[4], (C2,), C1 * K2 * K2),
        wf1=uinit(keys[5], (FC1_OUT, FC1_IN), FC1_IN),
        bf1=uinit(keys[6], (FC1_OUT,), FC1_IN),
        wf2=uinit(keys[7], (NCLASS, FC1_OUT), FC1_OUT),
        bf2=uinit(keys[8], (NCLASS,), FC1_OUT),
    )

    prep = prepare_params(params)                     # weight re-layout hoisted to init
    out = jax.block_until_ready(cnn_net_forward(x, prep))
    ref = reference_forward(x, params)

    assert out.shape == (B, NCLASS), out.shape
    assert jnp.allclose(jnp.sum(out, axis=1), 1.0, atol=1e-5)
    assert jnp.allclose(out, ref, atol=2e-5, rtol=2e-5), (out, ref)
    print("KERNEL_OK")
</pallas_src>

<mosaic_0001>
module attributes {stable_mosaic.version = 11 : i64} {
  func.func @_cnn_fused_kernel(%arg0: memref<64x768xf32, #tpu.memory_space<vmem>>, %arg1: memref<16x64xf32, #tpu.memory_space<vmem>>, %arg2: memref<16x1xf32, #tpu.memory_space<vmem>>, %arg3: memref<384x576xf32, #tpu.memory_space<vmem>>, %arg4: memref<32x256xf32, #tpu.memory_space<vmem>>, %arg5: memref<32x1xf32, #tpu.memory_space<vmem>>, %arg6: memref<1152x256xf32, #tpu.memory_space<vmem>>, %arg7: memref<1x256xf32, #tpu.memory_space<vmem>>, %arg8: memref<256x2xf32, #tpu.memory_space<vmem>>, %arg9: memref<1x2xf32, #tpu.memory_space<vmem>>, %arg10: memref<2x2xf32, #tpu.memory_space<vmem>>, %arg11: memref<2x1152xf32, #tpu.memory_space<vmem>>) attributes {dimension_semantics = [], scalar_prefetch = 0 : i64, scratch_operands = 1 : i64, tpu.core_type = #tpu.core_type<tc>} {
    %c0 = arith.constant 0 : index
    %c0_0 = arith.constant 0 : index
    %0 = vector.load %arg1[%c0, %c0_0] : memref<16x64xf32, #tpu.memory_space<vmem>>, vector<16x64xf32>
    %c0_1 = arith.constant 0 : index
    %c0_2 = arith.constant 0 : index
    %1 = vector.load %arg0[%c0_1, %c0_2] : memref<64x768xf32, #tpu.memory_space<vmem>>, vector<64x768xf32>
    %cst = arith.constant dense<0.000000e+00> : vector<16x768xf32>
    %2 = tpu.matmul %0, %1, %cst {dimension_numbers = #tpu.dot_dimension_numbers<[1], [0], [0], [1], [0, 0, 1, 1], [], []>} : vector<16x64xf32>, vector<64x768xf32>, vector<16x768xf32> -> vector<16x768xf32>
    %c0_3 = arith.constant 0 : index
    %c0_4 = arith.constant 0 : index
    %3 = vector.load %arg2[%c0_3, %c0_4] : memref<16x1xf32, #tpu.memory_space<vmem>>, vector<16x1xf32>
    %4 = vector.broadcast %3 : vector<16x1xf32> to vector<16x768xf32>
    %5 = arith.addf %2, %4 : vector<16x768xf32>
    %cst_5 = arith.constant 0.000000e+00 : f32
    %6 = vector.broadcast %cst_5 : f32 to vector<16x768xf32>
    %7 = arith.maximumf %5, %6 : vector<16x768xf32>
    %c0_6 = arith.constant 0 : index
    %c0_7 = arith.constant 0 : index
    %8 = vector.load %arg3[%c0_6, %c0_7] : memref<384x576xf32, #tpu.memory_space<vmem>>, vector<384x576xf32>
    %c0_8 = arith.constant 0 : index
    %c0_9 = arith.constant 0 : index
    %9 = vector.load %arg4[%c0_8, %c0_9] : memref<32x256xf32, #tpu.memory_space<vmem>>, vector<32x256xf32>
    %c0_10 = arith.constant 0 : index
    %c0_11 = arith.constant 0 : index
    %10 = vector.load %arg5[%c0_10, %c0_11] : memref<32x1xf32, #tpu.memory_space<vmem>>, vector<32x1xf32>
    %11 = vector.extract_strided_slice %7 {offsets = [0, 0], sizes = [16, 384], strides = [1, 1]} : vector<16x768xf32> to vector<16x384xf32>
    %cst_12 = arith.constant dense<0.000000e+00> : vector<16x576xf32>
    %12 = tpu.matmul %11, %8, %cst_12 {dimension_numbers = #tpu.dot_dimension_numbers<[1], [0], [0], [1], [0, 0, 1, 1], [], []>} : vector<16x384xf32>, vector<384x576xf32>, vector<16x576xf32> -> vector<16x576xf32>
    %13 = vector.extract_strided_slice %12 {offsets = [0, 0], sizes = [16, 36], strides = [1, 1]} : vector<16x576xf32> to vector<16x36xf32>
    %14 = vector.extract_strided_slice %12 {offsets = [0, 36], sizes = [16, 36], strides = [1, 1]} : vector<16x576xf32> to vector<16x36xf32>
    %15 = vector.extract_strided_slice %12 {offsets = [0, 72], sizes = [16, 36], strides = [1, 1]} : vector<16x576xf32> to vector<16x36xf32>
    %16 = vector.extract_strided_slice %12 {offsets = [0, 108], sizes = [16, 36], strides = [1, 1]} : vector<16x576xf32> to vector<16x36xf32>
    %17 = vector.extract_strided_slice %12 {offsets = [0, 144], sizes = [16, 36], strides = [1, 1]} : vector<16x576xf32> to vector<16x36xf32>
    %18 = vector.extract_strided_slice %12 {offsets = [0, 180], sizes = [16, 36], strides = [1, 1]} : vector<16x576xf32> to vector<16x36xf32>
    %19 = vector.extract_strided_slice %12 {offsets = [0, 216], sizes = [16, 36], strides = [1, 1]} : vector<16x576xf32> to vector<16x36xf32>
    %20 = vector.extract_strided_slice %12 {offsets = [0, 252], sizes = [16, 36], strides = [1, 1]} : vector<16x576xf32> to vector<16x36xf32>
    %21 = vector.extract_strided_slice %12 {offsets = [0, 288], sizes = [16, 36], strides = [1, 1]} : vector<16x576xf32> to vector<16x36xf32>
    %22 = vector.extract_strided_slice %12 {offsets = [0, 324], sizes = [16, 36], strides = [1, 1]} : vector<16x576xf32> to vector<16x36xf32>
    %23 = vector.extract_strided_slice %12 {offsets = [0, 360], sizes = [16, 36], strides = [1, 1]} : vector<16x576xf32> to vector<16x36xf32>
    %24 = vector.extract_strided_slice %12 {offsets = [0, 396], sizes = [16, 36], strides = [1, 1]} : vector<16x576xf32> to vector<16x36xf32>
    %25 = vector.extract_strided_slice %12 {offsets = [0, 432], sizes = [16, 36], strides = [1, 1]} : vector<16x576xf32> to vector<16x36xf32>
    %26 = vector.extract_strided_slice %12 {offsets = [0, 468], sizes = [16, 36], strides = [1, 1]} : vector<16x576xf32> to vector<16x36xf32>
    %27 = vector.extract_strided_slice %12 {offsets = [0, 504], sizes = [16, 36], strides = [1, 1]} : vector<16x576xf32> to vector<16x36xf32>
    %28 = vector.extract_strided_slice %12 {offsets = [0, 540], sizes = [16, 36], strides = [1, 1]} : vector<16x576xf32> to vector<16x36xf32>
    %29 = tpu.concatenate %13, %14, %15, %16, %17, %18, %19, %20, %21, %22, %23, %24, %25, %26, %27, %28 in 0 : vector<16x36xf32>, vector<16x36xf32>, vector<16x36xf32>, vector<16x36xf32>, vector<16x36xf32>, vector<16x36xf32>, vector<16x36xf32>, vector<16x36xf32>, vector<16x36xf32>, vector<16x36xf32>, vector<16x36xf32>, vector<16x36xf32>, vector<16x36xf32>, vector<16x36xf32>, vector<16x36xf32>, vector<16x36xf32> -> vector<256x36xf32>
    %cst_13 = arith.constant dense<0.000000e+00> : vector<32x36xf32>
    %30 = tpu.matmul %9, %29, %cst_13 {dimension_numbers = #tpu.dot_dimension_numbers<[1], [0], [0], [1], [0, 0, 1, 1], [], []>} : vector<32x256xf32>, vector<256x36xf32>, vector<32x36xf32> -> vector<32x36xf32>
    %31 = vector.broadcast %10 : vector<32x1xf32> to vector<32x36xf32>
    %32 = arith.addf %30, %31 : vector<32x36xf32>
    %cst_14 = arith.constant 0.000000e+00 : f32
    %33 = vector.broadcast %cst_14 : f32 to vector<32x36xf32>
    %34 = arith.maximumf %32, %33 : vector<32x36xf32>
    %35 = vector.extract_strided_slice %34 {offsets = [0, 0], sizes = [1, 36], strides = [1, 1]} : vector<32x36xf32> to vector<1x36xf32>
    %c0_15 = arith.constant 0 : index
    %c0_16 = arith.constant 0 : index
    %36 = vector.load %arg11[%c0_15, %c0_16] : memref<2x1152xf32, #tpu.memory_space<vmem>>, vector<1x36xf32>
    tpu.vector_store %arg11[%c0_15, %c0_16], %35 {strides = array<i32>} : memref<2x1152xf32, #tpu.memory_space<vmem>>, vector<1x36xf32>,
    %37 = vector.extract_strided_slice %34 {offsets = [1, 0], sizes = [1, 36], strides = [1, 1]} : vector<32x36xf32> to vector<1x36xf32>
    %c0_17 = arith.constant 0 : index
    %c36 = arith.constant 36 : index
    %38 = vector.load %arg11[%c0_17, %c36] : memref<2x1152xf32, #tpu.memory_space<vmem>>, vector<1x36xf32>
    tpu.vector_store %arg11[%c0_17, %c36], %37 {strides = array<i32>} : memref<2x1152xf32, #tpu.memory_space<vmem>>, vector<1x36xf32>,
    %39 = vector.extract_strided_slice %34 {offsets = [2, 0], sizes = [1, 36], strides = [1, 1]} : vector<32x36xf32> to vector<1x36xf32>
    %c0_18 = arith.constant 0 : index
    %c72 = arith.constant 72 : index
    %40 = vector.load %arg11[%c0_18, %c72] : memref<2x1152xf32, #tpu.memory_space<vmem>>, vector<1x36xf32>
    tpu.vector_store %arg11[%c0_18, %c72], %39 {strides = array<i32>} : memref<2x1152xf32, #tpu.memory_space<vmem>>, vector<1x36xf32>,
    %41 = vector.extract_strided_slice %34 {offsets = [3, 0], sizes = [1, 36], strides = [1, 1]} : vector<32x36xf32> to vector<1x36xf32>
    %c0_19 = arith.constant 0 : index
    %c108 = arith.constant 108 : index
    %42 = vector.load %arg11[%c0_19, %c108] : memref<2x1152xf32, #tpu.memory_space<vmem>>, vector<1x36xf32>
    tpu.vector_store %arg11[%c0_19, %c108], %41 {strides = array<i32>} : memref<2x1152xf32, #tpu.memory_space<vmem>>, vector<1x36xf32>,
    %43 = vector.extract_strided_slice %34 {offsets = [4, 0], sizes = [1, 36], strides = [1, 1]} : vector<32x36xf32> to vector<1x36xf32>
    %c0_20 = arith.constant 0 : index
    %c144 = arith.constant 144 : index
    %44 = vector.load %arg11[%c0_20, %c144] : memref<2x1152xf32, #tpu.memory_space<vmem>>, vector<1x36xf32>
    tpu.vector_store %arg11[%c0_20, %c144], %43 {strides = array<i32>} : memref<2x1152xf32, #tpu.memory_space<vmem>>, vector<1x36xf32>,
    %45 = vector.extract_strided_slice %34 {offsets = [5, 0], sizes = [1, 36], strides = [1, 1]} : vector<32x36xf32> to vector<1x36xf32>
    %c0_21 = arith.constant 0 : index
    %c180 = arith.constant 180 : index
    %46 = vector.load %arg11[%c0_21, %c180] : memref<2x1152xf32, #tpu.memory_space<vmem>>, vector<1x36xf32>
    tpu.vector_store %arg11[%c0_21, %c180], %45 {strides = array<i32>} : memref<2x1152xf32, #tpu.memory_space<vmem>>, vector<1x36xf32>,
    %47 = vector.extract_strided_slice %34 {offsets = [6, 0], sizes = [1, 36], strides = [1, 1]} : vector<32x36xf32> to vector<1x36xf32>
    %c0_22 = arith.constant 0 : index
    %c216 = arith.constant 216 : index
    %48 = vector.load %arg11[%c0_22, %c216] : memref<2x1152xf32, #tpu.memory_space<vmem>>, vector<1x36xf32>
    tpu.vector_store %arg11[%c0_22, %c216], %47 {strides = array<i32>} : memref<2x1152xf32, #tpu.memory_space<vmem>>, vector<1x36xf32>,
    %49 = vector.extract_strided_slice %34 {offsets = [7, 0], sizes = [1, 36], strides = [1, 1]} : vector<32x36xf32> to vector<1x36xf32>
    %c0_23 = arith.constant 0 : index
    %c252 = arith.constant 252 : index
    %50 = vector.load %arg11[%c0_23, %c252] : memref<2x1152xf32, #tpu.memory_space<vmem>>, vector<1x36xf32>
    tpu.vector_store %arg11[%c0_23, %c252], %49 {strides = array<i32>} : memref<2x1152xf32, #tpu.memory_space<vmem>>, vector<1x36xf32>,
    %51 = vector.extract_strided_slice %34 {offsets = [8, 0], sizes = [1, 36], strides = [1, 1]} : vector<32x36xf32> to vector<1x36xf32>
    %c0_24 = arith.constant 0 : index
    %c288 = arith.constant 288 : index
    %52 = vector.load %arg11[%c0_24, %c288] : memref<2x1152xf32, #tpu.memory_space<vmem>>, vector<1x36xf32>
    tpu.vector_store %arg11[%c0_24, %c288], %51 {strides = array<i32>} : memref<2x1152xf32, #tpu.memory_space<vmem>>, vector<1x36xf32>,
    %53 = vector.extract_strided_slice %34 {offsets = [9, 0], sizes = [1, 36], strides = [1, 1]} : vector<32x36xf32> to vector<1x36xf32>
    %c0_25 = arith.constant 0 : index
    %c324 = arith.constant 324 : index
    %54 = vector.load %arg11[%c0_25, %c324] : memref<2x1152xf32, #tpu.memory_space<vmem>>, vector<1x36xf32>
    tpu.vector_store %arg11[%c0_25, %c324], %53 {strides = array<i32>} : memref<2x1152xf32, #tpu.memory_space<vmem>>, vector<1x36xf32>,
    %55 = vector.extract_strided_slice %34 {offsets = [10, 0], sizes = [1, 36], strides = [1, 1]} : vector<32x36xf32> to vector<1x36xf32>
    %c0_26 = arith.constant 0 : index
    %c360 = arith.constant 360 : index
    %56 = vector.load %arg11[%c0_26, %c360] : memref<2x1152xf32, #tpu.memory_space<vmem>>, vector<1x36xf32>
    tpu.vector_store %arg11[%c0_26, %c360], %55 {strides = array<i32>} : memref<2x1152xf32, #tpu.memory_space<vmem>>, vector<1x36xf32>,
    %57 = vector.extract_strided_slice %34 {offsets = [11, 0], sizes = [1, 36], strides = [1, 1]} : vector<32x36xf32> to vector<1x36xf32>
    %c0_27 = arith.constant 0 : index
    %c396 = arith.constant 396 : index
    %58 = vector.load %arg11[%c0_27, %c396] : memref<2x1152xf32, #tpu.memory_space<vmem>>, vector<1x36xf32>
    tpu.vector_store %arg11[%c0_27, %c396], %57 {strides = array<i32>} : memref<2x1152xf32, #tpu.memory_space<vmem>>, vector<1x36xf32>,
    %59 = vector.extract_strided_slice %34 {offsets = [12, 0], sizes = [1, 36], strides = [1, 1]} : vector<32x36xf32> to vector<1x36xf32>
    %c0_28 = arith.constant 0 : index
    %c432 = arith.constant 432 : index
    %60 = vector.load %arg11[%c0_28, %c432] : memref<2x1152xf32, #tpu.memory_space<vmem>>, vector<1x36xf32>
    tpu.vector_store %arg11[%c0_28, %c432], %59 {strides = array<i32>} : memref<2x1152xf32, #tpu.memory_space<vmem>>, vector<1x36xf32>,
    %61 = vector.extract_strided_slice %34 {offsets = [13, 0], sizes = [1, 36], strides = [1, 1]} : vector<32x36xf32> to vector<1x36xf32>
    %c0_29 = arith.constant 0 : index
    %c468 = arith.constant 468 : index
    %62 = vector.load %arg11[%c0_29, %c468] : memref<2x1152xf32, #tpu.memory_space<vmem>>, vector<1x36xf32>
    tpu.vector_store %arg11[%c0_29, %c468], %61 {strides = array<i32>} : memref<2x1152xf32, #tpu.memory_space<vmem>>, vector<1x36xf32>,
    %63 = vector.extract_strided_slice %34 {offsets = [14, 0], sizes = [1, 36], strides = [1, 1]} : vector<32x36xf32> to vector<1x36xf32>
    %c0_30 = arith.constant 0 : index
    %c504 = arith.constant 504 : index
    %64 = vector.load %arg11[%c0_30, %c504] : memref<2x1152xf32, #tpu.memory_space<vmem>>, vector<1x36xf32>
    tpu.vector_store %arg11[%c0_30, %c504], %63 {strides = array<i32>} : memref<2x1152xf32, #tpu.memory_space<vmem>>, vector<1x36xf32>,
    %65 = vector.extract_strided_slice %34 {offsets = [15, 0], sizes = [1, 36], strides = [1, 1]} : vector<32x36xf32> to vector<1x36xf32>
    %c0_31 = arith.constant 0 : index
    %c540 = arith.constant 540 : index
    %66 = vector.load %arg11[%c0_31, %c540] : memref<2x1152xf32, #tpu.memory_space<vmem>>, vector<1x36xf32>
    tpu.vector_store %arg11[%c0_31, %c540], %65 {strides = array<i32>} : memref<2x1152xf32, #tpu.memory_space<vmem>>, vector<1x36xf32>,
    %67 = vector.extract_strided_slice %34 {offsets = [16, 0], sizes = [1, 36], strides = [1, 1]} : vector<32x36xf32> to vector<1x36xf32>
    %c0_32 = arith.constant 0 : index
    %c576 = arith.constant 576 : index
    %68 = vector.load %arg11[%c0_32, %c576] : memref<2x1152xf32, #tpu.memory_space<vmem>>, vector<1x36xf32>
    tpu.vector_store %arg11[%c0_32, %c576], %67 {strides = array<i32>} : memref<2x1152xf32, #tpu.memory_space<vmem>>, vector<1x36xf32>,
    %69 = vector.extract_strided_slice %34 {offsets = [17, 0], sizes = [1, 36], strides = [1, 1]} : vector<32x36xf32> to vector<1x36xf32>
    %c0_33 = arith.constant 0 : index
    %c612 = arith.constant 612 : index
    %70 = vector.load %arg11[%c0_33, %c612] : memref<2x1152xf32, #tpu.memory_space<vmem>>, vector<1x36xf32>
    tpu.vector_store %arg11[%c0_33, %c612], %69 {strides = array<i32>} : memref<2x1152xf32, #tpu.memory_space<vmem>>, vector<1x36xf32>,
    %71 = vector.extract_strided_slice %34 {offsets = [18, 0], sizes = [1, 36], strides = [1, 1]} : vector<32x36xf32> to vector<1x36xf32>
    %c0_34 = arith.constant 0 : index
    %c648 = arith.constant 648 : index
    %72 = vector.load %arg11[%c0_34, %c648] : memref<2x1152xf32, #tpu.memory_space<vmem>>, vector<1x36xf32>
    tpu.vector_store %arg11[%c0_34, %c648], %71 {strides = array<i32>} : memref<2x1152xf32, #tpu.memory_space<vmem>>, vector<1x36xf32>,
    %73 = vector.extract_strided_slice %34 {offsets = [19, 0], sizes = [1, 36], strides = [1, 1]} : vector<32x36xf32> to vector<1x36xf32>
    %c0_35 = arith.constant 0 : index
    %c684 = arith.constant 684 : index
    %74 = vector.load %arg11[%c0_35, %c684] : memref<2x1152xf32, #tpu.memory_space<vmem>>, vector<1x36xf32>
    tpu.vector_store %arg11[%c0_35, %c684], %73 {strides = array<i32>} : memref<2x1152xf32, #tpu.memory_space<vmem>>, vector<1x36xf32>,
    %75 = vector.extract_strided_slice %34 {offsets = [20, 0], sizes = [1, 36], strides = [1, 1]} : vector<32x36xf32> to vector<1x36xf32>
    %c0_36 = arith.constant 0 : index
    %c720 = arith.constant 720 : index
    %76 = vector.load %arg11[%c0_36, %c720] : memref<2x1152xf32, #tpu.memory_space<vmem>>, vector<1x36xf32>
    tpu.vector_store %arg11[%c0_36, %c720], %75 {strides = array<i32>} : memref<2x1152xf32, #tpu.memory_space<vmem>>, vector<1x36xf32>,
    %77 = vector.extract_strided_slice %34 {offsets = [21, 0], sizes = [1, 36], strides = [1, 1]} : vector<32x36xf32> to vector<1x36xf32>
    %c0_37 = arith.constant 0 : index
    %c756 = arith.constant 756 : index
    %78 = vector.load %arg11[%c0_37, %c756] : memref<2x1152xf32, #tpu.memory_space<vmem>>, vector<1x36xf32>
    tpu.vector_store %arg11[%c0_37, %c756], %77 {strides = array<i32>} : memref<2x1152xf32, #tpu.memory_space<vmem>>, vector<1x36xf32>,
    %79 = vector.extract_strided_slice %34 {offsets = [22, 0], sizes = [1, 36], strides = [1, 1]} : vector<32x36xf32> to vector<1x36xf32>
    %c0_38 = arith.constant 0 : index
    %c792 = arith.constant 792 : index
    %80 = vector.load %arg11[%c0_38, %c792] : memref<2x1152xf32, #tpu.memory_space<vmem>>, vector<1x36xf32>
    tpu.vector_store %arg11[%c0_38, %c792], %79 {strides = array<i32>} : memref<2x1152xf32, #tpu.memory_space<vmem>>, vector<1x36xf32>,
    %81 = vector.extract_strided_slice %34 {offsets = [23, 0], sizes = [1, 36], strides = [1, 1]} : vector<32x36xf32> to vector<1x36xf32>
    %c0_39 = arith.constant 0 : index
    %c828 = arith.constant 828 : index
    %82 = vector.load %arg11[%c0_39, %c828] : memref<2x1152xf32, #tpu.memory_space<vmem>>, vector<1x36xf32>
    tpu.vector_store %arg11[%c0_39, %c828], %81 {strides = array<i32>} : memref<2x1152xf32, #tpu.memory_space<vmem>>, vector<1x36xf32>,
    %83 = vector.extract_strided_slice %34 {offsets = [24, 0], sizes = [1, 36], strides = [1, 1]} : vector<32x36xf32> to vector<1x36xf32>
    %c0_40 = arith.constant 0 : index
    %c864 = arith.constant 864 : index
    %84 = vector.load %arg11[%c0_40, %c864] : memref<2x1152xf32, #tpu.memory_space<vmem>>, vector<1x36xf32>
    tpu.vector_store %arg11[%c0_40, %c864], %83 {strides = array<i32>} : memref<2x1152xf32, #tpu.memory_space<vmem>>, vector<1x36xf32>,
    %85 = vector.extract_strided_slice %34 {offsets = [25, 0], sizes = [1, 36], strides = [1, 1]} : vector<32x36xf32> to vector<1x36xf32>
    %c0_41 = arith.constant 0 : index
    %c900 = arith.constant 900 : index
    %86 = vector.load %arg11[%c0_41, %c900] : memref<2x1152xf32, #tpu.memory_space<vmem>>, vector<1x36xf32>
    tpu.vector_store %arg11[%c0_41, %c900], %85 {strides = array<i32>} : memref<2x1152xf32, #tpu.memory_space<vmem>>, vector<1x36xf32>,
    %87 = vector.extract_strided_slice %34 {offsets = [26, 0], sizes = [1, 36], strides = [1, 1]} : vector<32x36xf32> to vector<1x36xf32>
    %c0_42 = arith.constant 0 : index
    %c936 = arith.constant 936 : index
    %88 = vector.load %arg11[%c0_42, %c936] : memref<2x1152xf32, #tpu.memory_space<vmem>>, vector<1x36xf32>
    tpu.vector_store %arg11[%c0_42, %c936], %87 {strides = array<i32>} : memref<2x1152xf32, #tpu.memory_space<vmem>>, vector<1x36xf32>,
    %89 = vector.extract_strided_slice %34 {offsets = [27, 0], sizes = [1, 36], strides = [1, 1]} : vector<32x36xf32> to vector<1x36xf32>
    %c0_43 = arith.constant 0 : index
    %c972 = arith.constant 972 : index
    %90 = vector.load %arg11[%c0_43, %c972] : memref<2x1152xf32, #tpu.memory_space<vmem>>, vector<1x36xf32>
    tpu.vector_store %arg11[%c0_43, %c972], %89 {strides = array<i32>} : memref<2x1152xf32, #tpu.memory_space<vmem>>, vector<1x36xf32>,
    %91 = vector.extract_strided_slice %34 {offsets = [28, 0], sizes = [1, 36], strides = [1, 1]} : vector<32x36xf32> to vector<1x36xf32>
    %c0_44 = arith.constant 0 : index
    %c1008 = arith.constant 1008 : index
    %92 = vector.load %arg11[%c0_44, %c1008] : memref<2x1152xf32, #tpu.memory_space<vmem>>, vector<1x36xf32>
    tpu.vector_store %arg11[%c0_44, %c1008], %91 {strides = array<i32>} : memref<2x1152xf32, #tpu.memory_space<vmem>>, vector<1x36xf32>,
    %93 = vector.extract_strided_slice %34 {offsets = [29, 0], sizes = [1, 36], strides = [1, 1]} : vector<32x36xf32> to vector<1x36xf32>
    %c0_45 = arith.constant 0 : index
    %c1044 = arith.constant 1044 : index
    %94 = vector.load %arg11[%c0_45, %c1044] : memref<2x1152xf32, #tpu.memory_space<vmem>>, vector<1x36xf32>
    tpu.vector_store %arg11[%c0_45, %c1044], %93 {strides = array<i32>} : memref<2x1152xf32, #tpu.memory_space<vmem>>, vector<1x36xf32>,
    %95 = vector.extract_strided_slice %34 {offsets = [30, 0], sizes = [1, 36], strides = [1, 1]} : vector<32x36xf32> to vector<1x36xf32>
    %c0_46 = arith.constant 0 : index
    %c1080 = arith.constant 1080 : index
    %96 = vector.load %arg11[%c0_46, %c1080] : memref<2x1152xf32, #tpu.memory_space<vmem>>, vector<1x36xf32>
    tpu.vector_store %arg11[%c0_46, %c1080], %95 {strides = array<i32>} : memref<2x1152xf32, #tpu.memory_space<vmem>>, vector<1x36xf32>,
    %97 = vector.extract_strided_slice %34 {offsets = [31, 0], sizes = [1, 36], strides = [1, 1]} : vector<32x36xf32> to vector<1x36xf32>
    %c0_47 = arith.constant 0 : index
    %c1116 = arith.constant 1116 : index
    %98 = vector.load %arg11[%c0_47, %c1116] : memref<2x1152xf32, #tpu.memory_space<vmem>>, vector<1x36xf32>
    tpu.vector_store %arg11[%c0_47, %c1116], %97 {strides = array<i32>} : memref<2x1152xf32, #tpu.memory_space<vmem>>, vector<1x36xf32>,
    %99 = vector.extract_strided_slice %7 {offsets = [0, 384], sizes = [16, 384], strides = [1, 1]} : vector<16x768xf32> to vector<16x384xf32>
    %cst_48 = arith.constant dense<0.000000e+00> : vector<16x576xf32>
    %100 = tpu.matmul %99, %8, %cst_48 {dimension_numbers = #tpu.dot_dimension_numbers<[1], [0], [0], [1], [0, 0, 1, 1], [], []>} : vector<16x384xf32>, vector<384x576xf32>, vector<16x576xf32> -> vector<16x576xf32>
    %101 = vector.extract_strided_slice %100 {offsets = [0, 0], sizes = [16, 36], strides = [1, 1]} : vector<16x576xf32> to vector<16x36xf32>
    %102 = vector.extract_strided_slice %100 {offsets = [0, 36], sizes = [16, 36], strides = [1, 1]} : vector<16x576xf32> to vector<16x36xf32>
    %103 = vector.extract_strided_slice %100 {offsets = [0, 72], sizes = [16, 36], strides = [1, 1]} : vector<16x576xf32> to vector<16x36xf32>
    %104 = vector.extract_strided_slice %100 {offsets = [0, 108], sizes = [16, 36], strides = [1, 1]} : vector<16x576xf32> to vector<16x36xf32>
    %105 = vector.extract_strided_slice %100 {offsets = [0, 144], sizes = [16, 36], strides = [1, 1]} : vector<16x576xf32> to vector<16x36xf32>
    %106 = vector.extract_strided_slice %100 {offsets = [0, 180], sizes = [16, 36], strides = [1, 1]} : vector<16x576xf32> to vector<16x36xf32>
    %107 = vector.extract_strided_slice %100 {offsets = [0, 216], sizes = [16, 36], strides = [1, 1]} : vector<16x576xf32> to vector<16x36xf32>
    %108 = vector.extract_strided_slice %100 {offsets = [0, 252], sizes = [16, 36], strides = [1, 1]} : vector<16x576xf32> to vector<16x36xf32>
    %109 = vector.extract_strided_slice %100 {offsets = [0, 288], sizes = [16, 36], strides = [1, 1]} : vector<16x576xf32> to vector<16x36xf32>
    %110 = vector.extract_strided_slice %100 {offsets = [0, 324], sizes = [16, 36], strides = [1, 1]} : vector<16x576xf32> to vector<16x36xf32>
    %111 = vector.extract_strided_slice %100 {offsets = [0, 360], sizes = [16, 36], strides = [1, 1]} : vector<16x576xf32> to vector<16x36xf32>
    %112 = vector.extract_strided_slice %100 {offsets = [0, 396], sizes = [16, 36], strides = [1, 1]} : vector<16x576xf32> to vector<16x36xf32>
    %113 = vector.extract_strided_slice %100 {offsets = [0, 432], sizes = [16, 36], strides = [1, 1]} : vector<16x576xf32> to vector<16x36xf32>
    %114 = vector.extract_strided_slice %100 {offsets = [0, 468], sizes = [16, 36], strides = [1, 1]} : vector<16x576xf32> to vector<16x36xf32>
    %115 = vector.extract_strided_slice %100 {offsets = [0, 504], sizes = [16, 36], strides = [1, 1]} : vector<16x576xf32> to vector<16x36xf32>
    %116 = vector.extract_strided_slice %100 {offsets = [0, 540], sizes = [16, 36], strides = [1, 1]} : vector<16x576xf32> to vector<16x36xf32>
    %117 = tpu.concatenate %101, %102, %103, %104, %105, %106, %107, %108, %109, %110, %111, %112, %113, %114, %115, %116 in 0 : vector<16x36xf32>, vector<16x36xf32>, vector<16x36xf32>, vector<16x36xf32>, vector<16x36xf32>, vector<16x36xf32>, vector<16x36xf32>, vector<16x36xf32>, vector<16x36xf32>, vector<16x36xf32>, vector<16x36xf32>, vector<16x36xf32>, vector<16x36xf32>, vector<16x36xf32>, vector<16x36xf32>, vector<16x36xf32> -> vector<256x36xf32>
    %cst_49 = arith.constant dense<0.000000e+00> : vector<32x36xf32>
    %118 = tpu.matmul %9, %117, %cst_49 {dimension_numbers = #tpu.dot_dimension_numbers<[1], [0], [0], [1], [0, 0, 1, 1], [], []>} : vector<32x256xf32>, vector<256x36xf32>, vector<32x36xf32> -> vector<32x36xf32>
    %119 = vector.broadcast %10 : vector<32x1xf32> to vector<32x36xf32>
    %120 = arith.addf %118, %119 : vector<32x36xf32>
    %cst_50 = arith.constant 0.000000e+00 : f32
    %121 = vector.broadcast %cst_50 : f32 to vector<32x36xf32>
    %122 = arith.maximumf %120, %121 : vector<32x36xf32>
    %123 = vector.extract_strided_slice %122 {offsets = [0, 0], sizes = [1, 36], strides = [1, 1]} : vector<32x36xf32> to vector<1x36xf32>
    %c1 = arith.constant 1 : index
    %c0_51 = arith.constant 0 : index
    %124 = vector.load %arg11[%c1, %c0_51] : memref<2x1152xf32, #tpu.memory_space<vmem>>, vector<1x36xf32>
    tpu.vector_store %arg11[%c1, %c0_51], %123 {strides = array<i32>} : memref<2x1152xf32, #tpu.memory_space<vmem>>, vector<1x36xf32>,
    %125 = vector.extract_strided_slice %122 {offsets = [1, 0], sizes = [1, 36], strides = [1, 1]} : vector<32x36xf32> to vector<1x36xf32>
    %c1_52 = arith.constant 1 : index
    %c36_53 = arith.constant 36 : index
    %126 = vector.load %arg11[%c1_52, %c36_53] : memref<2x1152xf32, #tpu.memory_space<vmem>>, vector<1x36xf32>
    tpu.vector_store %arg11[%c1_52, %c36_53], %125 {strides = array<i32>} : memref<2x1152xf32, #tpu.memory_space<vmem>>, vector<1x36xf32>,
    %127 = vector.extract_strided_slice %122 {offsets = [2, 0], sizes = [1, 36], strides = [1, 1]} : vector<32x36xf32> to vector<1x36xf32>
    %c1_54 = arith.constant 1 : index
    %c72_55 = arith.constant 72 : index
    %128 = vector.load %arg11[%c1_54, %c72_55] : memref<2x1152xf32, #tpu.memory_space<vmem>>, vector<1x36xf32>
    tpu.vector_store %arg11[%c1_54, %c72_55], %127 {strides = array<i32>} : memref<2x1152xf32, #tpu.memory_space<vmem>>, vector<1x36xf32>,
    %129 = vector.extract_strided_slice %122 {offsets = [3, 0], sizes = [1, 36], strides = [1, 1]} : vector<32x36xf32> to vector<1x36xf32>
    %c1_56 = arith.constant 1 : index
    %c108_57 = arith.constant 108 : index
    %130 = vector.load %arg11[%c1_56, %c108_57] : memref<2x1152xf32, #tpu.memory_space<vmem>>, vector<1x36xf32>
    tpu.vector_store %arg11[%c1_56, %c108_57], %129 {strides = array<i32>} : memref<2x1152xf32, #tpu.memory_space<vmem>>, vector<1x36xf32>,
    %131 = vector.extract_strided_slice %122 {offsets = [4, 0], sizes = [1, 36], strides = [1, 1]} : vector<32x36xf32> to vector<1x36xf32>
    %c1_58 = arith.constant 1 : index
    %c144_59 = arith.constant 144 : index
    %132 = vector.load %arg11[%c1_58, %c144_59] : memref<2x1152xf32, #tpu.memory_space<vmem>>, vector<1x36xf32>
    tpu.vector_store %arg11[%c1_58, %c144_59], %131 {strides = array<i32>} : memref<2x1152xf32, #tpu.memory_space<vmem>>, vector<1x36xf32>,
    %133 = vector.extract_strided_slice %122 {offsets = [5, 0], sizes = [1, 36], strides = [1, 1]} : vector<32x36xf32> to vector<1x36xf32>
    %c1_60 = arith.constant 1 : index
    %c180_61 = arith.constant 180 : index
    %134 = vector.load %arg11[%c1_60, %c180_61] : memref<2x1152xf32, #tpu.memory_space<vmem>>, vector<1x36xf32>
    tpu.vector_store %arg11[%c1_60, %c180_61], %133 {strides = array<i32>} : memref<2x1152xf32, #tpu.memory_space<vmem>>, vector<1x36xf32>,
    %135 = vector.extract_strided_slice %122 {offsets = [6, 0], sizes = [1, 36], strides = [1, 1]} : vector<32x36xf32> to vector<1x36xf32>
    %c1_62 = arith.constant 1 : index
    %c216_63 = arith.constant 216 : index
    %136 = vector.load %arg11[%c1_62, %c216_63] : memref<2x1152xf32, #tpu.memory_space<vmem>>, vector<1x36xf32>
    tpu.vector_store %arg11[%c1_62, %c216_63], %135 {strides = array<i32>} : memref<2x1152xf32, #tpu.memory_space<vmem>>, vector<1x36xf32>,
    %137 = vector.extract_strided_slice %122 {offsets = [7, 0], sizes = [1, 36], strides = [1, 1]} : vector<32x36xf32> to vector<1x36xf32>
    %c1_64 = arith.constant 1 : index
    %c252_65 = arith.constant 252 : index
    %138 = vector.load %arg11[%c1_64, %c252_65] : memref<2x1152xf32, #tpu.memory_space<vmem>>, vector<1x36xf32>
    tpu.vector_store %arg11[%c1_64, %c252_65], %137 {strides = array<i32>} : memref<2x1152xf32, #tpu.memory_space<vmem>>, vector<1x36xf32>,
    %139 = vector.extract_strided_slice %122 {offsets = [8, 0], sizes = [1, 36], strides = [1, 1]} : vector<32x36xf32> to vector<1x36xf32>
    %c1_66 = arith.constant 1 : index
    %c288_67 = arith.constant 288 : index
    %140 = vector.load %arg11[%c1_66, %c288_67] : memref<2x1152xf32, #tpu.memory_space<vmem>>, vector<1x36xf32>
    tpu.vector_store %arg11[%c1_66, %c288_67], %139 {strides = array<i32>} : memref<2x1152xf32, #tpu.memory_space<vmem>>, vector<1x36xf32>,
    %141 = vector.extract_strided_slice %122 {offsets = [9, 0], sizes = [1, 36], strides = [1, 1]} : vector<32x36xf32> to vector<1x36xf32>
    %c1_68 = arith.constant 1 : index
    %c324_69 = arith.constant 324 : index
    %142 = vector.load %arg11[%c1_68, %c324_69] : memref<2x1152xf32, #tpu.memory_space<vmem>>, vector<1x36xf32>
    tpu.vector_store %arg11[%c1_68, %c324_69], %141 {strides = array<i32>} : memref<2x1152xf32, #tpu.memory_space<vmem>>, vector<1x36xf32>,
    %143 = vector.extract_strided_slice %122 {offsets = [10, 0], sizes = [1, 36], strides = [1, 1]} : vector<32x36xf32> to vector<1x36xf32>
    %c1_70 = arith.constant 1 : index
    %c360_71 = arith.constant 360 : index
    %144 = vector.load %arg11[%c1_70, %c360_71] : memref<2x1152xf32, #tpu.memory_space<vmem>>, vector<1x36xf32>
    tpu.vector_store %arg11[%c1_70, %c360_71], %143 {strides = array<i32>} : memref<2x1152xf32, #tpu.memory_space<vmem>>, vector<1x36xf32>,
    %145 = vector.extract_strided_slice %122 {offsets = [11, 0], sizes = [1, 36], strides = [1, 1]} : vector<32x36xf32> to vector<1x36xf32>
    %c1_72 = arith.constant 1 : index
    %c396_73 = arith.constant 396 : index
    %146 = vector.load %arg11[%c1_72, %c396_73] : memref<2x1152xf32, #tpu.memory_space<vmem>>, vector<1x36xf32>
    tpu.vector_store %arg11[%c1_72, %c396_73], %145 {strides = array<i32>} : memref<2x1152xf32, #tpu.memory_space<vmem>>, vector<1x36xf32>,
    %147 = vector.extract_strided_slice %122 {offsets = [12, 0], sizes = [1, 36], strides = [1, 1]} : vector<32x36xf32> to vector<1x36xf32>
    %c1_74 = arith.constant 1 : index
    %c432_75 = arith.constant 432 : index
    %148 = vector.load %arg11[%c1_74, %c432_75] : memref<2x1152xf32, #tpu.memory_space<vmem>>, vector<1x36xf32>
    tpu.vector_store %arg11[%c1_74, %c432_75], %147 {strides = array<i32>} : memref<2x1152xf32, #tpu.memory_space<vmem>>, vector<1x36xf32>,
    %149 = vector.extract_strided_slice %122 {offsets = [13, 0], sizes = [1, 36], strides = [1, 1]} : vector<32x36xf32> to vector<1x36xf32>
    %c1_76 = arith.constant 1 : index
    %c468_77 = arith.constant 468 : index
    %150 = vector.load %arg11[%c1_76, %c468_77] : memref<2x1152xf32, #tpu.memory_space<vmem>>, vector<1x36xf32>
    tpu.vector_store %arg11[%c1_76, %c468_77], %149 {strides = array<i32>} : memref<2x1152xf32, #tpu.memory_space<vmem>>, vector<1x36xf32>,
    %151 = vector.extract_strided_slice %122 {offsets = [14, 0], sizes = [1, 36], strides = [1, 1]} : vector<32x36xf32> to vector<1x36xf32>
    %c1_78 = arith.constant 1 : index
    %c504_79 = arith.constant 504 : index
    %152 = vector.load %arg11[%c1_78, %c504_79] : memref<2x1152xf32, #tpu.memory_space<vmem>>, vector<1x36xf32>
    tpu.vector_store %arg11[%c1_78, %c504_79], %151 {strides = array<i32>} : memref<2x1152xf32, #tpu.memory_space<vmem>>, vector<1x36xf32>,
    %153 = vector.extract_strided_slice %122 {offsets = [15, 0], sizes = [1, 36], strides = [1, 1]} : vector<32x36xf32> to vector<1x36xf32>
    %c1_80 = arith.constant 1 : index
    %c540_81 = arith.constant 540 : index
    %154 = vector.load %arg11[%c1_80, %c540_81] : memref<2x1152xf32, #tpu.memory_space<vmem>>, vector<1x36xf32>
    tpu.vector_store %arg11[%c1_80, %c540_81], %153 {strides = array<i32>} : memref<2x1152xf32, #tpu.memory_space<vmem>>, vector<1x36xf32>,
    %155 = vector.extract_strided_slice %122 {offsets = [16, 0], sizes = [1, 36], strides = [1, 1]} : vector<32x36xf32> to vector<1x36xf32>
    %c1_82 = arith.constant 1 : index
    %c576_83 = arith.constant 576 : index
    %156 = vector.load %arg11[%c1_82, %c576_83] : memref<2x1152xf32, #tpu.memory_space<vmem>>, vector<1x36xf32>
    tpu.vector_store %arg11[%c1_82, %c576_83], %155 {strides = array<i32>} : memref<2x1152xf32, #tpu.memory_space<vmem>>, vector<1x36xf32>,
    %157 = vector.extract_strided_slice %122 {offsets = [17, 0], sizes = [1, 36], strides = [1, 1]} : vector<32x36xf32> to vector<1x36xf32>
    %c1_84 = arith.constant 1 : index
    %c612_85 = arith.constant 612 : index
    %158 = vector.load %arg11[%c1_84, %c612_85] : memref<2x1152xf32, #tpu.memory_space<vmem>>, vector<1x36xf32>
    tpu.vector_store %arg11[%c1_84, %c612_85], %157 {strides = array<i32>} : memref<2x1152xf32, #tpu.memory_space<vmem>>, vector<1x36xf32>,
    %159 = vector.extract_strided_slice %122 {offsets = [18, 0], sizes = [1, 36], strides = [1, 1]} : vector<32x36xf32> to vector<1x36xf32>
    %c1_86 = arith.constant 1 : index
    %c648_87 = arith.constant 648 : index
    %160 = vector.load %arg11[%c1_86, %c648_87] : memref<2x1152xf32, #tpu.memory_space<vmem>>, vector<1x36xf32>
    tpu.vector_store %arg11[%c1_86, %c648_87], %159 {strides = array<i32>} : memref<2x1152xf32, #tpu.memory_space<vmem>>, vector<1x36xf32>,
    %161 = vector.extract_strided_slice %122 {offsets = [19, 0], sizes = [1, 36], strides = [1, 1]} : vector<32x36xf32> to vector<1x36xf32>
    %c1_88 = arith.constant 1 : index
    %c684_89 = arith.constant 684 : index
    %162 = vector.load %arg11[%c1_88, %c684_89] : memref<2x1152xf32, #tpu.memory_space<vmem>>, vector<1x36xf32>
    tpu.vector_store %arg11[%c1_88, %c684_89], %161 {strides = array<i32>} : memref<2x1152xf32, #tpu.memory_space<vmem>>, vector<1x36xf32>,
    %163 = vector.extract_strided_slice %122 {offsets = [20, 0], sizes = [1, 36], strides = [1, 1]} : vector<32x36xf32> to vector<1x36xf32>
    %c1_90 = arith.constant 1 : index
    %c720_91 = arith.constant 720 : index
    %164 = vector.load %arg11[%c1_90, %c720_91] : memref<2x1152xf32, #tpu.memory_space<vmem>>, vector<1x36xf32>
    tpu.vector_store %arg11[%c1_90, %c720_91], %163 {strides = array<i32>} : memref<2x1152xf32, #tpu.memory_space<vmem>>, vector<1x36xf32>,
    %165 = vector.extract_strided_slice %122 {offsets = [21, 0], sizes = [1, 36], strides = [1, 1]} : vector<32x36xf32> to vector<1x36xf32>
    %c1_92 = arith.constant 1 : index
    %c756_93 = arith.constant 756 : index
    %166 = vector.load %arg11[%c1_92, %c756_93] : memref<2x1152xf32, #tpu.memory_space<vmem>>, vector<1x36xf32>
    tpu.vector_store %arg11[%c1_92, %c756_93], %165 {strides = array<i32>} : memref<2x1152xf32, #tpu.memory_space<vmem>>, vector<1x36xf32>,
    %167 = vector.extract_strided_slice %122 {offsets = [22, 0], sizes = [1, 36], strides = [1, 1]} : vector<32x36xf32> to vector<1x36xf32>
    %c1_94 = arith.constant 1 : index
    %c792_95 = arith.constant 792 : index
    %168 = vector.load %arg11[%c1_94, %c792_95] : memref<2x1152xf32, #tpu.memory_space<vmem>>, vector<1x36xf32>
    tpu.vector_store %arg11[%c1_94, %c792_95], %167 {strides = array<i32>} : memref<2x1152xf32, #tpu.memory_space<vmem>>, vector<1x36xf32>,
    %169 = vector.extract_strided_slice %122 {offsets = [23, 0], sizes = [1, 36], strides = [1, 1]} : vector<32x36xf32> to vector<1x36xf32>
    %c1_96 = arith.constant 1 : index
    %c828_97 = arith.constant 828 : index
    %170 = vector.load %arg11[%c1_96, %c828_97] : memref<2x1152xf32, #tpu.memory_space<vmem>>, vector<1x36xf32>
    tpu.vector_store %arg11[%c1_96, %c828_97], %169 {strides = array<i32>} : memref<2x1152xf32, #tpu.memory_space<vmem>>, vector<1x36xf32>,
    %171 = vector.extract_strided_slice %122 {offsets = [24, 0], sizes = [1, 36], strides = [1, 1]} : vector<32x36xf32> to vector<1x36xf32>
    %c1_98 = arith.constant 1 : index
    %c864_99 = arith.constant 864 : index
    %172 = vector.load %arg11[%c1_98, %c864_99] : memref<2x1152xf32, #tpu.memory_space<vmem>>, vector<1x36xf32>
    tpu.vector_store %arg11[%c1_98, %c864_99], %171 {strides = array<i32>} : memref<2x1152xf32, #tpu.memory_space<vmem>>, vector<1x36xf32>,
    %173 = vector.extract_strided_slice %122 {offsets = [25, 0], sizes = [1, 36], strides = [1, 1]} : vector<32x36xf32> to vector<1x36xf32>
    %c1_100 = arith.constant 1 : index
    %c900_101 = arith.constant 900 : index
    %174 = vector.load %arg11[%c1_100, %c900_101] : memref<2x1152xf32, #tpu.memory_space<vmem>>, vector<1x36xf32>
    tpu.vector_store %arg11[%c1_100, %c900_101], %173 {strides = array<i32>} : memref<2x1152xf32, #tpu.memory_space<vmem>>, vector<1x36xf32>,
    %175 = vector.extract_strided_slice %122 {offsets = [26, 0], sizes = [1, 36], strides = [1, 1]} : vector<32x36xf32> to vector<1x36xf32>
    %c1_102 = arith.constant 1 : index
    %c936_103 = arith.constant 936 : index
    %176 = vector.load %arg11[%c1_102, %c936_103] : memref<2x1152xf32, #tpu.memory_space<vmem>>, vector<1x36xf32>
    tpu.vector_store %arg11[%c1_102, %c936_103], %175 {strides = array<i32>} : memref<2x1152xf32, #tpu.memory_space<vmem>>, vector<1x36xf32>,
    %177 = vector.extract_strided_slice %122 {offsets = [27, 0], sizes = [1, 36], strides = [1, 1]} : vector<32x36xf32> to vector<1x36xf32>
    %c1_104 = arith.constant 1 : index
    %c972_105 = arith.constant 972 : index
    %178 = vector.load %arg11[%c1_104, %c972_105] : memref<2x1152xf32, #tpu.memory_space<vmem>>, vector<1x36xf32>
    tpu.vector_store %arg11[%c1_104, %c972_105], %177 {strides = array<i32>} : memref<2x1152xf32, #tpu.memory_space<vmem>>, vector<1x36xf32>,
    %179 = vector.extract_strided_slice %122 {offsets = [28, 0], sizes = [1, 36], strides = [1, 1]} : vector<32x36xf32> to vector<1x36xf32>
    %c1_106 = arith.constant 1 : index
    %c1008_107 = arith.constant 1008 : index
    %180 = vector.load %arg11[%c1_106, %c1008_107] : memref<2x1152xf32, #tpu.memory_space<vmem>>, vector<1x36xf32>
    tpu.vector_store %arg11[%c1_106, %c1008_107], %179 {strides = array<i32>} : memref<2x1152xf32, #tpu.memory_space<vmem>>, vector<1x36xf32>,
    %181 = vector.extract_strided_slice %122 {offsets = [29, 0], sizes = [1, 36], strides = [1, 1]} : vector<32x36xf32> to vector<1x36xf32>
    %c1_108 = arith.constant 1 : index
    %c1044_109 = arith.constant 1044 : index
    %182 = vector.load %arg11[%c1_108, %c1044_109] : memref<2x1152xf32, #tpu.memory_space<vmem>>, vector<1x36xf32>
    tpu.vector_store %arg11[%c1_108, %c1044_109], %181 {strides = array<i32>} : memref<2x1152xf32, #tpu.memory_space<vmem>>, vector<1x36xf32>,
    %183 = vector.extract_strided_slice %122 {offsets = [30, 0], sizes = [1, 36], strides = [1, 1]} : vector<32x36xf32> to vector<1x36xf32>
    %c1_110 = arith.constant 1 : index
    %c1080_111 = arith.constant 1080 : index
    %184 = vector.load %arg11[%c1_110, %c1080_111] : memref<2x1152xf32, #tpu.memory_space<vmem>>, vector<1x36xf32>
    tpu.vector_store %arg11[%c1_110, %c1080_111], %183 {strides = array<i32>} : memref<2x1152xf32, #tpu.memory_space<vmem>>, vector<1x36xf32>,
    %185 = vector.extract_strided_slice %122 {offsets = [31, 0], sizes = [1, 36], strides = [1, 1]} : vector<32x36xf32> to vector<1x36xf32>
    %c1_112 = arith.constant 1 : index
    %c1116_113 = arith.constant 1116 : index
    %186 = vector.load %arg11[%c1_112, %c1116_113] : memref<2x1152xf32, #tpu.memory_space<vmem>>, vector<1x36xf32>
    tpu.vector_store %arg11[%c1_112, %c1116_113], %185 {strides = array<i32>} : memref<2x1152xf32, #tpu.memory_space<vmem>>, vector<1x36xf32>,
    %c0_114 = arith.constant 0 : index
    %c0_115 = arith.constant 0 : index
    %187 = vector.load %arg11[%c0_114, %c0_115] : memref<2x1152xf32, #tpu.memory_space<vmem>>, vector<2x1152xf32>
    %c0_116 = arith.constant 0 : index
    %c0_117 = arith.constant 0 : index
    %188 = vector.load %arg6[%c0_116, %c0_117] : memref<1152x256xf32, #tpu.memory_space<vmem>>, vector<1152x256xf32>
    %cst_118 = arith.constant dense<0.000000e+00> : vector<2x256xf32>
    %189 = tpu.matmul %187, %188, %cst_118 {dimension_numbers = #tpu.dot_dimension_numbers<[1], [0], [0], [1], [0, 0, 1, 1], [], []>} : vector<2x1152xf32>, vector<1152x256xf32>, vector<2x256xf32> -> vector<2x256xf32>
    %c0_119 = arith.constant 0 : index
    %c0_120 = arith.constant 0 : index
    %190 = vector.load %arg7[%c0_119, %c0_120] : memref<1x256xf32, #tpu.memory_space<vmem>>, vector<1x256xf32>
    %191 = vector.broadcast %190 : vector<1x256xf32> to vector<2x256xf32>
    %192 = arith.addf %189, %191 : vector<2x256xf32>
    %cst_121 = arith.constant 0.000000e+00 : f32
    %193 = vector.broadcast %cst_121 : f32 to vector<2x256xf32>
    %194 = arith.maximumf %192, %193 : vector<2x256xf32>
    %c0_122 = arith.constant 0 : index
    %c0_123 = arith.constant 0 : index
    %195 = vector.load %arg8[%c0_122, %c0_123] : memref<256x2xf32, #tpu.memory_space<vmem>>, vector<256x2xf32>
    %cst_124 = arith.constant dense<0.000000e+00> : vector<2x2xf32>
    %196 = tpu.matmul %194, %195, %cst_124 {dimension_numbers = #tpu.dot_dimension_numbers<[1], [0], [0], [1], [0, 0, 1, 1], [], []>} : vector<2x256xf32>, vector<256x2xf32>, vector<2x2xf32> -> vector<2x2xf32>
    %c0_125 = arith.constant 0 : index
    %c0_126 = arith.constant 0 : index
    %197 = vector.load %arg9[%c0_125, %c0_126] : memref<1x2xf32, #tpu.memory_space<vmem>>, vector<1x2xf32>
    %198 = vector.broadcast %197 : vector<1x2xf32> to vector<2x2xf32>
    %199 = arith.addf %196, %198 : vector<2x2xf32>
    %cst_127 = arith.constant dense<0xFF800000> : vector<2xf32>
    %200 = vector.multi_reduction <maximumf>, %199, %cst_127 [1] : vector<2x2xf32> to vector<2xf32>
    %201 = vector.shape_cast %200 : vector<2xf32> to vector<2x1xf32>
    %202 = vector.broadcast %201 : vector<2x1xf32> to vector<2x2xf32>
    %203 = arith.subf %199, %202 : vector<2x2xf32>
    %204 = math.exp %203 : vector<2x2xf32>
    %cst_128 = arith.constant dense<0.000000e+00> : vector<2xf32>
    %205 = vector.multi_reduction <add>, %204, %cst_128 [1] : vector<2x2xf32> to vector<2xf32>
    %206 = vector.shape_cast %205 : vector<2xf32> to vector<2x1xf32>
    %207 = vector.broadcast %206 : vector<2x1xf32> to vector<2x2xf32>
    %208 = arith.divf %204, %207 : vector<2x2xf32>
    %c0_129 = arith.constant 0 : index
    %c0_130 = arith.constant 0 : index
    %209 = vector.load %arg10[%c0_129, %c0_130] : memref<2x2xf32, #tpu.memory_space<vmem>>, vector<2x2xf32>
    tpu.vector_store %arg10[%c0_129, %c0_130], %208 {strides = array<i32>} : memref<2x2xf32, #tpu.memory_space<vmem>>, vector<2x2xf32>,
    return
  }
}

</mosaic_0001>

<bundles_post_ra>
// kernel: cnn_net_forward.1
= control target key start
LH: loop header
LB: loop body
LE: loop exit
PB: predicated region body
PF: predicated region fallthrough
CT: control target
= control target key end

     0   :  { %v7999_v7 = vmov 0.0   ;;  %v4934_v13 = vmov 0   ;;  %vm98_vm0 = vcmask 523264   ;;  %s7988_s0 = inlined_call_operand.vmem [shape: f32[64,768], index: 0, kind: input, shape index: {}]   ;;  %s7989_s1 = inlined_call_operand.vmem [shape: f32[16,64], index: 1, kind: input, shape index: {}]   ;;  %s7990_s2 = inlined_call_operand.vmem [shape: f32[16,1], index: 2, kind: input, shape index: {}]   ;;  %s7991_s3 = inlined_call_operand.vmem [shape: f32[384,576], index: 3, kind: input, shape index: {}]   ;;  %s7992_s4 = inlined_call_operand.vmem [shape: f32[32,256], index: 4, kind: input, shape index: {}]   ;;  %s7993_s5 = inlined_call_operand.vmem [shape: f32[32,1], index: 5, kind: input, shape index: {}]   ;;  %s7994_s6 = inlined_call_operand.vmem [shape: f32[1152,256], index: 6, kind: input, shape index: {}]   ;;  %s7995_s7 = inlined_call_operand.vmem [shape: f32[1,256], index: 7, kind: input, shape index: {}]   ;;  %s7996_s8 = inlined_call_operand.vmem [shape: f32[256,2], index: 8, kind: input, shape index: {}]   ;;  %s7997_s9 = inlined_call_operand.vmem [shape: f32[1,2], index: 9, kind: input, shape index: {}]   ;;  %s7998_s10 = inlined_call_operand.hbm [shape: f32[2,2], index: 10, kind: output, shape index: {}]  }
   0x1   :  { %v39_v0 = vld [vmem:[%s7988_s0 + $0x8] sm:$0xff]  ;;  %v45_v1 = vld [vmem:[%s7988_s0 + $0x38] sm:$0xff]  ;;  %v38_v5 = vld [vmem:[%s7988_s0] sm:$0xff]  ;;  %169 = vmatprep.mubr.f32.mxu0 %v7999_v7  ;;  %246 = vmatprep.mubr.f32.mxu1 %v7999_v7 }
   0x2   :  { %v41_v2 = vld [vmem:[%s7988_s0 + $0x18] sm:$0xff]  ;;  %v3706_v3 = vpack.c.bf16 %v45_v1, %v39_v0  ;;  %v47_v4 = vld [vmem:[%s7988_s0 + $0x48] sm:$0xff]  ;;  %v44_v6 = vld [vmem:[%s7988_s0 + $0x30] sm:$0xff]  ;;  %4711 = vset.pattern.permute.xlu0 %v4934_v13  ;;  %4902 = vset.pattern.permute.xlu1 %v4934_v13 }
   0x3   :  { %v3722_v8 = vpack.c.bf16 %v47_v4, %v41_v2  ;;  %v3708_v9 = vpack.c.bf16 %v44_v6, %v38_v5  ;;  %v40_v10 = vld [vmem:[%s7988_s0 + $0x10] sm:$0xff]  ;;  %v46_v11 = vld [vmem:[%s7988_s0 + $0x40] sm:$0xff]  ;;  %v51_v12 = vld [vmem:[%s7988_s0 + $0x68] sm:$0xff] }
   0x4   :  { %3707 = vmatprep.subr.bf16.mxu0 %v3706_v3  ;;  %v3724_v14 = vpack.c.bf16 %v46_v11, %v40_v10  ;;  %v57_v15 = vld [vmem:[%s7988_s0 + $0x98] sm:$0xff]  ;;  %v59_v17 = vld [vmem:[%s7988_s0 + $0xa8] sm:$0xff]  ;;  %v50_v20 = vld [vmem:[%s7988_s0 + $0x60] sm:$0xff] }
   0x5   :  { %v53_v16 = vld [vmem:[%s7988_s0 + $0x78] sm:$0xff]  ;;  %3723 = vmatprep.subr.bf16.mxu1 %v3722_v8  ;;  %3709 = vmatpush1.bf16.msra.mxu0 %v3708_v9  ;;  %v3710_v18 = vpack.c.bf16 %v57_v15, %v51_v12  ;;  %v56_v21 = vld [vmem:[%s7988_s0 + $0x90] sm:$0xff]  ;;  %v58_v24 = vld [vmem:[%s7988_s0 + $0xa0] sm:$0xff] }
   0x6   :  { %v3726_v19 = vpack.c.bf16 %v59_v17, %v53_v16  ;;  %v52_v22 = vld [vmem:[%s7988_s0 + $0x70] sm:$0xff]  ;;  %3725 = vmatpush1.bf16.msra.mxu1 %v3724_v14  ;;  %v3712_v23 = vpack.c.bf16 %v56_v21, %v50_v20  ;;  %v63_v25 = vld [vmem:[%s7988_s0 + $0xc8] sm:$0xff]  ;;  %v69_v26 = vld [vmem:[%s7988_s0 + $0xf8] sm:$0xff] }
   0x7   :  { %3711 = vmatprep.subr.bf16.mxu0 %v3710_v18  ;;  %v3728_v27 = vpack.c.bf16 %v58_v24, %v52_v22  ;;  %v3714_v28 = vpack.c.bf16 %v69_v26, %v63_v25  ;;  %v65_v29 = vld [vmem:[%s7988_s0 + $0xd8] sm:$0xff]  ;;  %v71_v30 = vld [vmem:[%s7988_s0 + $0x108] sm:$0xff]  ;;  %v62_v31 = vld [vmem:[%s7988_s0 + $0xc0] sm:$0xff] }
   0x8   :  { %3727 = vmatprep.subr.bf16.mxu1 %v3726_v19  ;;  %v3730_v32 = vpack.c.bf16 %v71_v30, %v65_v29  ;;  %v68_v33 = vld [vmem:[%s7988_s0 + $0xf0] sm:$0xff]  ;;  %v70_v35 = vld [vmem:[%s7988_s0 + $0x100] sm:$0xff]  ;;  %v75_v37 = vld [vmem:[%s7988_s0 + $0x128] sm:$0xff] }
   0x9   :  { %v64_v34 = vld [vmem:[%s7988_s0 + $0xd0] sm:$0xff]  ;;  %3713 = vmatpush1.bf16.msra.mxu0 %v3712_v23  ;;  %v3716_v36 = vpack.c.bf16 %v68_v33, %v62_v31  ;;  %v81_v38 = vld [vmem:[%s7988_s0 + $0x158] sm:$0xff]  ;;  %v83_v42 = vld [vmem:[%s7988_s0 + $0x168] sm:$0xff] }
   0xa   :  { %v77_v39 = vld [vmem:[%s7988_s0 + $0x138] sm:$0xff]  ;;  %3729 = vmatpush1.bf16.msra.mxu1 %v3728_v27  ;;  %3715 = vmatprep.subr.bf16.mxu0 %v3714_v28  ;;  %v3732_v40 = vpack.c.bf16 %v70_v35, %v64_v34  ;;  %v3718_v41 = vpack.c.bf16 %v81_v38, %v75_v37  ;;  %v74_v43 = vld [vmem:[%s7988_s0 + $0x120] sm:$0xff]  ;;  %v80_v44 = vld [vmem:[%s7988_s0 + $0x150] sm:$0xff] }
   0xb   :  { %3731 = vmatprep.subr.bf16.mxu1 %v3730_v32  ;;  %v3734_v45 = vpack.c.bf16 %v83_v42, %v77_v39  ;;  %v76_v46 = vld [vmem:[%s7988_s0 + $0x130] sm:$0xff]  ;;  %v82_v47 = vld [vmem:[%s7988_s0 + $0x160] sm:$0xff]  ;;  %v43_v48 = vld [vmem:[%s7988_s0 + $0x28] sm:$0xff]  ;;  %v3720_v50 = vpack.c.bf16 %v80_v44, %v74_v43 }
   0xc   :  { %v49_v49 = vld [vmem:[%s7988_s0 + $0x58] sm:$0xff]  ;;  %v3736_v51 = vpack.c.bf16 %v82_v47, %v76_v46  ;;  %v42_v53 = vld [vmem:[%s7988_s0 + $0x20] sm:$0xff]  ;;  %v48_v54 = vld [vmem:[%s7988_s0 + $0x50] sm:$0xff] }
   0xd   :  { %3717 = vmatpush1.bf16.msra.mxu0 %v3716_v36  ;;  %v3738_v52 = vpack.c.bf16 %v49_v49, %v43_v48  ;;  %v55_v55 = vld [vmem:[%s7988_s0 + $0x88] sm:$0xff]  ;;  %v61_v56 = vld [vmem:[%s7988_s0 + $0xb8] sm:$0xff]  ;;  %v5142_v57 = vld [vmem:[%s7989_s1] sm:$0xff]  ;;  %v3740_v58 = vpack.c.bf16 %v48_v54, %v42_v53 }
   0xe   :  { %3733 = vmatpush1.bf16.msra.mxu1 %v3732_v40  ;;  %3719 = vmatprep.subr.bf16.mxu0 %v3718_v41  ;;  %v86_v59 = vld [vmem:[%s7990_s2] sm:$0xff]  ;;  %v60_v61 = vld [vmem:[%s7988_s0 + $0xb0] sm:$0xff]  ;;  %v3742_v62 = vpack.c.bf16 %v61_v56, %v55_v55  ;;  %v67_v63 = vld [vmem:[%s7988_s0 + $0xe8] sm:$0xff] }
   0xf   :  { %3735 = vmatprep.subr.bf16.mxu1 %v3734_v45  ;;  %v54_v60 = vld [vmem:[%s7988_s0 + $0x80] sm:$0xff]  ;;  %v73_v0 = vld [vmem:[%s7988_s0 + $0x118] sm:$0xff]  ;;  %90 = vperm.xlu0 %4711, %v86_v59   ;;  %v87_v1 = vld [vmem:[%s7990_s2 + $0x8] sm:$0xff] }
  0x10   :  { %v5169_v2 = vld [vmem:[%s7989_s1 + $0x8] sm:$0xff]  ;;  %v3744_v3 = vpack.c.bf16 %v60_v61, %v54_v60  ;;  %v3746_v4 = vpack.c.bf16 %v73_v0, %v67_v63  ;;  %v66_v5 = vld [vmem:[%s7988_s0 + $0xe0] sm:$0xff]  ;;  %v72_v6 = vld [vmem:[%s7988_s0 + $0x110] sm:$0xff] }
  0x11   :  { %3721 = vmatpush1.bf16.msra.mxu0 %v3720_v50  ;;  %v79_v8 = vld [vmem:[%s7988_s0 + $0x148] sm:$0xff]  ;;  %v85_v9 = vld [vmem:[%s7988_s0 + $0x178] sm:$0xff]  ;;  %v3748_v10 = vpack.c.bf16 %v72_v6, %v66_v5  ;;  %v78_v12 = vld [vmem:[%s7988_s0 + $0x140] sm:$0xff] }
  0x12   :  { %3737 = vmatpush1.bf16.msra.mxu1 %v3736_v51  ;;  %3739 = vmatprep.subr.bf16.mxu0 %v3738_v52  ;;  %v3750_v11 = vpack.c.bf16 %v85_v9, %v79_v8  ;;  %v84_v13 = vld [vmem:[%s7988_s0 + $0x170] sm:$0xff]  ;;  %v349_v14 = vld [vmem:[%s7991_s3 + $0x8] sm:$0xff]  ;;  %v508_v19 = vld [vmem:[%s7991_s3 + $0x500] sm:$0xff] }
  0x13   :  { %95 = vperm.xlu0 %4711, %v87_v1   ;;  %v354_v15 = vld [vmem:[%s7991_s3 + $0x30] sm:$0xff]  ;;  %v3752_v16 = vpack.c.bf16 %v84_v13, %v78_v12  ;;  %v509_v17 = vld [vmem:[%s7991_s3 + $0x508] sm:$0xff]  ;;  %v348_v21 = vld [vmem:[%s7991_s3] sm:$0xff] }
  0x14   :  { %3361 = vmatmul.mubr.msk.f32.vlgmr.msra.gmra.mrb[0].mxu0 %vm98_vm0, %v5142_v57  ;;  %v514_v18 = vld [vmem:[%s7991_s3 + $0x530] sm:$0xff]  ;;  %v5212_v20 = vpack.c.bf16 %v354_v15, %v349_v14  ;;  %v353_v22 = vld [vmem:[%s7991_s3 + $0x28] sm:$0xff]  ;;  %v359_v25 = vld [vmem:[%s7991_s3 + $0x58] sm:$0xff] }
  0x15   :  { %3363 = vmatmul.mubr.msk.f32.vlgmr.msra.gmra.mrb[0].mxu1 %vm98_vm0, %v5142_v57  ;;  %3741 = vmatpush1.bf16.msra.mxu0 %v3740_v58  ;;  %v5220_v23 = vpack.c.bf16 %v514_v18, %v509_v17  ;;  %v513_v24 = vld [vmem:[%s7991_s3 + $0x528] sm:$0xff]  ;;  %v364_v26 = vld [vmem:[%s7991_s3 + $0x80] sm:$0xff]  ;;  %v519_v28 = vld [vmem:[%s7991_s3 + $0x558] sm:$0xff]  ;;  %v5246_v32 = vpack.c.bf16 %v353_v22, %v348_v21 }
  0x16   :  { %175 = vmatprep.mubr.f32.mxu0 %v7999_v7  ;;  %252 = vmatprep.mubr.f32.mxu1 %v7999_v7  ;;  %v5231_v27 = vpack.c.bf16 %v513_v24, %v508_v19  ;;  %v524_v29 = vld [vmem:[%s7991_s3 + $0x580] sm:$0xff]  ;;  %v518_v30 = vld [vmem:[%s7991_s3 + $0x550] sm:$0xff]  ;;  %v523_v31 = vld [vmem:[%s7991_s3 + $0x578] sm:$0xff]  ;;  %v5258_v36 = vpack.c.bf16 %v364_v26, %v359_v25 }
  0x17   :  { %3743 = vmatprep.subr.bf16.mxu0 %v3742_v62  ;;  %3819 = vmatprep.subr.bf16.mxu1 %v5220_v23  ;;  %v358_v33 = vld [vmem:[%s7991_s3 + $0x50] sm:$0xff]  ;;  %v363_v34 = vld [vmem:[%s7991_s3 + $0x78] sm:$0xff]  ;;  %v5255_v35 = vpack.c.bf16 %v524_v29, %v519_v28  ;;  %v369_v37 = vld [vmem:[%s7991_s3 + $0xa8] sm:$0xff]  ;;  %v5263_v38 = vpack.c.bf16 %v523_v31, %v518_v30 }
  0x18   :  { %3362 = vmatmul.mubr.msk.f32.gmra.mrb[2].mxu0 %vm98_vm0, %v5169_v2  ;;  %3821 = vmatpush1.bf16.msra.mxu1 %v5231_v27  ;;  %v529_v39 = vld [vmem:[%s7991_s3 + $0x5a8] sm:$0xff]  ;;  %v534_v40 = vld [vmem:[%s7991_s3 + $0x5d0] sm:$0xff]  ;;  %v528_v43 = vld [vmem:[%s7991_s3 + $0x5a0] sm:$0xff]  ;;  %v5287_v45 = vpack.c.bf16 %v363_v34, %v358_v33 }
  0x19   :  { %3364 = vmatmul.mubr.msk.f32.gmra.mrb[2].mxu1 %vm98_vm0, %v5169_v2  ;;  %3745 = vmatpush1.bf16.msra.mxu0 %v3744_v3  ;;  %v374_v41 = vld [vmem:[%s7991_s3 + $0xd0] sm:$0xff]  ;;  %v5275_v42 = vpack.c.bf16 %v534_v40, %v529_v39  ;;  %v533_v44 = vld [vmem:[%s7991_s3 + $0x5c8] sm:$0xff]  ;;  %v539_v46 = vld [vmem:[%s7991_s3 + $0x5f8] sm:$0xff] }
  0x1a   :  { %3747 = vmatprep.subr.bf16.mxu0 %v3746_v4  ;;  %323 = vmatprep.mubr.f32.mxu0 %v7999_v7  ;;  %v544_v47 = vld [vmem:[%s7991_s3 + $0x620] sm:$0xff]  ;;  %v5296_v48 = vpack.c.bf16 %v374_v41, %v369_v37  ;;  %v373_v50 = vld [vmem:[%s7991_s3 + $0xc8] sm:$0xff]  ;;  %v379_v51 = vld [vmem:[%s7991_s3 + $0xf8] sm:$0xff]  ;;  %v5308_v52 = vpack.c.bf16 %v533_v44, %v528_v43 }
  0x1b   :  { %741 = vmatprep.mubr.f32.mxu1 %v7999_v7  ;;  %3823 = vmatprep.subr.bf16.mxu1 %v5255_v35  ;;  %v368_v49 = vld [vmem:[%s7991_s3 + $0xa0] sm:$0xff]  ;;  %v5314_v54 = vpack.c.bf16 %v544_v47, %v539_v46  ;;  %v538_v55 = vld [vmem:[%s7991_s3 + $0x5f0] sm:$0xff]  ;;  %v543_v56 = vld [vmem:[%s7991_s3 + $0x618] sm:$0xff] }
  0x1c   :  { %3825 = vmatpush1.bf16.msra.mxu1 %v5263_v38  ;;  %8103 = vst [vmem:[#allocation6_spill] sm:$0xff] %v5308_v52  ;;  %v384_v53 = vld [vmem:[%s7991_s3 + $0x120] sm:$0xff]  ;;  %v554_v58 = vld [vmem:[%s7991_s3 + $0x670] sm:$0xff]  ;;  %v5331_v59 = vpack.c.bf16 %v373_v50, %v368_v49  ;;  %v383_v62 = vld [vmem:[%s7991_s3 + $0x118] sm:$0xff]  ;;  %v5346_v0 = vpack.c.bf16 %v543_v56, %v538_v55 }
  0x1d   :  { %3749 = vmatpush1.bf16.msra.mxu0 %v3748_v10  ;;  %3827 = vmatprep.subr.bf16.mxu1 %v5275_v42  ;;  %8104 = vst [vmem:[#allocation7_spill] sm:$0xff] %v5314_v54  ;;  %v5334_v60 = vpack.c.bf16 %v384_v53, %v379_v51  ;;  %v378_v61 = vld [vmem:[%s7991_s3 + $0xf0] sm:$0xff]  ;;  %v389_v63 = vld [vmem:[%s7991_s3 + $0x148] sm:$0xff]  ;;  %v548_v3 = vld [vmem:[%s7991_s3 + $0x640] sm:$0xff] }
  0x1e   :  { %3751 = vmatprep.subr.bf16.mxu0 %v3750_v11  ;;  %8105 = vst [vmem:[#allocation8_spill] sm:$0xff] %v5346_v0  ;;  %v394_v1 = vld [vmem:[%s7991_s3 + $0x170] sm:$0xff]  ;;  %v553_v4 = vld [vmem:[%s7991_s3 + $0x668] sm:$0xff]  ;;  %v559_v5 = vld [vmem:[%s7991_s3 + $0x698] sm:$0xff]  ;;  %v5367_v8 = vpack.c.bf16 %v383_v62, %v378_v61 }
  0x1f   :  { %v564_v6 = vld [vmem:[%s7991_s3 + $0x6c0] sm:$0xff]  ;;  %v5373_v10 = vpack.c.bf16 %v394_v1, %v389_v63  ;;  %v393_v11 = vld [vmem:[%s7991_s3 + $0x168] sm:$0xff]  ;;  %v399_v12 = vld [vmem:[%s7991_s3 + $0x198] sm:$0xff]  ;;  %v5385_v14 = vpack.c.bf16 %v553_v4, %v548_v3 }
  0x20   :  { %3829 = vmatpush1.bf16.msra.mxu1 %v5308_v52  ;;  %v388_v9 = vld [vmem:[%s7991_s3 + $0x140] sm:$0xff]  ;;  %v5388_v15 = vpack.c.bf16 %v564_v6, %v559_v5  ;;  %v563_v17 = vld [vmem:[%s7991_s3 + $0x6b8] sm:$0xff] }
  0x21   :  { %3753 = vmatpush1.bf16.msra.mxu0 %v3752_v16  ;;  %3831 = vmatprep.subr.bf16.mxu1 %v5314_v54  ;;  %v404_v13 = vld [vmem:[%s7991_s3 + $0x1c0] sm:$0xff]  ;;  %8107 = vst [vmem:[#allocation10_spill] sm:$0xff] %v5385_v14  ;;  %v558_v16 = vld [vmem:[%s7991_s3 + $0x690] sm:$0xff] }
  0x22   :  { %3755 = vmatprep.subr.bf16.mxu0 %v5212_v20  ;;  %8108 = vst [vmem:[#allocation11_spill] sm:$0xff] %v5388_v15 }
  0x24   :  { %3365 = vmatmul.mubr.msk.f32.vlgmr.msra.gmra.mrb[4].mxu0 %vm98_vm0, %v5142_v57  ;;  %v549_v57 = vld [vmem:[%s7991_s3 + $0x648] sm:$0xff]  ;;  %3833 = vmatpush1.bf16.msra.mxu1 %v5346_v0 }
  0x25   :  { %329 = vmatprep.mubr.f32.mxu0 %v7999_v7  ;;  %3757 = vmatpush1.bf16.msra.mxu0 %v5246_v32 }
  0x26   :  { %3759 = vmatprep.subr.bf16.mxu0 %v5258_v36 }
  0x28   :  { %3366 = vmatmul.mubr.msk.f32.gmra.mrb[6].mxu0 %vm98_vm0, %v5169_v2  ;;  %v5352_v2 = vpack.c.bf16 %v554_v58, %v549_v57 }
  0x29   :  { %3761 = vmatpush1.bf16.msra.mxu0 %v5287_v45 }
  0x2a   :  { %3763 = vmatprep.subr.bf16.mxu0 %v5296_v48  ;;  %8106 = vst [vmem:[#allocation9_spill] sm:$0xff] %v5352_v2  ;;  %3835 = vmatprep.subr.bf16.mxu1 %v5352_v2 }
  0x2d   :  { %3765 = vmatpush1.bf16.msra.mxu0 %v5331_v59 }
  0x2e   :  { %3767 = vmatprep.subr.bf16.mxu0 %v5334_v60 }
  0x2f   :  { %15 = vsyncpa [#allocation4], 0  ;;  %v569_v18 = vld [vmem:[%s7991_s3 + $0x6e8] sm:$0xff]  ;;  %v574_v19 = vld [vmem:[%s7991_s3 + $0x710] sm:$0xff]  ;;  %v5403_v21 = vpack.c.bf16 %v393_v11, %v388_v9  ;;  %v5406_v22 = vpack.c.bf16 %v404_v13, %v399_v12  ;;  %3837 = vmatpush1.bf16.msra.mxu1 %v5385_v14  ;;  %v5418_v28 = vpack.c.bf16 %v563_v17, %v558_v16  ;;  %v8121_v54 = vmov 0.0   ;;  %s8074_s12 = smov 56  }
  0x30   :  { %v398_v24 = vld [vmem:[%s7991_s3 + $0x190] sm:$0xff]  ;;  %v403_v25 = vld [vmem:[%s7991_s3 + $0x1b8] sm:$0xff]  ;;  %v409_v26 = vld [vmem:[%s7991_s3 + $0x1e8] sm:$0xff]  ;;  %3839 = vmatprep.subr.bf16.mxu1 %v5388_v15  ;;  %v5424_v30 = vpack.c.bf16 %v574_v19, %v569_v18  ;;  %s8072_s13 = smov 92   ;;  %s8086_s14 = smov 24   ;;  %vm1142_vm1 = vcmask 195584  }
  0x31   :  { %3769 = vmatpush1.bf16.msra.mxu0 %v5367_v8  ;;  %8109 = vst [vmem:[#allocation12_spill] sm:$0xff] %v5418_v28  ;;  %v414_v29 = vld [vmem:[%s7991_s3 + $0x210] sm:$0xff]  ;;  %v568_v31 = vld [vmem:[%s7991_s3 + $0x6e0] sm:$0xff]  ;;  %v573_v33 = vld [vmem:[%s7991_s3 + $0x708] sm:$0xff]  ;;  %v5433_v34 = vpack.c.bf16 %v403_v25, %v398_v24  ;;  %s8090_s15 = smov 96   ;;  %s8084_s16 = smov 60  }
  0x32   :  { %3771 = vmatprep.subr.bf16.mxu0 %v5373_v10  ;;  %8110 = vst [vmem:[#allocation13_spill] sm:$0xff] %v5424_v30  ;;  %v5436_v37 = vpack.c.bf16 %v414_v29, %v409_v26  ;;  %v408_v39 = vld [vmem:[%s7991_s3 + $0x1e0] sm:$0xff]  ;;  %v413_v40 = vld [vmem:[%s7991_s3 + $0x208] sm:$0xff]  ;;  %v5445_v41 = vpack.c.bf16 %v573_v33, %v568_v31  ;;  %v419_v43 = vld [vmem:[%s7991_s3 + $0x238] sm:$0xff]  ;;  %s8088_s17 = smov 112   ;;  %s4942_s18 = smov 116  }
  0x33   :  { %3841 = vmatpush1.bf16.msra.mxu1 %v5418_v28  ;;  %v424_v44 = vld [vmem:[%s7991_s3 + $0x260] sm:$0xff]  ;;  %v5455_v46 = vpack.c.bf16 %v413_v40, %v408_v39  ;;  %v418_v49 = vld [vmem:[%s7991_s3 + $0x230] sm:$0xff]  ;;  %v423_v50 = vld [vmem:[%s7991_s3 + $0x258] sm:$0xff]  ;;  %s8078_s19 = smov 76   ;;  %s8092_s20 = smov 80   ;;  %vm1082_vm2 = vcmask 162816  }
  0x34   :  { %8111 = vst [vmem:[#allocation14_spill] sm:$0xff] %v5445_v41  ;;  %3843 = vmatprep.subr.bf16.mxu1 %v5424_v30  ;;  %v5458_v47 = vpack.c.bf16 %v424_v44, %v419_v43  ;;  %v429_v51 = vld [vmem:[%s7991_s3 + $0x288] sm:$0xff]  ;;  %v434_v53 = vld [vmem:[%s7991_s3 + $0x2b0] sm:$0xff]  ;;  %v5474_v55 = vpack.c.bf16 %v423_v50, %v418_v49  ;;  %v428_v57 = vld [vmem:[%s7991_s3 + $0x280] sm:$0xff]  ;;  %s8094_s21 = smov 44   ;;  %s8096_s0 = smov 8  }
  0x35   :  { %3773 = vmatpush1.bf16.msra.mxu0 %v5403_v21  ;;  %v5477_v56 = vpack.c.bf16 %v434_v53, %v429_v51  ;;  %v433_v58 = vld [vmem:[%s7991_s3 + $0x2a8] sm:$0xff]  ;;  %v439_v61 = vld [vmem:[%s7991_s3 + $0x2d8] sm:$0xff]  ;;  %v444_v62 = vld [vmem:[%s7991_s3 + $0x300] sm:$0xff]  ;;  %s8082_s24 = smov 4   ;;  %s8080_s25 = smov 40   ;;  %vm1175_vm3 = vcmask 64512  }
  0x36   :  { %3775 = vmatprep.subr.bf16.mxu0 %v5406_v22  ;;  %v5492_v63 = vpack.c.bf16 %v433_v58, %v428_v57  ;;  %v5495_v1 = vpack.c.bf16 %v444_v62, %v439_v61  ;;  %v438_v3 = vld [vmem:[%s7991_s3 + $0x2d0] sm:$0xff]  ;;  %v443_v4 = vld [vmem:[%s7991_s3 + $0x2f8] sm:$0xff]  ;;  %v449_v5 = vld [vmem:[%s7991_s3 + $0x328] sm:$0xff]  ;;  %s4949_s26 = smov 100   ;;  %vm1115_vm4 = vcmask 31744   ;;  %vm1295_vm5 = vcmask 286720  }
  0x37   :  { %3845 = vmatpush1.bf16.msra.mxu1 %v5445_v41  ;;  %v454_v6 = vld [vmem:[%s7991_s3 + $0x350] sm:$0xff]  ;;  %v5510_v9 = vpack.c.bf16 %v443_v4, %v438_v3  ;;  %v448_v12 = vld [vmem:[%s7991_s3 + $0x320] sm:$0xff]  ;;  %v453_v13 = vld [vmem:[%s7991_s3 + $0x348] sm:$0xff]  ;;  %s4951_s23 = smov 108   ;;  %s4952_s2 = smov 124   ;;  %vm1310_vm6 = vcmask 581920  }
  0x38   :  { %v5513_v11 = vpack.c.bf16 %v454_v6, %v449_v5  ;;  %v459_v16 = vld [vmem:[%s7991_s3 + $0x378] sm:$0xff]  ;;  %v464_v17 = vld [vmem:[%s7991_s3 + $0x3a0] sm:$0xff]  ;;  %v5528_v18 = vpack.c.bf16 %v453_v13, %v448_v12  ;;  %v458_v24 = vld [vmem:[%s7991_s3 + $0x370] sm:$0xff]  ;;  %s4953_s27 = smov 36   ;;  %s4954_s28 = smov 120   ;;  %vm1326_vm7 = vcmask 1041248  }
  0x39   :  { %3777 = vmatpush1.bf16.msra.mxu0 %v5433_v34  ;;  %v5531_v19 = vpack.c.bf16 %v464_v17, %v459_v16  ;;  %v463_v25 = vld [vmem:[%s7991_s3 + $0x398] sm:$0xff]  ;;  %v469_v26 = vld [vmem:[%s7991_s3 + $0x3c8] sm:$0xff]  ;;  %v474_v29 = vld [vmem:[%s7991_s3 + $0x3f0] sm:$0xff]  ;;  %s4955_s29 = smov 72   ;;  %s4956_s1 = smov 16   ;;  %vm1327_vm8 = vcmask 124930  }
  0x3a   :  { %3779 = vmatprep.subr.bf16.mxu0 %v5436_v37  ;;  %v5546_v31 = vpack.c.bf16 %v463_v25, %v458_v24  ;;  %v5549_v33 = vpack.c.bf16 %v474_v29, %v469_v26  ;;  %v468_v39 = vld [vmem:[%s7991_s3 + $0x3c0] sm:$0xff]  ;;  %v473_v40 = vld [vmem:[%s7991_s3 + $0x3e8] sm:$0xff]  ;;  %v479_v43 = vld [vmem:[%s7991_s3 + $0x418] sm:$0xff]  ;;  %s4958_s30 = smov 88   ;;  %s4959_s11 = smov 104   ;;  %vm1323_vm9 = vcmask 883712  }
  0x3b   :  { %v484_v44 = vld [vmem:[%s7991_s3 + $0x440] sm:$0xff]  ;;  %v5564_v49 = vpack.c.bf16 %v473_v40, %v468_v39  ;;  %v478_v51 = vld [vmem:[%s7991_s3 + $0x410] sm:$0xff]  ;;  %v483_v53 = vld [vmem:[%s7991_s3 + $0x438] sm:$0xff]  ;;  %s4960_s22 = smov 32   ;;  %vm1316_vm10 = vcmask 877120   ;;  %vm1341_vm12 = vcmask 417920  }
  0x3c   :  { %v5567_v50 = vpack.c.bf16 %v484_v44, %v479_v43  ;;  %v489_v57 = vld [vmem:[%s7991_s3 + $0x468] sm:$0xff]  ;;  %v494_v58 = vld [vmem:[%s7991_s3 + $0x490] sm:$0xff]  ;;  %v5582_v61 = vpack.c.bf16 %v483_v53, %v478_v51  ;;  %v488_v3 = vld [vmem:[%s7991_s3 + $0x460] sm:$0xff]  ;;  %vm1348_vm13 = vcmask 713120   ;;  %vm1364_vm14 = vcmask 1041376  }
  0x3d   :  { %3781 = vmatpush1.bf16.msra.mxu0 %v5455_v46  ;;  %v5585_v62 = vpack.c.bf16 %v494_v58, %v489_v57  ;;  %v493_v4 = vld [vmem:[%s7991_s3 + $0x488] sm:$0xff]  ;;  %v579_v6 = vld [vmem:[%s7991_s3 + $0x738] sm:$0xff]  ;;  %v584_v12 = vld [vmem:[%s7991_s3 + $0x760] sm:$0xff]  ;;  %vm1365_vm15 = vcmask 256002   ;;  %vm8098_vm0 = vcmask 1014784  }
  0x3e   :  { %3783 = vmatprep.subr.bf16.mxu0 %v5458_v47  ;;  %v5594_v5 = vpack.c.bf16 %v493_v4, %v488_v3  ;;  %v5604_v13 = vpack.c.bf16 %v584_v12, %v579_v6  ;;  %v578_v16 = vld [vmem:[%s7991_s3 + $0x730] sm:$0xff]  ;;  %v583_v17 = vld [vmem:[%s7991_s3 + $0x758] sm:$0xff]  ;;  %v504_v26 = vld [vmem:[%s7991_s3 + $0x4e0] sm:$0xff] }
  0x3f   :  { %v5612_v24 = vpack.c.bf16 %v583_v17, %v578_v16  ;;  %v499_v25 = vld [vmem:[%s7991_s3 + $0x4b8] sm:$0xff]  ;;  %v498_v39 = vld [vmem:[%s7991_s3 + $0x4b0] sm:$0xff]  ;;  %v432_v44 = vld [vmem:[%s7991_s3 + $0x2a0] sm:$0xff] }
  0x40   :  { %8112 = vst [vmem:[#allocation15_spill] sm:$0xff] %v5604_v13  ;;  %3847 = vmatprep.subr.bf16.mxu1 %v5604_v13  ;;  %v5621_v29 = vpack.c.bf16 %v504_v26, %v499_v25  ;;  %v503_v40 = vld [vmem:[%s7991_s3 + $0x4d8] sm:$0xff]  ;;  %v437_v51 = vld [vmem:[%s7991_s3 + $0x2c8] sm:$0xff]  ;;  %v356_v58 = vld [vmem:[%s7991_s3 + $0x40] sm:$0xff] }
  0x41   :  { %3785 = vmatpush1.bf16.msra.mxu0 %v5474_v55  ;;  %8113 = vst [vmem:[#allocation16_spill] sm:$0xff] %v5612_v24  ;;  %3849 = vmatpush1.bf16.msra.mxu1 %v5612_v24  ;;  %v5630_v43 = vpack.c.bf16 %v503_v40, %v498_v39  ;;  %v5639_v53 = vpack.c.bf16 %v437_v51, %v432_v44  ;;  %v351_v57 = vld [vmem:[%s7991_s3 + $0x18] sm:$0xff]  ;;  %v352_v12 = vld [vmem:[%s7991_s3 + $0x20] sm:$0xff]  ;;  %v357_v16 = vld [vmem:[%s7991_s3 + $0x48] sm:$0xff] }
  0x42   :  { %3787 = vmatprep.subr.bf16.mxu0 %v5477_v56  ;;  %v5649_v3 = vpack.c.bf16 %v356_v58, %v351_v57  ;;  %v350_v39 = vld [vmem:[%s7991_s3 + $0x10] sm:$0xff]  ;;  %v355_v40 = vld [vmem:[%s7991_s3 + $0x38] sm:$0xff]  ;;  %v361_v7 = vld [vmem:[%s7991_s3 + $0x68] sm:$0xff] }
  0x43   :  { %8114 = vst [vmem:[#allocation17_spill] sm:$0xff] %v5639_v53  ;;  %3947 = vmatprep.subr.bf16.mxu1 %v5639_v53  ;;  %v442_v44 = vld [vmem:[%s7991_s3 + $0x2f0] sm:$0xff]  ;;  %v5689_v41 = vpack.c.bf16 %v355_v40, %v350_v39  ;;  %v367_v28 = vld [vmem:[%s7991_s3 + $0x98] sm:$0xff]  ;;  %v452_v39 = vld [vmem:[%s7991_s3 + $0x340] sm:$0xff] }
  0x44   :  { %8115 = vst [vmem:[#allocation18_spill] sm:$0xff] %v5649_v3  ;;  %v366_v53 = vld [vmem:[%s7991_s3 + $0x90] sm:$0xff]  ;;  %v457_v40 = vld [vmem:[%s7991_s3 + $0x368] sm:$0xff]  ;;  %vm6735_vm11 = vmor %vm1327_vm8, %vm1326_vm7  ;;  %vm1396_vm7 = vcmask 92162   ;;  %vm8101_vm8 = vcmask 850944  }
  0x45   :  { %3789 = vmatpush1.bf16.msra.mxu0 %v5492_v63  ;;  %8117 = vst [vmem:[#allocation20_spill] sm:$0xff] %v5689_v41  ;;  %v362_v30 = vld [vmem:[%s7991_s3 + $0x70] sm:$0xff]  ;;  %v5701_v14 = vpack.c.bf16 %v366_v53, %v361_v7  ;;  %v360_v7 = vld [vmem:[%s7991_s3 + $0x60] sm:$0xff]  ;;  %v365_v53 = vld [vmem:[%s7991_s3 + $0x88] sm:$0xff] }
  0x46   :  { %3791 = vmatprep.subr.bf16.mxu0 %v5495_v1 }
  0x47   :  { %8119 = vst [vmem:[#allocation22_spill] sm:$0xff] %v5701_v14 }
  0x49   :  { %3793 = vmatpush1.bf16.msra.mxu0 %v5510_v9 }
  0x4a   :  { %3795 = vmatprep.subr.bf16.mxu0 %v5513_v11 }
  0x4d   :  { %3797 = vmatpush1.bf16.msra.mxu0 %v5528_v18 }
  0x4e   :  { %3799 = vmatprep.subr.bf16.mxu0 %v5531_v19 }
  0x51   :  { %3801 = vmatpush1.bf16.msra.mxu0 %v5546_v31 }
  0x52   :  { %3803 = vmatprep.subr.bf16.mxu0 %v5549_v33 }
  0x55   :  { %3805 = vmatpush1.bf16.msra.mxu0 %v5564_v49 }
  0x56   :  { %3807 = vmatprep.subr.bf16.mxu0 %v5567_v50 }
  0x59   :  { %3809 = vmatpush1.bf16.msra.mxu0 %v5582_v61 }
  0x5a   :  { %3811 = vmatprep.subr.bf16.mxu0 %v5585_v62 }
  0x5d   :  { %3813 = vmatpush1.bf16.msra.mxu0 %v5594_v5 }
  0x5e   :  { %3815 = vmatprep.subr.bf16.mxu0 %v5621_v29 }
  0x61   :  { %3817 = vmatpush1.bf16.msra.mxu0 %v5630_v43 }
  0x62   :  { %3851 = vmatprep.subr.bf16.mxu0 %v5649_v3  ;;  %v5683_v3 = vpack.c.bf16 %v357_v16, %v352_v12 }
  0x64   :  { %8116 = vst [vmem:[#allocation19_spill] sm:$0xff] %v5683_v3 }
  0x8e   :  { %v5652_v4 = vpop.permute.xlu0 %90 }
  0xe7   :  { %v171_v6 = vpop.f32.mrb[0].mxu0 }
  0xe8   :  { %v172_v17 = vadd.f32 %v171_v6, %v5652_v4  ;;  %v248_v25 = vpop.f32.mrb[0].mxu1  ;;  %v173_v26 = vpop.f32.mrb[1].mxu0  ;;  %v447_v6 = vld [vmem:[%s7991_s3 + $0x318] sm:$0xff] }
  0xe9   :  { %v249_v51 = vadd.f32 %v248_v25, %v5652_v4  ;;  %v174_v57 = vadd.f32 %v173_v26, %v5652_v4  ;;  %v5672_v58 = vpop.f32.mrb[1].mxu1  ;;  %v5687_v25 = vpop.permute.xlu0 %95 }
  0xea   :  { %v5697_v15 = vmax.f32 %v172_v17, 0.0 }
  0xeb   :  { %v5685_v24 = vmax.f32 %v249_v51, 0.0  ;;  %v337_v26 = vmax.f32 %v174_v57, 0.0  ;;  %v177_v13 = vpop.f32.mrb[2].mxu0  ;;  %v5699_v51 = vpack.c.bf16 %v447_v6, %v442_v44  ;;  %v371_v44 = vld [vmem:[%s7991_s3 + $0xb8] sm:$0xff]  ;;  %v376_v6 = vld [vmem:[%s7991_s3 + $0xe0] sm:$0xff] }
  0xec   :  { %v254_v12 = vpop.f32.mrb[2].mxu1  ;;  %v179_v16 = vpop.f32.mrb[3].mxu0  ;;  %v178_v57 = vadd.f32 %v177_v13, %v5687_v25  ;;  %v5723_v13 = vpack.c.bf16 %v367_v28, %v362_v30  ;;  %v372_v28 = vld [vmem:[%s7991_s3 + $0xc0] sm:$0xff]  ;;  %v377_v30 = vld [vmem:[%s7991_s3 + $0xe8] sm:$0xff] }
  0xed   :  { %8118 = vst [vmem:[#allocation21_spill] sm:$0xff] %v5699_v51  ;;  %v255_v2 = vadd.f32 %v254_v12, %v5687_v25  ;;  %v180_v17 = vadd.f32 %v179_v16, %v5687_v25  ;;  %v5712_v0 = vpop.f32.mrb[3].mxu1  ;;  %742 = vmatmul.mubr.f32.vlgmr.msra.gmra.mrb[4].mxu1 %v5685_v24  ;;  %664 = vmatprep.mubr.f32.mxu0 %v337_v26 }
  0xee   :  { %3949 = vmatpush3.bf16.msra.mxu1 %v5683_v3  ;;  %665 = vmatmul.mubr.f32.vlgmr.msra.gmra.mrb[8].mxu0 %v5697_v15  ;;  %8120 = vst [vmem:[#allocation23_spill] sm:$0xff] %v5723_v13  ;;  %v5737_v3 = vpack.c.bf16 %v457_v40, %v452_v39  ;;  %v467_v39 = vld [vmem:[%s7991_s3 + $0x3b8] sm:$0xff]  ;;  %v5755_v40 = vmax.f32 %v178_v57, 0.0  ;;  %v381_v57 = vld [vmem:[%s7991_s3 + $0x108] sm:$0xff] }
  0xef   :  { %v5731_v12 = vmax.f32 %v255_v2, 0.0  ;;  %v5733_v16 = vmax.f32 %v180_v17, 0.0  ;;  %3853 = vmatpush1.bf16.msra.mxu0 %v5689_v41  ;;  %747 = vmatprep.mubr.f32.mxu1 %v8121_v54  ;;  %v5747_v2 = vpack.c.bf16 %v365_v53, %v360_v7  ;;  %v462_v17 = vld [vmem:[%s7991_s3 + $0x390] sm:$0xff]  ;;  %v5759_v41 = vpack.c.bf16 %v376_v6, %v371_v44  ;;  %v375_v53 = vld [vmem:[%s7991_s3 + $0xd8] sm:$0xff] }
  0xf0   :  { %8122 = vst [vmem:[#allocation24_spill] sm:$0xff] %v5737_v3  ;;  %3951 = vmatprep.subr.bf16.mxu1 %v5699_v51  ;;  %3855 = vmatprep.subr.bf16.mxu0 %v5701_v14  ;;  %v370_v7 = vld [vmem:[%s7991_s3 + $0xb0] sm:$0xff]  ;;  %v5768_v51 = vpack.c.bf16 %v377_v30, %v372_v28  ;;  %v5778_v6 = vpack.c.bf16 %v467_v39, %v462_v17  ;;  %v387_v28 = vld [vmem:[%s7991_s3 + $0x138] sm:$0xff]  ;;  %v472_v14 = vld [vmem:[%s7991_s3 + $0x3e0] sm:$0xff] }
  0xf1   :  { %8123 = vst [vmem:[#allocation25_spill] sm:$0xff] %v5747_v2  ;;  %748 = vmatmul.mubr.f32.gmra.mrb[6].mxu1 %v5731_v12  ;;  %670 = vmatprep.mubr.f32.mxu0 %v5733_v16  ;;  %8124 = vst [vmem:[#allocation26_spill] sm:$0xff] %v5759_v41  ;;  %v386_v44 = vld [vmem:[%s7991_s3 + $0x130] sm:$0xff]  ;;  %v5787_v30 = vpack.c.bf16 %v375_v53, %v370_v7  ;;  %v477_v17 = vld [vmem:[%s7991_s3 + $0x408] sm:$0xff] }
  0xf2   :  { %3953 = vmatpush3.bf16.msra.mxu1 %v5723_v13  ;;  %972 = vmatprep.mubr.f32.mxu1 %v337_v26  ;;  %8125 = vst [vmem:[#allocation27_spill] sm:$0xff] %v5768_v51  ;;  %8126 = vst [vmem:[#allocation28_spill] sm:$0xff] %v5778_v6  ;;  %v382_v13 = vld [vmem:[%s7991_s3 + $0x110] sm:$0xff]  ;;  %v5796_v39 = vpack.c.bf16 %v386_v44, %v381_v57  ;;  %v391_v53 = vld [vmem:[%s7991_s3 + $0x158] sm:$0xff] }
  0xf3   :  { %671 = vmatmul.mubr.f32.gmra.mrb[10].mxu0 %v5755_v40  ;;  %3955 = vmatprep.subr.bf16.mxu1 %v5737_v3  ;;  %8127 = vst [vmem:[#allocation29_spill] sm:$0xff] %v5787_v30  ;;  %v380_v3 = vld [vmem:[%s7991_s3 + $0x100] sm:$0xff]  ;;  %v5805_v7 = vpack.c.bf16 %v387_v28, %v382_v13  ;;  %v397_v13 = vld [vmem:[%s7991_s3 + $0x188] sm:$0xff] }
  0xf4   :  { %3857 = vmatpush1.bf16.msra.mxu0 %v5747_v2  ;;  %818 = vmatprep.mubr.f32.mxu0 %v337_v26  ;;  %8128 = vst [vmem:[#allocation30_spill] sm:$0xff] %v5796_v39  ;;  %v385_v26 = vld [vmem:[%s7991_s3 + $0x128] sm:$0xff]  ;;  %v396_v57 = vld [vmem:[%s7991_s3 + $0x180] sm:$0xff] }
  0xf5   :  { %3859 = vmatprep.subr.bf16.mxu0 %v5759_v41  ;;  %8129 = vst [vmem:[#allocation31_spill] sm:$0xff] %v5805_v7  ;;  %v5816_v41 = vpack.c.bf16 %v477_v17, %v472_v14  ;;  %v5827_v2 = vpack.c.bf16 %v385_v26, %v380_v3  ;;  %v487_v14 = vld [vmem:[%s7991_s3 + $0x458] sm:$0xff]  ;;  %v5836_v17 = vpack.c.bf16 %v396_v57, %v391_v53  ;;  %v406_v53 = vld [vmem:[%s7991_s3 + $0x1d0] sm:$0xff] }
  0xf6   :  { %3957 = vmatpush3.bf16.msra.mxu1 %v5768_v51  ;;  %v392_v51 = vld [vmem:[%s7991_s3 + $0x160] sm:$0xff]  ;;  %v395_v3 = vld [vmem:[%s7991_s3 + $0x178] sm:$0xff] }
  0xf7   :  { %v5813_v44 = vpop.f32.mrb[4].mxu0  ;;  %3959 = vmatprep.subr.bf16.mxu1 %v5778_v6  ;;  %8130 = vst [vmem:[#allocation32_spill] sm:$0xff] %v5816_v41  ;;  %8132 = vst [vmem:[#allocation34_spill] sm:$0xff] %v5827_v2  ;;  %v482_v6 = vld [vmem:[%s7991_s3 + $0x430] sm:$0xff]  ;;  %v5845_v26 = vpack.c.bf16 %v397_v13, %v392_v51  ;;  %v407_v51 = vld [vmem:[%s7991_s3 + $0x1d8] sm:$0xff] }
  0xf8   :  { %3861 = vmatpush1.bf16.msra.mxu0 %v5787_v30  ;;  %v5825_v28 = vpop.f32.mrb[5].mxu0  ;;  %8133 = vst [vmem:[#allocation35_spill] sm:$0xff] %v5836_v17  ;;  %v390_v30 = vld [vmem:[%s7991_s3 + $0x150] sm:$0xff] }
  0xf9   :  { %8131 = vst [vmem:[#allocation33_spill] sm:$0xff] %v5825_v28  ;;  %3863 = vmatprep.subr.bf16.mxu0 %v5796_v39  ;;  %8134 = vst [vmem:[#allocation36_spill] sm:$0xff] %v5845_v26  ;;  %v401_v28 = vld [vmem:[%s7991_s3 + $0x1a8] sm:$0xff]  ;;  %v5856_v39 = vpack.c.bf16 %v487_v14, %v482_v6  ;;  %v5867_v52 = vpack.c.bf16 %v395_v3, %v390_v30 }
  0xfa   :  { %3961 = vmatpush3.bf16.msra.mxu1 %v5805_v7  ;;  %v402_v7 = vld [vmem:[%s7991_s3 + $0x1b0] sm:$0xff]  ;;  %v497_v6 = vld [vmem:[%s7991_s3 + $0x4a8] sm:$0xff]  ;;  %v5876_v14 = vpack.c.bf16 %v406_v53, %v401_v28  ;;  %v416_v28 = vld [vmem:[%s7991_s3 + $0x220] sm:$0xff] }
  0xfb   :  { %v5853_v57 = vpop.f32.mrb[6].mxu0  ;;  %3963 = vmatprep.subr.bf16.mxu1 %v5816_v41  ;;  %8135 = vst [vmem:[#allocation37_spill] sm:$0xff] %v5856_v39  ;;  %8137 = vst [vmem:[#allocation39_spill] sm:$0xff] %v5867_v52  ;;  %v492_v41 = vld [vmem:[%s7991_s3 + $0x480] sm:$0xff]  ;;  %v405_v30 = vld [vmem:[%s7991_s3 + $0x1c8] sm:$0xff]  ;;  %v5885_v3 = vpack.c.bf16 %v407_v51, %v402_v7 }
  0xfc   :  { %3865 = vmatpush1.bf16.msra.mxu0 %v5827_v2  ;;  %v5865_v13 = vpop.f32.mrb[7].mxu0  ;;  %8138 = vst [vmem:[#allocation40_spill] sm:$0xff] %v5876_v14  ;;  %v400_v2 = vld [vmem:[%s7991_s3 + $0x1a0] sm:$0xff]  ;;  %v5894_v53 = vpack.c.bf16 %v497_v6, %v492_v41  ;;  %v417_v7 = vld [vmem:[%s7991_s3 + $0x228] sm:$0xff]  ;;  %v507_v41 = vld [vmem:[%s7991_s3 + $0x4f8] sm:$0xff] }
  0xfd   :  { %8136 = vst [vmem:[#allocation38_spill] sm:$0xff] %v5865_v13  ;;  %3867 = vmatprep.subr.bf16.mxu0 %v5836_v17  ;;  %8139 = vst [vmem:[#allocation41_spill] sm:$0xff] %v5885_v3  ;;  %v411_v13 = vld [vmem:[%s7991_s3 + $0x1f8] sm:$0xff]  ;;  %v412_v17 = vld [vmem:[%s7991_s3 + $0x200] sm:$0xff]  ;;  %v5903_v51 = vpack.c.bf16 %v405_v30, %v400_v2 }
  0xfe   :  { %3965 = vmatpush3.bf16.msra.mxu1 %v5845_v26  ;;  %8140 = vst [vmem:[#allocation42_spill] sm:$0xff] %v5894_v53  ;;  %v502_v26 = vld [vmem:[%s7991_s3 + $0x4d0] sm:$0xff]  ;;  %v5912_v6 = vpack.c.bf16 %v416_v28, %v411_v13  ;;  %v415_v2 = vld [vmem:[%s7991_s3 + $0x218] sm:$0xff]  ;;  %v5921_v30 = vpack.c.bf16 %v417_v7, %v412_v17 }
  0xff   :  { %3967 = vmatprep.subr.bf16.mxu1 %v5856_v39  ;;  %v410_v39 = vld [vmem:[%s7991_s3 + $0x1f0] sm:$0xff]  ;;  %v5930_v28 = vpack.c.bf16 %v507_v41, %v502_v26  ;;  %v427_v17 = vld [vmem:[%s7991_s3 + $0x278] sm:$0xff]  ;;  %v420_v26 = vld [vmem:[%s7991_s3 + $0x240] sm:$0xff] }
 0x100   :  { %3869 = vmatpush1.bf16.msra.mxu0 %v5867_v52  ;;  %8141 = vst [vmem:[#allocation43_spill] sm:$0xff] %v5921_v30  ;;  %v421_v52 = vld [vmem:[%s7991_s3 + $0x248] sm:$0xff]  ;;  %v426_v13 = vld [vmem:[%s7991_s3 + $0x270] sm:$0xff]  ;;  %v5939_v7 = vpack.c.bf16 %v415_v2, %v410_v39  ;;  %v431_v39 = vld [vmem:[%s7991_s3 + $0x298] sm:$0xff] }
 0x101   :  { %3871 = vmatprep.subr.bf16.mxu0 %v5876_v14  ;;  %8142 = vst [vmem:[#allocation44_spill] sm:$0xff] %v5930_v28  ;;  %v422_v14 = vld [vmem:[%s7991_s3 + $0x250] sm:$0xff]  ;;  %v425_v41 = vld [vmem:[%s7991_s3 + $0x268] sm:$0xff] }
 0x102   :  { %3969 = vmatpush3.bf16.msra.mxu1 %v5885_v3  ;;  %v5942_v3 = vpack.c.bf16 %v426_v13, %v421_v52  ;;  %v436_v52 = vld [vmem:[%s7991_s3 + $0x2c0] sm:$0xff]  ;;  %v5961_v2 = vpack.c.bf16 %v425_v41, %v420_v26  ;;  %v446_v26 = vld [vmem:[%s7991_s3 + $0x310] sm:$0xff] }
 0x103   :  { %3971 = vmatprep.subr.bf16.mxu1 %v5894_v53  ;;  %v5951_v53 = vpack.c.bf16 %v427_v17, %v422_v14  ;;  %v5964_v13 = vpack.c.bf16 %v436_v52, %v431_v39  ;;  %v430_v14 = vld [vmem:[%s7991_s3 + $0x290] sm:$0xff]  ;;  %v435_v17 = vld [vmem:[%s7991_s3 + $0x2b8] sm:$0xff]  ;;  %v440_v52 = vld [vmem:[%s7991_s3 + $0x2e0] sm:$0xff] }
 0x104   :  { %3873 = vmatpush1.bf16.msra.mxu0 %v5903_v51  ;;  %8144 = vst [vmem:[#allocation46_spill] sm:$0xff] %v5961_v2  ;;  %v5980_v41 = vpack.c.bf16 %v435_v17, %v430_v14  ;;  %v451_v14 = vld [vmem:[%s7991_s3 + $0x338] sm:$0xff]  ;;  %v456_v17 = vld [vmem:[%s7991_s3 + $0x360] sm:$0xff] }
 0x105   :  { %3875 = vmatprep.subr.bf16.mxu0 %v5912_v6  ;;  %8143 = vst [vmem:[#allocation45_spill] sm:$0xff] %v5951_v53  ;;  %8145 = vst [vmem:[#allocation47_spill] sm:$0xff] %v5964_v13 }
 0x106   :  { %3973 = vmatpush3.bf16.msra.mxu1 %v5921_v30  ;;  %8146 = vst [vmem:[#allocation48_spill] sm:$0xff] %v5980_v41  ;;  %v450_v30 = vld [vmem:[%s7991_s3 + $0x330] sm:$0xff] }
 0x107   :  { %3975 = vmatprep.subr.bf16.mxu1 %v5930_v28  ;;  %v441_v28 = vld [vmem:[%s7991_s3 + $0x2e8] sm:$0xff] }
 0x108   :  { %3877 = vmatpush1.bf16.msra.mxu0 %v5939_v7  ;;  %v5984_v39 = vpack.c.bf16 %v446_v26, %v441_v28  ;;  %v6004_v26 = vpack.c.bf16 %v456_v17, %v451_v14  ;;  %v460_v17 = vld [vmem:[%s7991_s3 + $0x380] sm:$0xff] }
 0x109   :  { %3879 = vmatprep.subr.bf16.mxu0 %v5942_v3 }
 0x10a   :  { %3977 = vmatpush3.bf16.msra.mxu1 %v5951_v53  ;;  %8147 = vst [vmem:[#allocation49_spill] sm:$0xff] %v5984_v39  ;;  %v445_v53 = vld [vmem:[%s7991_s3 + $0x308] sm:$0xff]  ;;  %8149 = vst [vmem:[#allocation51_spill] sm:$0xff] %v6004_v26 }
 0x10b   :  { %v6000_v28 = vpack.c.bf16 %v445_v53, %v440_v52  ;;  %v466_v53 = vld [vmem:[%s7991_s3 + $0x3b0] sm:$0xff] }
 0x10c   :  { %3881 = vmatpush1.bf16.msra.mxu0 %v5961_v2  ;;  %v471_v2 = vld [vmem:[%s7991_s3 + $0x3d8] sm:$0xff] }
 0x10d   :  { %973 = vmatmul.mubr.f32.vlgmr.msra.gmra.mrb[8].mxu1 %v5697_v15  ;;  %3883 = vmatprep.subr.bf16.mxu0 %v5964_v13  ;;  %8148 = vst [vmem:[#allocation50_spill] sm:$0xff] %v6000_v28  ;;  %v455_v13 = vld [vmem:[%s7991_s3 + $0x358] sm:$0xff] }
 0x10e   :  { %977 = vmatprep.mubr.f32.mxu1 %v5733_v16  ;;  %v6019_v52 = vpack.c.bf16 %v455_v13, %v450_v30  ;;  %v476_v30 = vld [vmem:[%s7991_s3 + $0x400] sm:$0xff] }
 0x110   :  { %3885 = vmatpush1.bf16.msra.mxu0 %v5980_v41  ;;  %v461_v41 = vld [vmem:[%s7991_s3 + $0x388] sm:$0xff]  ;;  %8150 = vst [vmem:[#allocation52_spill] sm:$0xff] %v6019_v52 }
 0x111   :  { %978 = vmatmul.mubr.f32.gmra.mrb[10].mxu1 %v5755_v40  ;;  %3887 = vmatprep.subr.bf16.mxu0 %v5984_v39  ;;  %v6022_v14 = vpack.c.bf16 %v466_v53, %v461_v41  ;;  %v465_v39 = vld [vmem:[%s7991_s3 + $0x3a8] sm:$0xff]  ;;  %v6040_v41 = vpack.c.bf16 %v476_v30, %v471_v2  ;;  %v470_v53 = vld [vmem:[%s7991_s3 + $0x3d0] sm:$0xff]  ;;  %v480_v30 = vld [vmem:[%s7991_s3 + $0x420] sm:$0xff] }
 0x112   :  { %v6037_v13 = vpack.c.bf16 %v465_v39, %v460_v17  ;;  %v486_v39 = vld [vmem:[%s7991_s3 + $0x450] sm:$0xff] }
 0x113   :  { %8151 = vst [vmem:[#allocation53_spill] sm:$0xff] %v6022_v14  ;;  %8153 = vst [vmem:[#allocation55_spill] sm:$0xff] %v6040_v41 }
 0x114   :  { %3889 = vmatpush1.bf16.msra.mxu0 %v6000_v28  ;;  %8152 = vst [vmem:[#allocation54_spill] sm:$0xff] %v6037_v13  ;;  %v481_v28 = vld [vmem:[%s7991_s3 + $0x428] sm:$0xff] }
 0x115   :  { %3891 = vmatprep.subr.bf16.mxu0 %v6004_v26  ;;  %v475_v26 = vld [vmem:[%s7991_s3 + $0x3f8] sm:$0xff]  ;;  %v6058_v17 = vpack.c.bf16 %v486_v39, %v481_v28  ;;  %v490_v39 = vld [vmem:[%s7991_s3 + $0x470] sm:$0xff] }
 0x116   :  { %v6055_v2 = vpack.c.bf16 %v475_v26, %v470_v53  ;;  %v496_v26 = vld [vmem:[%s7991_s3 + $0x4a0] sm:$0xff] }
 0x117   :  { %8155 = vst [vmem:[#allocation57_spill] sm:$0xff] %v6058_v17 }
 0x118   :  { %3893 = vmatpush1.bf16.msra.mxu0 %v6019_v52  ;;  %8154 = vst [vmem:[#allocation56_spill] sm:$0xff] %v6055_v2  ;;  %v491_v52 = vld [vmem:[%s7991_s3 + $0x478] sm:$0xff] }
 0x119   :  { %3895 = vmatprep.subr.bf16.mxu0 %v6022_v14  ;;  %v485_v14 = vld [vmem:[%s7991_s3 + $0x448] sm:$0xff]  ;;  %v6076_v53 = vpack.c.bf16 %v496_v26, %v491_v52  ;;  %v500_v26 = vld [vmem:[%s7991_s3 + $0x4c0] sm:$0xff] }
 0x11a   :  { %v6073_v28 = vpack.c.bf16 %v485_v14, %v480_v30  ;;  %v506_v14 = vld [vmem:[%s7991_s3 + $0x4f0] sm:$0xff] }
 0x11b   :  { %8157 = vst [vmem:[#allocation59_spill] sm:$0xff] %v6076_v53 }
 0x11c   :  { %3897 = vmatpush1.bf16.msra.mxu0 %v6037_v13  ;;  %8156 = vst [vmem:[#allocation58_spill] sm:$0xff] %v6073_v28  ;;  %v501_v13 = vld [vmem:[%s7991_s3 + $0x4c8] sm:$0xff] }
 0x11d   :  { %3899 = vmatprep.subr.bf16.mxu0 %v6040_v41  ;;  %v495_v41 = vld [vmem:[%s7991_s3 + $0x498] sm:$0xff]  ;;  %v6094_v30 = vpack.c.bf16 %v506_v14, %v501_v13  ;;  %v510_v14 = vld [vmem:[%s7991_s3 + $0x510] sm:$0xff] }
 0x11e   :  { %v6091_v52 = vpack.c.bf16 %v495_v41, %v490_v39  ;;  %v516_v41 = vld [vmem:[%s7991_s3 + $0x540] sm:$0xff] }
 0x11f   :  { %8159 = vst [vmem:[#allocation61_spill] sm:$0xff] %v6094_v30 }
 0x120   :  { %3901 = vmatpush1.bf16.msra.mxu0 %v6055_v2  ;;  %8158 = vst [vmem:[#allocation60_spill] sm:$0xff] %v6091_v52  ;;  %v511_v2 = vld [vmem:[%s7991_s3 + $0x518] sm:$0xff] }
 0x121   :  { %3903 = vmatprep.subr.bf16.mxu0 %v6058_v17  ;;  %v505_v17 = vld [vmem:[%s7991_s3 + $0x4e8] sm:$0xff]  ;;  %v6112_v39 = vpack.c.bf16 %v516_v41, %v511_v2  ;;  %v520_v41 = vld [vmem:[%s7991_s3 + $0x560] sm:$0xff] }
 0x122   :  { %v6109_v13 = vpack.c.bf16 %v505_v17, %v500_v26  ;;  %v526_v17 = vld [vmem:[%s7991_s3 + $0x590] sm:$0xff] }
 0x123   :  { %8160 = vst [vmem:[#allocation62_spill] sm:$0xff] %v6112_v39 }
 0x124   :  { %3905 = vmatpush1.bf16.msra.mxu0 %v6073_v28  ;;  %v521_v28 = vld [vmem:[%s7991_s3 + $0x568] sm:$0xff] }
 0x125   :  { %3907 = vmatprep.subr.bf16.mxu0 %v6076_v53  ;;  %v515_v53 = vld [vmem:[%s7991_s3 + $0x538] sm:$0xff]  ;;  %v6130_v26 = vpack.c.bf16 %v526_v17, %v521_v28  ;;  %v530_v17 = vld [vmem:[%s7991_s3 + $0x5b0] sm:$0xff] }
 0x126   :  { %v6127_v2 = vpack.c.bf16 %v515_v53, %v510_v14  ;;  %v536_v53 = vld [vmem:[%s7991_s3 + $0x5e0] sm:$0xff] }
 0x128   :  { %3909 = vmatpush1.bf16.msra.mxu0 %v6091_v52  ;;  %v531_v52 = vld [vmem:[%s7991_s3 + $0x5b8] sm:$0xff] }
 0x129   :  { %3911 = vmatprep.subr.bf16.mxu0 %v6094_v30  ;;  %v525_v30 = vld [vmem:[%s7991_s3 + $0x588] sm:$0xff]  ;;  %v6150_v14 = vpack.c.bf16 %v536_v53, %v531_v52 }
 0x12a   :  { %v6147_v28 = vpack.c.bf16 %v525_v30, %v520_v41  ;;  %v540_v41 = vld [vmem:[%s7991_s3 + $0x600] sm:$0xff]  ;;  %v545_v53 = vld [vmem:[%s7991_s3 + $0x628] sm:$0xff] }
 0x12b   :  { %8162 = vst [vmem:[#allocation64_spill] sm:$0xff] %v6150_v14 }
 0x12c   :  { %3913 = vmatpush1.bf16.msra.mxu0 %v6109_v13  ;;  %8161 = vst [vmem:[#allocation63_spill] sm:$0xff] %v6147_v28 }
 0x12d   :  { %3915 = vmatprep.subr.bf16.mxu0 %v6112_v39  ;;  %v535_v39 = vld [vmem:[%s7991_s3 + $0x5d8] sm:$0xff] }
 0x12e   :  { %v6166_v52 = vpack.c.bf16 %v535_v39, %v530_v17  ;;  %v556_v39 = vld [vmem:[%s7991_s3 + $0x680] sm:$0xff]  ;;  %v6185_v17 = vpack.c.bf16 %v545_v53, %v540_v41  ;;  %v566_v41 = vld [vmem:[%s7991_s3 + $0x6d0] sm:$0xff] }
 0x12f   :  { %819 = vmatmul.mubr.f32.vlgmr.msra.gmra.mrb[12].mxu0 %v5697_v15  ;;  %v541_v15 = vld [vmem:[%s7991_s3 + $0x608] sm:$0xff] }
 0x130   :  { %824 = vmatprep.mubr.f32.mxu0 %v5733_v16  ;;  %3917 = vmatpush1.bf16.msra.mxu0 %v6127_v2  ;;  %v546_v16 = vld [vmem:[%s7991_s3 + $0x630] sm:$0xff]  ;;  %8163 = vst [vmem:[#allocation65_spill] sm:$0xff] %v6166_v52  ;;  %8165 = vst [vmem:[#allocation67_spill] sm:$0xff] %v6185_v17 }
 0x131   :  { %3919 = vmatprep.subr.bf16.mxu0 %v6130_v26  ;;  %v6170_v30 = vpack.c.bf16 %v546_v16, %v541_v15  ;;  %v550_v16 = vld [vmem:[%s7991_s3 + $0x650] sm:$0xff] }
 0x133   :  { %825 = vmatmul.mubr.f32.gmra.mrb[14].mxu0 %v5755_v40  ;;  %8164 = vst [vmem:[#allocation66_spill] sm:$0xff] %v6170_v30  ;;  %v551_v40 = vld [vmem:[%s7991_s3 + $0x658] sm:$0xff] }
 0x134   :  { %3921 = vmatpush1.bf16.msra.mxu0 %v6147_v28  ;;  %895 = vmatprep.mubr.f32.mxu0 %v8121_v54  ;;  %v6188_v15 = vpack.c.bf16 %v556_v39, %v551_v40  ;;  %v561_v28 = vld [vmem:[%s7991_s3 + $0x6a8] sm:$0xff]  ;;  %v560_v39 = vld [vmem:[%s7991_s3 + $0x6a0] sm:$0xff] }
 0x135   :  { %3923 = vmatprep.subr.bf16.mxu0 %v6150_v14  ;;  %v555_v14 = vld [vmem:[%s7991_s3 + $0x678] sm:$0xff]  ;;  %v6206_v40 = vpack.c.bf16 %v566_v41, %v561_v28  ;;  %v570_v41 = vld [vmem:[%s7991_s3 + $0x6f0] sm:$0xff] }
 0x136   :  { %8166 = vst [vmem:[#allocation68_spill] sm:$0xff] %v6188_v15  ;;  %v6203_v53 = vpack.c.bf16 %v555_v14, %v550_v16  ;;  %v576_v14 = vld [vmem:[%s7991_s3 + $0x720] sm:$0xff] }
 0x137   :  { %8168 = vst [vmem:[#allocation70_spill] sm:$0xff] %v6206_v40 }
 0x138   :  { %3925 = vmatpush1.bf16.msra.mxu0 %v6166_v52  ;;  %8167 = vst [vmem:[#allocation69_spill] sm:$0xff] %v6203_v53  ;;  %v571_v52 = vld [vmem:[%s7991_s3 + $0x6f8] sm:$0xff] }
 0x139   :  { %3927 = vmatprep.subr.bf16.mxu0 %v6170_v30  ;;  %v565_v30 = vld [vmem:[%s7991_s3 + $0x6c8] sm:$0xff]  ;;  %v6224_v16 = vpack.c.bf16 %v576_v14, %v571_v52  ;;  %v580_v14 = vld [vmem:[%s7991_s3 + $0x740] sm:$0xff] }
 0x13a   :  { %v6221_v28 = vpack.c.bf16 %v565_v30, %v560_v39  ;;  %v586_v30 = vld [vmem:[%s7991_s3 + $0x770] sm:$0xff] }
 0x13b   :  { %8170 = vst [vmem:[#allocation72_spill] sm:$0xff] %v6224_v16 }
 0x13c   :  { %3929 = vmatpush1.bf16.msra.mxu0 %v6185_v17  ;;  %8169 = vst [vmem:[#allocation71_spill] sm:$0xff] %v6221_v28  ;;  %v581_v17 = vld [vmem:[%s7991_s3 + $0x748] sm:$0xff] }
 0x13d   :  { %3931 = vmatprep.subr.bf16.mxu0 %v6188_v15  ;;  %v575_v15 = vld [vmem:[%s7991_s3 + $0x718] sm:$0xff]  ;;  %v6242_v39 = vpack.c.bf16 %v586_v30, %v581_v17  ;;  %v522_v30 = vld [vmem:[%s7991_s3 + $0x570] sm:$0xff] }
 0x13e   :  { %v6239_v52 = vpack.c.bf16 %v575_v15, %v570_v41  ;;  %v517_v15 = vld [vmem:[%s7991_s3 + $0x548] sm:$0xff] }
 0x140   :  { %3933 = vmatpush1.bf16.msra.mxu0 %v6203_v53  ;;  %v512_v53 = vld [vmem:[%s7991_s3 + $0x520] sm:$0xff] }
 0x141   :  { %3935 = vmatprep.subr.bf16.mxu0 %v6206_v40  ;;  %v585_v40 = vld [vmem:[%s7991_s3 + $0x768] sm:$0xff]  ;;  %v6260_v41 = vpack.c.bf16 %v517_v15, %v512_v53  ;;  %v547_v15 = vld [vmem:[%s7991_s3 + $0x638] sm:$0xff] }
 0x142   :  { %v6257_v17 = vpack.c.bf16 %v585_v40, %v580_v14  ;;  %v532_v40 = vld [vmem:[%s7991_s3 + $0x5c0] sm:$0xff]  ;;  %v537_v53 = vld [vmem:[%s7991_s3 + $0x5e8] sm:$0xff] }
 0x143   :  { %8171 = vst [vmem:[#allocation73_spill] sm:$0xff] %v6260_v41  ;;  %v6282_v14 = vpack.c.bf16 %v537_v53, %v532_v40  ;;  %v552_v40 = vld [vmem:[%s7991_s3 + $0x660] sm:$0xff]  ;;  %v557_v53 = vld [vmem:[%s7991_s3 + $0x688] sm:$0xff] }
 0x144   :  { %3937 = vmatpush1.bf16.msra.mxu0 %v6221_v28 }
 0x145   :  { %3939 = vmatprep.subr.bf16.mxu0 %v6224_v16  ;;  %v527_v16 = vld [vmem:[%s7991_s3 + $0x598] sm:$0xff]  ;;  %8172 = vst [vmem:[#allocation74_spill] sm:$0xff] %v6282_v14 }
 0x146   :  { %v6270_v28 = vpack.c.bf16 %v527_v16, %v522_v30  ;;  %v542_v16 = vld [vmem:[%s7991_s3 + $0x610] sm:$0xff] }
 0x147   :  { %v6294_v30 = vpack.c.bf16 %v547_v15, %v542_v16  ;;  %v567_v16 = vld [vmem:[%s7991_s3 + $0x6d8] sm:$0xff] }
 0x148   :  { %3941 = vmatpush1.bf16.msra.mxu0 %v6239_v52 }
 0x149   :  { %3943 = vmatprep.subr.bf16.mxu0 %v6242_v39  ;;  %8173 = vst [vmem:[#allocation75_spill] sm:$0xff] %v6294_v30 }
 0x14c   :  { %3945 = vmatpush1.bf16.msra.mxu0 %v6257_v17 }
 0x14d   :  { %3979 = vmatprep.subr.bf16.mxu0 %v6260_v41 }
 0x14f   :  { %896 = vmatmul.mubr.f32.vlgmr.msra.gmra.mrb[12].mxu0 %v5685_v24 }
 0x150   :  { %3981 = vmatpush3.bf16.msra.mxu0 %v6260_v41  ;;  %901 = vmatprep.mubr.f32.mxu0 %v8121_v54  ;;  %v6304_v41 = vpack.c.bf16 %v557_v53, %v552_v40  ;;  %v577_v40 = vld [vmem:[%s7991_s3 + $0x728] sm:$0xff] }
 0x151   :  { %3983 = vmatprep.subr.bf16.mxu0 %v6270_v28 }
 0x153   :  { %902 = vmatmul.mubr.f32.gmra.mrb[14].mxu0 %v5731_v12 }
 0x154   :  { %3985 = vmatpush3.bf16.msra.mxu0 %v6270_v28  ;;  %3668 = vmatprep.mubr.f32.mxu0 %v5685_v24  ;;  %v562_v24 = vld [vmem:[%s7991_s3 + $0x6b0] sm:$0xff] }
 0x155   :  { %3987 = vmatprep.subr.bf16.mxu0 %v6282_v14  ;;  %v6314_v15 = vpack.c.bf16 %v567_v16, %v562_v24  ;;  %v587_v24 = vld [vmem:[%s7991_s3 + $0x778] sm:$0xff] }
 0x158   :  { %3989 = vmatpush3.bf16.msra.mxu0 %v6282_v14  ;;  %v572_v14 = vld [vmem:[%s7991_s3 + $0x700] sm:$0xff] }
 0x159   :  { %3991 = vmatprep.subr.bf16.mxu0 %v6294_v30  ;;  %v6324_v53 = vpack.c.bf16 %v577_v40, %v572_v14  ;;  %v326_v14 = vadd.f32 %v5813_v44, %v5652_v4  ;;  %v8189_v44 = vld [vmem:[#allocation22_spill] sm:$0xff] }
 0x15b   :  { %v6342_v40 = vmax.f32 %v326_v14, 0.0  ;;  %v8194_v14 = vld [vmem:[#allocation34_spill] sm:$0xff] }
 0x15c   :  { %3993 = vmatpush3.bf16.msra.mxu0 %v6294_v30  ;;  %v582_v30 = vld [vmem:[%s7991_s3 + $0x750] sm:$0xff]  ;;  %s8076_s3 = smov 20  }
 0x15d   :  { %3995 = vmatprep.subr.bf16.mxu0 %v6304_v41  ;;  %v6334_v16 = vpack.c.bf16 %v587_v24, %v582_v30  ;;  %v8191_v30 = vld [vmem:[#allocation26_spill] sm:$0xff] }
 0x15e   :  { %v8193_v24 = vld [vmem:[#allocation30_spill] sm:$0xff] }
 0x160   :  { %3997 = vmatpush3.bf16.msra.mxu0 %v6304_v41 }
 0x161   :  { %3999 = vmatprep.subr.bf16.mxu0 %v6314_v15 }
 0x164   :  { %4001 = vmatpush3.bf16.msra.mxu0 %v6314_v15 }
 0x165   :  { %4003 = vmatprep.subr.bf16.mxu0 %v6324_v53 }
 0x168   :  { %4005 = vmatpush3.bf16.msra.mxu0 %v6324_v53 }
 0x169   :  { %4007 = vmatprep.subr.bf16.mxu0 %v6334_v16 }
 0x16c   :  { %4009 = vmatpush3.bf16.msra.mxu0 %v6334_v16 }
 0x16d   :  { %4043 = vmatprep.subr.bf16.mxu0 %v5212_v20  ;;  %v251_v20 = vadd.f32 %v5672_v58, %v5652_v4  ;;  %v8188_v58 = vld [vmem:[#allocation20_spill] sm:$0xff] }
 0x16f   :  { %3669 = vmatmul.mubr.f32.vlgmr.msra.gmra.mrb[16].mxu0 %v5731_v12 }
 0x170   :  { %4045 = vmatpush1.bf16.msra.mxu0 %v5246_v32  ;;  %1660 = vmatprep.mubr.f32.mxu0 %v6342_v40  ;;  %v332_v32 = vadd.f32 %v5853_v57, %v5687_v25  ;;  %v8190_v57 = vld [vmem:[#allocation25_spill] sm:$0xff] }
 0x171   :  { %4047 = vmatprep.subr.bf16.mxu0 %v5258_v36  ;;  %v6381_v36 = vmax.f32 %v251_v20, 0.0  ;;  %v8195_v20 = vld [vmem:[#allocation35_spill] sm:$0xff] }
 0x174   :  { %4049 = vmatpush1.bf16.msra.mxu0 %v5287_v45  ;;  %v257_v45 = vadd.f32 %v5712_v0, %v5687_v25  ;;  %v8176_v0 = vld [vmem:[#allocation8_spill] sm:$0xff] }
 0x175   :  { %4051 = vmatprep.subr.bf16.mxu0 %v5296_v48  ;;  %v6386_v48 = vmax.f32 %v332_v32, 0.0 }
 0x178   :  { %4053 = vmatpush1.bf16.msra.mxu0 %v5331_v59  ;;  %v6391_v59 = vmax.f32 %v257_v45, 0.0  ;;  %v8196_v45 = vld [vmem:[#allocation39_spill] sm:$0xff] }
 0x179   :  { %4055 = vmatprep.subr.bf16.mxu0 %v5334_v60  ;;  %v8175_v60 = vld [vmem:[#allocation7_spill] sm:$0xff] }
 0x17c   :  { %4057 = vmatpush1.bf16.msra.mxu0 %v5367_v8  ;;  %v8177_v8 = vld [vmem:[#allocation9_spill] sm:$0xff] }
 0x17d   :  { %4059 = vmatprep.subr.bf16.mxu0 %v5373_v10 }
 0x180   :  { %4061 = vmatpush1.bf16.msra.mxu0 %v5403_v21 }
 0x181   :  { %4063 = vmatprep.subr.bf16.mxu0 %v5406_v22  ;;  %v8179_v22 = vld [vmem:[#allocation11_spill] sm:$0xff] }
 0x184   :  { %4065 = vmatpush1.bf16.msra.mxu0 %v5433_v34 }
 0x185   :  { %4067 = vmatprep.subr.bf16.mxu0 %v5436_v37 }
 0x188   :  { %4069 = vmatpush1.bf16.msra.mxu0 %v5455_v46 }
 0x189   :  { %4071 = vmatprep.subr.bf16.mxu0 %v5458_v47 }
 0x18c   :  { %4073 = vmatpush1.bf16.msra.mxu0 %v5474_v55  ;;  %v8181_v55 = vld [vmem:[#allocation13_spill] sm:$0xff] }
 0x18d   :  { %4075 = vmatprep.subr.bf16.mxu0 %v5477_v56 }
 0x190   :  { %4077 = vmatpush1.bf16.msra.mxu0 %v5492_v63 }
 0x191   :  { %4079 = vmatprep.subr.bf16.mxu0 %v5495_v1 }
 0x194   :  { %4081 = vmatpush1.bf16.msra.mxu0 %v5510_v9 }
 0x195   :  { %4083 = vmatprep.subr.bf16.mxu0 %v5513_v11 }
 0x198   :  { %4085 = vmatpush1.bf16.msra.mxu0 %v5528_v18  ;;  %v8182_v18 = vld [vmem:[#allocation14_spill] sm:$0xff] }
 0x199   :  { %4087 = vmatprep.subr.bf16.mxu0 %v5531_v19  ;;  %v8183_v19 = vld [vmem:[#allocation33_spill] sm:$0xff] }
 0x19c   :  { %4089 = vmatpush1.bf16.msra.mxu0 %v5546_v31  ;;  %v328_v31 = vadd.f32 %v8183_v19, %v5652_v4  ;;  %v8187_v4 = vld [vmem:[#allocation18_spill] sm:$0xff]  ;;  %v8214_v19 = vld [vmem:[#allocation17_spill] sm:$0xff] }
 0x19d   :  { %4091 = vmatprep.subr.bf16.mxu0 %v5549_v33  ;;  %v8184_v33 = vld [vmem:[#allocation15_spill] sm:$0xff] }
 0x1a0   :  { %4093 = vmatpush1.bf16.msra.mxu0 %v5564_v49 }
 0x1a1   :  { %4095 = vmatprep.subr.bf16.mxu0 %v5567_v50 }
 0x1a4   :  { %4097 = vmatpush1.bf16.msra.mxu0 %v5582_v61 }
 0x1a5   :  { %4099 = vmatprep.subr.bf16.mxu0 %v5585_v62  ;;  %v8185_v62 = vld [vmem:[#allocation16_spill] sm:$0xff] }
 0x1a8   :  { %4101 = vmatpush1.bf16.msra.mxu0 %v5594_v5  ;;  %v6430_v5 = vmax.f32 %v328_v31, 0.0  ;;  %v8215_v31 = vld [vmem:[#allocation19_spill] sm:$0xff] }
 0x1a9   :  { %4103 = vmatprep.subr.bf16.mxu0 %v5621_v29  ;;  %v8186_v29 = vld [vmem:[#allocation38_spill] sm:$0xff] }
 0x1ac   :  { %4105 = vmatpush1.bf16.msra.mxu0 %v5630_v43  ;;  %v334_v43 = vadd.f32 %v8186_v29, %v5687_v25  ;;  %v8192_v25 = vld [vmem:[#allocation29_spill] sm:$0xff]  ;;  %v8219_v29 = vld [vmem:[#allocation27_spill] sm:$0xff] }
 0x1ad   :  { %4107 = vmatprep.subr.bf16.mxu0 %v5220_v23  ;;  %v8174_v23 = vld [vmem:[#allocation6_spill] sm:$0xff] }
 0x1ae   :  { %v6438_v12 = vmax.f32 %v334_v43, 0.0  ;;  %v8221_v43 = vld [vmem:[#allocation31_spill] sm:$0xff] }
 0x1af   :  { %1661 = vmatmul.mubr.f32.vlgmr.msra.gmra.mrb[18].mxu0 %v6381_v36 }
 0x1b0   :  { %1666 = vmatprep.mubr.f32.mxu0 %v6386_v48  ;;  %4109 = vmatpush1.bf16.msra.mxu0 %v5231_v27  ;;  %v8178_v27 = vld [vmem:[#allocation10_spill] sm:$0xff] }
 0x1b1   :  { %4111 = vmatprep.subr.bf16.mxu0 %v5255_v35 }
 0x1b3   :  { %1667 = vmatmul.mubr.f32.gmra.mrb[20].mxu0 %v6391_v59 }
 0x1b4   :  { %4113 = vmatpush1.bf16.msra.mxu0 %v5263_v38  ;;  %1737 = vmatprep.mubr.f32.mxu0 %v8121_v54 }
 0x1b5   :  { %4115 = vmatprep.subr.bf16.mxu0 %v5275_v42  ;;  %v8180_v42 = vld [vmem:[#allocation12_spill] sm:$0xff] }
 0x1b8   :  { %4117 = vmatpush1.bf16.msra.mxu0 %v8174_v23 }
 0x1b9   :  { %4119 = vmatprep.subr.bf16.mxu0 %v8175_v60  ;;  %v8197_v60 = vld [vmem:[#allocation40_spill] sm:$0xff] }
 0x1bc   :  { %4121 = vmatpush1.bf16.msra.mxu0 %v8176_v0 }
 0x1bd   :  { %4123 = vmatprep.subr.bf16.mxu0 %v8177_v8 }
 0x1c0   :  { %4125 = vmatpush1.bf16.msra.mxu0 %v8178_v27  ;;  %v743_v10 = vpop.f32.mrb[4].mxu1 }
 0x1c1   :  { %v745_v35 = vpop.f32.mrb[5].mxu1  ;;  %v666_v21 = vpop.f32.mrb[8].mxu0  ;;  %4127 = vmatprep.subr.bf16.mxu0 %v8179_v22  ;;  %v8200_v22 = vld [vmem:[#allocation48_spill] sm:$0xff] }
 0x1c2   :  { %v6404_v38 = vadd.f32 %v743_v10, %v666_v21  ;;  %v668_v34 = vpop.f32.mrb[9].mxu0  ;;  %v8199_v21 = vld [vmem:[#allocation47_spill] sm:$0xff] }
 0x1c3   :  { %v6406_v37 = vadd.f32 %v745_v35, %v668_v34  ;;  %v8198_v35 = vld [vmem:[#allocation46_spill] sm:$0xff]  ;;  %v8201_v34 = vld [vmem:[#allocation49_spill] sm:$0xff] }
 0x1c4   :  { %4129 = vmatpush1.bf16.msra.mxu0 %v8180_v42  ;;  %v749_v46 = vpop.f32.mrb[6].mxu1  ;;  %v8202_v42 = vld [vmem:[#allocation50_spill] sm:$0xff] }
 0x1c5   :  { %v751_v47 = vpop.f32.mrb[7].mxu1  ;;  %4131 = vmatprep.subr.bf16.mxu0 %v8181_v55  ;;  %v4712_v56 = vpack.i.bf16 %v6406_v37, %v6404_v38  ;;  %v8209_v55 = vld [vmem:[#allocation57_spill] sm:$0xff] }
 0x1c6   :  { %v672_v63 = vpop.f32.mrb[10].mxu0 }
 0x1c7   :  { %v6412_v1 = vadd.f32 %v749_v46, %v672_v63  ;;  %v674_v9 = vpop.f32.mrb[11].mxu0  ;;  %4713 = vrot.lane.b32.xlu0 %v4712_v56, %s8076_s3  ;;  %v8204_v46 = vld [vmem:[#allocation52_spill] sm:$0xff]  ;;  %v8210_v56 = vld [vmem:[#allocation58_spill] sm:$0xff]  ;;  %v8211_v63 = vld [vmem:[#allocation59_spill] sm:$0xff] }
 0x1c8   :  { %v6415_v11 = vadd.f32 %v751_v47, %v674_v9  ;;  %4133 = vmatpush1.bf16.msra.mxu0 %v8182_v18  ;;  %v8206_v47 = vld [vmem:[#allocation54_spill] sm:$0xff]  ;;  %v8212_v9 = vld [vmem:[#allocation60_spill] sm:$0xff]  ;;  %v8213_v18 = vld [vmem:[#allocation61_spill] sm:$0xff] }
 0x1c9   :  { %4135 = vmatprep.subr.bf16.mxu0 %v8184_v33  ;;  %v4722_v49 = vpack.i.bf16 %v6412_v1, %v6404_v38  ;;  %v4012_v50 = vpack.c.bf16 %v6412_v1, %v6404_v38  ;;  %v8216_v33 = vld [vmem:[#allocation21_spill] sm:$0xff] }
 0x1ca   :  { %v4742_v61 = vpack.i.bf16 %v6415_v11, %v6412_v1 }
 0x1cb   :  { %4723 = vrot.lane.b32.xlu1 %v4722_v49, %s8074_s12  ;;  %4718 = vrot.lane.b32.xlu0 %v4722_v49, %s8072_s13  ;;  %v8217_v49 = vld [vmem:[#allocation23_spill] sm:$0xff] }
 0x1cc   :  { %4137 = vmatpush1.bf16.msra.mxu0 %v8185_v62  ;;  %v8218_v62 = vld [vmem:[#allocation24_spill] sm:$0xff] }
 0x1cd   :  { %4139 = vmatprep.subr.bf16.mxu0 %v8187_v4  ;;  %v8222_v4 = vld [vmem:[#allocation32_spill] sm:$0xff] }
 0x1cf   :  { %1738 = vmatmul.mubr.f32.vlgmr.msra.gmra.mrb[18].mxu0 %v6430_v5 }
 0x1d0   :  { %4141 = vmatpush1.bf16.msra.mxu0 %v8188_v58  ;;  %1743 = vmatprep.mubr.f32.mxu0 %v8121_v54  ;;  %v8223_v58 = vld [vmem:[#allocation36_spill] sm:$0xff] }
 0x1d1   :  { %4143 = vmatprep.subr.bf16.mxu0 %v8189_v44  ;;  %v8224_v44 = vld [vmem:[#allocation37_spill] sm:$0xff] }
 0x1d3   :  { %1744 = vmatmul.mubr.f32.gmra.mrb[20].mxu0 %v6438_v12 }
 0x1d4   :  { %4145 = vmatpush1.bf16.msra.mxu0 %v8190_v57  ;;  %1814 = vmatprep.mubr.f32.mxu0 %v6342_v40 }
 0x1d5   :  { %4147 = vmatprep.subr.bf16.mxu0 %v8191_v30 }
 0x1d8   :  { %4149 = vmatpush1.bf16.msra.mxu0 %v8192_v25  ;;  %v8225_v25 = vld [vmem:[#allocation41_spill] sm:$0xff] }
 0x1d9   :  { %4151 = vmatprep.subr.bf16.mxu0 %v8193_v24 }
 0x1dc   :  { %4153 = vmatpush1.bf16.msra.mxu0 %v8194_v14 }
 0x1dd   :  { %4155 = vmatprep.subr.bf16.mxu0 %v8195_v20 }
 0x1e0   :  { %v3433_v32 = vpop.f32.mrb[8].mxu1  ;;  %4157 = vmatpush1.bf16.msra.mxu0 %v8196_v45 }
 0x1e1   :  { %v3434_v23 = vpop.f32.mrb[9].mxu1  ;;  %4159 = vmatprep.subr.bf16.mxu0 %v8197_v60 }
 0x1e2   :  { %v6451_v0 = vadd.f32 %v3434_v23, %v3433_v32  ;;  %v8227_v23 = vld [vmem:[#allocation43_spill] sm:$0xff] }
 0x1e4   :  { %v3436_v8 = vpop.f32.mrb[10].mxu1  ;;  %4161 = vmatpush1.bf16.msra.mxu0 %v5903_v51  ;;  %v8203_v51 = vld [vmem:[#allocation51_spill] sm:$0xff] }
 0x1e5   :  { %v3437_v27 = vpop.f32.mrb[11].mxu1  ;;  %4163 = vmatprep.subr.bf16.mxu0 %v5912_v6  ;;  %v8205_v6 = vld [vmem:[#allocation53_spill] sm:$0xff] }
 0x1e6   :  { %v6455_v10 = vadd.f32 %v3437_v27, %v3436_v8  ;;  %v8228_v27 = vld [vmem:[#allocation44_spill] sm:$0xff] }
 0x1e8   :  { %4165 = vmatpush1.bf16.msra.mxu0 %v5939_v7  ;;  %v8207_v7 = vld [vmem:[#allocation55_spill] sm:$0xff] }
 0x1e9   :  { %4167 = vmatprep.subr.bf16.mxu0 %v5942_v3  ;;  %v8208_v3 = vld [vmem:[#allocation56_spill] sm:$0xff] }
 0x1ec   :  { %4169 = vmatpush1.bf16.msra.mxu0 %v8198_v35  ;;  %v8229_v35 = vld [vmem:[#allocation45_spill] sm:$0xff] }
 0x1ed   :  { %4171 = vmatprep.subr.bf16.mxu0 %v8199_v21  ;;  %v4752_v21 = vpack.i.bf16 %v6415_v11, %v6406_v37 }
 0x1f0   :  { %4173 = vmatpush1.bf16.msra.mxu0 %v8200_v22 }
 0x1f1   :  { %4175 = vmatprep.subr.bf16.mxu0 %v8201_v34 }
 0x1f4   :  { %4177 = vmatpush1.bf16.msra.mxu0 %v8202_v42 }
 0x1f5   :  { %4179 = vmatprep.subr.bf16.mxu0 %v8203_v51 }
 0x1f8   :  { %4181 = vmatpush1.bf16.msra.mxu0 %v8204_v46 }
 0x1f9   :  { %4183 = vmatprep.subr.bf16.mxu0 %v8205_v6 }
 0x1fc   :  { %4185 = vmatpush1.bf16.msra.mxu0 %v8206_v47 }
 0x1fd   :  { %4187 = vmatprep.subr.bf16.mxu0 %v8207_v7 }
 0x200   :  { %4189 = vmatpush1.bf16.msra.mxu0 %v8208_v3 }
 0x201   :  { %4191 = vmatprep.subr.bf16.mxu0 %v8209_v55 }
 0x204   :  { %4193 = vmatpush1.bf16.msra.mxu0 %v8210_v56 }
 0x205   :  { %4195 = vmatprep.subr.bf16.mxu0 %v8211_v63 }
 0x208   :  { %4197 = vmatpush1.bf16.msra.mxu0 %v8212_v9 }
 0x209   :  { %4199 = vmatprep.subr.bf16.mxu0 %v8213_v18 }
 0x20c   :  { %4201 = vmatpush1.bf16.msra.mxu0 %v6109_v13  ;;  %v8220_v13 = vld [vmem:[#allocation28_spill] sm:$0xff] }
 0x20d   :  { %4235 = vmatprep.subr.bf16.mxu0 %v8214_v19 }
 0x20f   :  { %1815 = vmatmul.mubr.f32.vlgmr.msra.gmra.mrb[22].mxu0 %v6381_v36 }
 0x210   :  { %1820 = vmatprep.mubr.f32.mxu0 %v6386_v48  ;;  %4237 = vmatpush3.bf16.msra.mxu0 %v8215_v31 }
 0x211   :  { %4239 = vmatprep.subr.bf16.mxu0 %v8216_v33 }
 0x213   :  { %1821 = vmatmul.mubr.f32.gmra.mrb[24].mxu0 %v6391_v59 }
 0x214   :  { %4241 = vmatpush3.bf16.msra.mxu0 %v8217_v49  ;;  %1968 = vmatprep.mubr.f32.mxu0 %v6342_v40  ;;  %v8226_v40 = vld [vmem:[#allocation42_spill] sm:$0xff] }
 0x215   :  { %4243 = vmatprep.subr.bf16.mxu0 %v8218_v62 }
 0x218   :  { %4245 = vmatpush3.bf16.msra.mxu0 %v8219_v29 }
 0x219   :  { %4247 = vmatprep.subr.bf16.mxu0 %v8220_v13 }
 0x21c   :  { %4249 = vmatpush3.bf16.msra.mxu0 %v8221_v43 }
 0x21d   :  { %4251 = vmatprep.subr.bf16.mxu0 %v8222_v4 }
 0x220   :  { %4253 = vmatpush3.bf16.msra.mxu0 %v8223_v58 }
 0x221   :  { %4255 = vmatprep.subr.bf16.mxu0 %v8224_v44 }
 0x222   :  { %v897_v57 = vpop.f32.mrb[12].mxu0 }
 0x223   :  { %v899_v30 = vpop.f32.mrb[13].mxu0  ;;  %v4792_v51 = vpack.i.bf16 %v897_v57, %v6406_v37 }
 0x224   :  { %4257 = vmatpush3.bf16.msra.mxu0 %v8225_v25  ;;  %v4727_v24 = vpack.i.bf16 %v899_v30, %v897_v57 }
 0x225   :  { %4259 = vmatprep.subr.bf16.mxu0 %v8226_v40 }
 0x226   :  { %4728 = vrot.lane.b32.xlu1 %v4727_v24, %s8086_s14  ;;  %v903_v14 = vpop.f32.mrb[14].mxu0 }
 0x227   :  { %v905_v20 = vpop.f32.mrb[15].mxu0  ;;  %v4732_v32 = vpack.i.bf16 %v903_v14, %v897_v57  ;;  %v4797_v45 = vpack.i.bf16 %v903_v14, %v6415_v11 }
 0x228   :  { %4261 = vmatpush3.bf16.msra.mxu0 %v8227_v23  ;;  %v4747_v60 = vpack.i.bf16 %v905_v20, %v903_v14  ;;  %v4757_v8 = vpack.i.bf16 %v905_v20, %v899_v30 }
 0x229   :  { %4263 = vmatprep.subr.bf16.mxu0 %v8228_v27 }
 0x22a   :  { %4733 = vrot.lane.b32.xlu1 %v4732_v32, %s8090_s15  ;;  %4748 = vrot.lane.b32.xlu0 %v4747_v60, %s8086_s14 }
 0x22c   :  { %4265 = vmatpush3.bf16.msra.mxu0 %v8229_v35 }
 0x22e   :  { %4738 = vrot.lane.b32.xlu1 %v4732_v32, %s8084_s16  ;;  %4753 = vrot.lane.b32.xlu0 %v4752_v21, %s8088_s17 }
 0x22f   :  { %1969 = vmatmul.mubr.f32.vlgmr.msra.gmra.mrb[26].mxu0 %v6381_v36 }
 0x230   :  { %1973 = vmatprep.mubr.f32.mxu0 %v6386_v48 }
 0x232   :  { %4758 = vrot.lane.b32.xlu0 %v4757_v8, %s4942_s18  ;;  %4743 = vrot.lane.b32.xlu1 %v4742_v61, %s8076_s3 }
 0x233   :  { %1974 = vmatmul.mubr.f32.gmra.mrb[28].mxu0 %v6391_v59  ;;  %v589_v59 = vld [vmem:[%s7992_s4 + $0x8] sm:$0xff] }
 0x234   :  { %1270 = vmatprep.mubr.f32.mxu1 %v589_v59  ;;  %2242 = vmatprep.mubr.f32.mxu0 %v589_v59 }
 0x236   :  { %4763 = vrot.lane.b32.xlu0 %v4752_v21, %s8078_s19  ;;  %4768 = vrot.lane.b32.xlu1 %v4757_v8, %s8092_s20 }
 0x23a   :  { %4773 = vrot.lane.b32.xlu1 %v4757_v8, %s8094_s21 }
 0x242   :  { %v3670_v36 = vpop.f32.mrb[16].mxu0 }
 0x243   :  { %v1055_v48 = vadd.f32 %v3670_v36, %v6455_v10  ;;  %v1049_v22 = vpop.f32.mrb[17].mxu0  ;;  %v4724_v10 = vpop.permute.xlu1 %4723 }
 0x244   :  { %v1050_v34 = vadd.f32 %v6451_v0, %v1049_v22  ;;  %v4714_v0 = vpop.permute.xlu0 %4713  ;;  %v4726_v4 = vunpack.i.h.bf16 %v4724_v10 }
 0x245   :  { %v4777_v42 = vpack.i.bf16 %v1055_v48, %v905_v20  ;;  %v4716_v23 = vunpack.i.h.bf16 %v4714_v0  ;;  %v4715_v60 = vunpack.i.l.bf16 %v4714_v0 }
 0x246   :  { %v4802_v11 = vpack.i.bf16 %v1055_v48, %v1050_v34  ;;  %v4782_v61 = vpack.i.bf16 %v1050_v34, %v899_v30  ;;  %v4725_v30 = vunpack.i.l.bf16 %v4724_v10 }
 0x247   :  { %4778 = vrot.lane.b32.xlu0 %v4777_v42, %s8096_s0  ;;  %v1083_v59 = vsel %vm1082_vm2, %v4715_v60, %v4716_v23 }
 0x248   :  { %4783 = vrot.lane.b32.xlu1 %v4782_v61, %s8096_s0  ;;  %v4719_v46 = vpop.permute.xlu0 %4718 }
 0x249   :  { %v4721_v19 = vunpack.i.h.bf16 %v4719_v46  ;;  %v4720_v31 = vunpack.i.l.bf16 %v4719_v46 }
 0x24b   :  { %4793 = vrot.lane.b32.xlu0 %v4792_v51, %s8082_s24  ;;  %v4016_v25 = vpack.c.bf16 %v4721_v19, %v4720_v31 }
 0x24c   :  { %4788 = vrot.lane.b32.xlu1 %v4752_v21, %s8080_s25  ;;  %v4020_v21 = vpack.c.bf16 %v4726_v4, %v4725_v30 }
 0x24f   :  { %4803 = vrot.lane.b32.xlu0 %v4802_v11, %s4949_s26 }
 0x250   :  { %4798 = vrot.lane.b32.xlu1 %v4797_v45, %s8082_s24 }
 0x298   :  { %v4729_v6 = vpop.permute.xlu1 %4728 }
 0x299   :  { %v4731_v63 = vunpack.i.h.bf16 %v4729_v6  ;;  %v4730_v9 = vunpack.i.l.bf16 %v4729_v6 }
 0x29b   :  { %v1143_v57 = vsel %vm1142_vm1, %v4730_v9, %v4731_v63 }
 0x29c   :  { %v4734_v47 = vpop.permute.xlu1 %4733  ;;  %v4749_v7 = vpop.permute.xlu0 %4748 }
 0x29d   :  { %v4736_v37 = vunpack.i.h.bf16 %v4734_v47  ;;  %v4735_v3 = vunpack.i.l.bf16 %v4734_v47  ;;  %v4751_v55 = vunpack.i.h.bf16 %v4749_v7  ;;  %v4750_v56 = vunpack.i.l.bf16 %v4749_v7 }
 0x29f   :  { %v4010_v18 = vpack.c.bf16 %v4736_v37, %v4735_v3  ;;  %v1144_v13 = vsel %vm1142_vm1, %v4750_v56, %v4751_v55 }
 0x2a0   :  { %v4739_v33 = vpop.permute.xlu1 %4738  ;;  %v4754_v49 = vpop.permute.xlu0 %4753  ;;  %v4018_v20 = vpack.c.bf16 %v1144_v13, %v1143_v57 }
 0x2a1   :  { %v4741_v62 = vunpack.i.h.bf16 %v4739_v33  ;;  %v4740_v29 = vunpack.i.l.bf16 %v4739_v33  ;;  %4011 = vmatprep.subr.bf16.mxu1 %v4010_v18  ;;  %v4756_v51 = vunpack.i.h.bf16 %v4754_v49  ;;  %v4755_v0 = vunpack.i.l.bf16 %v4754_v49 }
 0x2a2   :  { %4013 = vmatpush3.bf16.msra.mxu1 %v4012_v50  ;;  %v6531_v43 = vpop.f32.mrb[18].mxu0 }
 0x2a3   :  { %v6533_v58 = vpop.f32.mrb[19].mxu0  ;;  %v4014_v44 = vpack.c.bf16 %v4741_v62, %v4740_v29  ;;  %v4028_v3 = vpack.c.bf16 %v4756_v51, %v4755_v0  ;;  %v8231_v51 = vld [vmem:[#allocation63_spill] sm:$0xff]  ;;  %v8232_v0 = vld [vmem:[#allocation64_spill] sm:$0xff] }
 0x2a4   :  { %v4759_v24 = vpop.permute.xlu0 %4758  ;;  %v4744_v40 = vpop.permute.xlu1 %4743  ;;  %v4807_v14 = vpack.i.bf16 %v6533_v58, %v6531_v43 }
 0x2a5   :  { %v4761_v32 = vunpack.i.h.bf16 %v4759_v24  ;;  %v4760_v45 = vunpack.i.l.bf16 %v4759_v24  ;;  %v4746_v38 = vunpack.i.h.bf16 %v4744_v40  ;;  %v4745_v1 = vunpack.i.l.bf16 %v4744_v40  ;;  %4015 = vmatprep.subr.bf16.mxu1 %v4014_v44 }
 0x2a6   :  { %4017 = vmatpush3.bf16.msra.mxu1 %v4016_v25  ;;  %v6538_v50 = vpop.f32.mrb[20].mxu0  ;;  %4808 = vrot.lane.b32.xlu1 %v4807_v14, %s8076_s3 }
 0x2a7   :  { %v4300_v8 = vpack.c.bf16 %v6538_v50, %v6531_v43  ;;  %4019 = vmatprep.subr.bf16.mxu1 %v4018_v20  ;;  %v6543_v27 = vpop.f32.mrb[21].mxu0  ;;  %v4817_v35 = vpack.i.bf16 %v6538_v50, %v6531_v43  ;;  %v4022_v34 = vpack.c.bf16 %v4761_v32, %v4760_v45  ;;  %v1084_v42 = vsel %vm1082_vm2, %v4745_v1, %v4746_v38 }
 0x2a8   :  { %v4769_v36 = vpop.permute.xlu1 %4768  ;;  %v4837_v48 = vpack.i.bf16 %v6543_v27, %v6538_v50  ;;  %v6551_v22 = vpack.i.bf16 %v6543_v27, %v6533_v58  ;;  %v4024_v46 = vpack.c.bf16 %v1084_v42, %v1083_v59  ;;  %v4764_v6 = vpop.permute.xlu0 %4763  ;;  %v8230_v42 = vld [vmem:[#allocation62_spill] sm:$0xff]  ;;  %v6584_v59 = vld [vmem:[%s7992_s4 + $0x28] sm:$0xff] }
 0x2a9   :  { %v4771_v11 = vunpack.i.h.bf16 %v4769_v36  ;;  %v4770_v61 = vunpack.i.l.bf16 %v4769_v36  ;;  %4818 = vrot.lane.b32.xlu0 %v4817_v35, %s8074_s12  ;;  %v4766_v55 = vunpack.i.h.bf16 %v4764_v6  ;;  %v4765_v56 = vunpack.i.l.bf16 %v4764_v6  ;;  %v8234_v6 = vld [vmem:[#allocation66_spill] sm:$0xff]  ;;  %s4962_s12 = smov 12  }
 0x2aa   :  { %4021 = vmatpush3.bf16.msra.mxu1 %v4020_v21  ;;  %4813 = vrot.lane.b32.xlu1 %v4817_v35, %s8072_s13  ;;  %s4961_s13 = smov 68  }
 0x2ab   :  { %4023 = vmatprep.subr.bf16.mxu1 %v4022_v34  ;;  %v4026_v47 = vpack.c.bf16 %v4771_v11, %v4770_v61  ;;  %v4032_v9 = vpack.c.bf16 %v4766_v55, %v4765_v56  ;;  %v6564_v34 = vld [vmem:[%s7992_s4] sm:$0xff]  ;;  %v6570_v11 = vld [vmem:[%s7992_s4 + $0x18] sm:$0xff]  ;;  %v6578_v61 = vld [vmem:[%s7992_s4 + $0x10] sm:$0xff] }
 0x2ac   :  { %v4774_v10 = vpop.permute.xlu1 %4773  ;;  %v8239_v55 = vld [vmem:[#allocation71_spill] sm:$0xff]  ;;  %v8240_v56 = vld [vmem:[#allocation72_spill] sm:$0xff] }
 0x2ad   :  { %v4776_v7 = vunpack.i.h.bf16 %v4774_v10  ;;  %v4775_v37 = vunpack.i.l.bf16 %v4774_v10  ;;  %v8233_v10 = vld [vmem:[#allocation65_spill] sm:$0xff] }
 0x2ae   :  { %4025 = vmatpush3.bf16.msra.mxu1 %v4024_v46  ;;  %v6606_v46 = vld [vmem:[%s7992_s4 + $0x30] sm:$0xff] }
 0x2af   :  { %4027 = vmatprep.subr.bf16.mxu1 %v4026_v47  ;;  %v4030_v63 = vpack.c.bf16 %v4776_v7, %v4775_v37  ;;  %v8235_v47 = vld [vmem:[#allocation67_spill] sm:$0xff]  ;;  %v8236_v7 = vld [vmem:[#allocation68_spill] sm:$0xff]  ;;  %v8237_v37 = vld [vmem:[#allocation69_spill] sm:$0xff] }
 0x2b2   :  { %4029 = vmatpush3.bf16.msra.mxu1 %v4028_v3  ;;  %v8238_v3 = vld [vmem:[#allocation70_spill] sm:$0xff] }
 0x2b3   :  { %4031 = vmatprep.subr.bf16.mxu1 %v4030_v63 }
 0x2b6   :  { %4033 = vmatpush3.bf16.msra.mxu1 %v4032_v9 }
 0x2b9   :  { %v4779_v18 = vpop.permute.xlu0 %4778 }
 0x2ba   :  { %v4781_v19 = vunpack.i.h.bf16 %v4779_v18  ;;  %v4780_v31 = vunpack.i.l.bf16 %v4779_v18  ;;  %v4784_v33 = vpop.permute.xlu1 %4783 }
 0x2bb   :  { %v4786_v49 = vunpack.i.h.bf16 %v4784_v33  ;;  %v4785_v62 = vunpack.i.l.bf16 %v4784_v33 }
 0x2bc   :  { %v1177_v29 = vsel %vm1175_vm3, %v4780_v31, %v4781_v19  ;;  %v8241_v31 = vld [vmem:[#allocation73_spill] sm:$0xff] }
 0x2bd   :  { %v4794_v13 = vpop.permute.xlu0 %4793  ;;  %v1176_v4 = vsel %vm1175_vm3, %v4785_v62, %v4786_v49 }
 0x2be   :  { %v4789_v44 = vpop.permute.xlu1 %4788  ;;  %v4034_v57 = vpack.c.bf16 %v1177_v29, %v1176_v4  ;;  %v4796_v24 = vunpack.i.h.bf16 %v4794_v13  ;;  %v4795_v40 = vunpack.i.l.bf16 %v4794_v13 }
 0x2bf   :  { %v4791_v30 = vunpack.i.h.bf16 %v4789_v44  ;;  %v4790_v25 = vunpack.i.l.bf16 %v4789_v44 }
 0x2c0   :  { %4035 = vmatprep.subr.bf16.mxu1 %v4034_v57  ;;  %v1116_v35 = vsel %vm1115_vm4, %v4795_v40, %v4796_v24 }
 0x2c1   :  { %v4036_v14 = vpack.c.bf16 %v4791_v30, %v4790_v25  ;;  %v4804_v20 = vpop.permute.xlu0 %4803 }
 0x2c2   :  { %v4806_v32 = vunpack.i.h.bf16 %v4804_v20  ;;  %v4805_v45 = vunpack.i.l.bf16 %v4804_v20  ;;  %v4799_v38 = vpop.permute.xlu1 %4798 }
 0x2c3   :  { %v4801_v1 = vunpack.i.h.bf16 %v4799_v38  ;;  %v4800_v23 = vunpack.i.l.bf16 %v4799_v38  ;;  %4037 = vmatpush3.bf16.msra.mxu1 %v4036_v14 }
 0x2c4   :  { %v4038_v60 = vpack.c.bf16 %v4806_v32, %v4805_v45 }
 0x2c5   :  { %v1117_v21 = vsel %vm1115_vm4, %v4800_v23, %v4801_v1 }
 0x2c6   :  { %v4040_v36 = vpack.c.bf16 %v1117_v21, %v1116_v35  ;;  %4039 = vmatprep.subr.bf16.mxu1 %v4038_v60 }
 0x2c8   :  { %4041 = vmatpush3.bf16.msra.mxu1 %v4040_v36 }
 0x2c9   :  { %4203 = vmatprep.subr.bf16.mxu1 %v8230_v42 }
 0x2cb   :  { %1271 = vmatmul.mubr.f32.vlgmr.msra.gmra.mrb[12].mxu1 %v6564_v34 }
 0x2cc   :  { %4205 = vmatpush1.bf16.msra.mxu1 %v6127_v2  ;;  %1275 = vmatprep.mubr.f32.mxu1 %v6570_v11  ;;  %v6592_v2 = vld [vmem:[%s7992_s4 + $0x20] sm:$0xff] }
 0x2cd   :  { %4207 = vmatprep.subr.bf16.mxu1 %v6130_v26  ;;  %v6598_v26 = vld [vmem:[%s7992_s4 + $0x38] sm:$0xff]  ;;  %s4957_s4 = smov 52  }
 0x2cf   :  { %1276 = vmatmul.mubr.f32.gmra.mrb[14].mxu1 %v6578_v61 }
 0x2d0   :  { %4209 = vmatpush1.bf16.msra.mxu1 %v8231_v51  ;;  %1280 = vmatprep.mubr.f32.mxu1 %v6584_v59 }
 0x2d1   :  { %4211 = vmatprep.subr.bf16.mxu1 %v8232_v0 }
 0x2d3   :  { %1281 = vmatmul.mubr.f32.gmra.mrb[16].mxu1 %v6592_v2 }
 0x2d4   :  { %4213 = vmatpush1.bf16.msra.mxu1 %v8233_v10  ;;  %1285 = vmatprep.mubr.f32.mxu1 %v6598_v26 }
 0x2d5   :  { %4215 = vmatprep.subr.bf16.mxu1 %v8234_v6 }
 0x2d7   :  { %1286 = vmatmul.mubr.f32.gmra.mrb[18].mxu1 %v6606_v46 }
 0x2d8   :  { %4217 = vmatpush1.bf16.msra.mxu1 %v8235_v47  ;;  %1891 = vmatprep.mubr.f32.mxu1 %v8121_v54 }
 0x2d9   :  { %4219 = vmatprep.subr.bf16.mxu1 %v8236_v7  ;;  %v596_v7 = vld [vmem:[%s7993_s5] sm:$0xff] }
 0x2dc   :  { %4221 = vmatpush1.bf16.msra.mxu1 %v8237_v37 }
 0x2dd   :  { %4223 = vmatprep.subr.bf16.mxu1 %v8238_v3 }
 0x2e0   :  { %4225 = vmatpush1.bf16.msra.mxu1 %v8239_v55 }
 0x2e1   :  { %4227 = vmatprep.subr.bf16.mxu1 %v8240_v56 }
 0x2e2   :  { %v1816_v63 = vpop.f32.mrb[22].mxu0 }
 0x2e3   :  { %v1818_v9 = vpop.f32.mrb[23].mxu0 }
 0x2e4   :  { %4229 = vmatpush1.bf16.msra.mxu1 %v6239_v52  ;;  %v8242_v52 = vld [vmem:[#allocation74_spill] sm:$0xff] }
 0x2e5   :  { %4231 = vmatprep.subr.bf16.mxu1 %v6242_v39  ;;  %v8243_v39 = vld [vmem:[#allocation75_spill] sm:$0xff] }
 0x2e6   :  { %v1822_v18 = vpop.f32.mrb[24].mxu0 }
 0x2e7   :  { %v1824_v19 = vpop.f32.mrb[25].mxu0 }
 0x2e8   :  { %4233 = vmatpush1.bf16.msra.mxu1 %v6257_v17 }
 0x2e9   :  { %4267 = vmatprep.subr.bf16.mxu1 %v8241_v31 }
 0x2eb   :  { %1892 = vmatmul.mubr.f32.vlgmr.msra.gmra.mrb[20].mxu1 %v6430_v5 }
 0x2ec   :  { %4269 = vmatpush3.bf16.msra.mxu1 %v8241_v31  ;;  %1897 = vmatprep.mubr.f32.mxu1 %v8121_v54 }
 0x2ed   :  { %4271 = vmatprep.subr.bf16.mxu1 %v6270_v28 }
 0x2ef   :  { %1898 = vmatmul.mubr.f32.gmra.mrb[22].mxu1 %v6438_v12 }
 0x2f0   :  { %4273 = vmatpush3.bf16.msra.mxu1 %v6270_v28  ;;  %3703 = vmatprep.mubr.f32.mxu1 %v6430_v5 }
 0x2f1   :  { %4275 = vmatprep.subr.bf16.mxu1 %v8242_v52 }
 0x2f4   :  { %4277 = vmatpush3.bf16.msra.mxu1 %v8242_v52 }
 0x2f5   :  { %4279 = vmatprep.subr.bf16.mxu1 %v8243_v39 }
 0x2f8   :  { %4281 = vmatpush3.bf16.msra.mxu1 %v8243_v39 }
 0x2f9   :  { %4283 = vmatprep.subr.bf16.mxu1 %v6304_v41 }
 0x2fc   :  { %4285 = vmatpush3.bf16.msra.mxu1 %v6304_v41 }
 0x2fd   :  { %4287 = vmatprep.subr.bf16.mxu1 %v6314_v15 }
 0x300   :  { %4289 = vmatpush3.bf16.msra.mxu1 %v6314_v15 }
 0x301   :  { %4291 = vmatprep.subr.bf16.mxu1 %v6324_v53 }
 0x302   :  { %v3533_v28 = vpop.f32.mrb[26].mxu0 }
 0x303   :  { %v3534_v17 = vpop.f32.mrb[27].mxu0 }
 0x304   :  { %v3535_v5 = vadd.f32 %v3534_v17, %v3533_v28  ;;  %4293 = vmatpush3.bf16.msra.mxu1 %v6324_v53 }
 0x305   :  { %4295 = vmatprep.subr.bf16.mxu1 %v6334_v16 }
 0x306   :  { %v3536_v33 = vpop.f32.mrb[28].mxu0 }
 0x307   :  { %v3537_v49 = vpop.f32.mrb[29].mxu0 }
 0x308   :  { %v3538_v62 = vadd.f32 %v3537_v49, %v3536_v33  ;;  %4297 = vmatpush3.bf16.msra.mxu1 %v6334_v16 }
 0x30b   :  { %3704 = vmatmul.mubr.f32.vlgmr.msra.gmra.mrb[24].mxu1 %v6438_v12 }
 0x318   :  { %v4809_v37 = vpop.permute.xlu1 %4808 }
 0x31b   :  { %v4819_v3 = vpop.permute.xlu0 %4818 }
 0x31c   :  { %v4814_v55 = vpop.permute.xlu1 %4813 }
 0x31d   :  { %v4816_v17 = vunpack.i.h.bf16 %v4814_v55 }
 0x39e   :  { %v3489_v41 = vpop.f32.mrb[12].mxu1 }
 0x39f   :  { %v3490_v29 = vpop.f32.mrb[13].mxu1 }
 0x3a0   :  { %v6641_v13 = vadd.f32 %v3490_v29, %v3489_v41 }
 0x3a2   :  { %v3492_v15 = vpop.f32.mrb[14].mxu1 }
 0x3a3   :  { %v3493_v4 = vpop.f32.mrb[15].mxu1 }
 0x3a4   :  { %v6643_v44 = vadd.f32 %v3493_v4, %v3492_v15  ;;  %v4821_v15 = vunpack.i.h.bf16 %v4819_v3  ;;  %v4820_v4 = vunpack.i.l.bf16 %v4819_v3 }
 0x3a6   :  { %v3495_v57 = vpop.f32.mrb[16].mxu1 }
 0x3a7   :  { %v3496_v30 = vpop.f32.mrb[17].mxu1 }
 0x3a8   :  { %v6645_v53 = vadd.f32 %v3496_v30, %v3495_v57 }
 0x3aa   :  { %v3498_v25 = vpop.f32.mrb[18].mxu1 }
 0x3ab   :  { %v3499_v24 = vpop.f32.mrb[19].mxu1 }
 0x3ac   :  { %v6647_v40 = vadd.f32 %v3499_v24, %v3498_v25 }
 0x3be   :  { %v1893_v14 = vpop.f32.mrb[20].mxu1 }
 0x3bf   :  { %v1894_v16 = vadd.f32 %v1893_v14, %v1816_v63  ;;  %v1895_v20 = vpop.f32.mrb[21].mxu1 }
 0x3c0   :  { %v1896_v12 = vadd.f32 %v1895_v20, %v1818_v9 }
 0x3c1   :  { %v4887_v32 = vpack.i.bf16 %v1894_v16, %v6533_v58 }
 0x3c2   :  { %v1899_v45 = vpop.f32.mrb[22].mxu1  ;;  %v4822_v38 = vpack.i.bf16 %v1896_v12, %v1894_v16 }
 0x3c3   :  { %v1900_v1 = vadd.f32 %v1899_v45, %v1822_v18  ;;  %v1901_v23 = vpop.f32.mrb[23].mxu1  ;;  %v4810_v45 = vunpack.i.l.bf16 %v4809_v37 }
 0x3c4   :  { %v1902_v60 = vadd.f32 %v1901_v23, %v1824_v19  ;;  %4823 = vrot.lane.b32.xlu0 %v4822_v38, %s8086_s14  ;;  %v4308_v38 = vpack.c.bf16 %v4821_v15, %v4820_v4 }
 0x3c5   :  { %v4827_v35 = vpack.i.bf16 %v1900_v1, %v1894_v16  ;;  %v4892_v21 = vpack.i.bf16 %v1900_v1, %v6543_v27 }
 0x3c6   :  { %v4842_v36 = vpack.i.bf16 %v1902_v60, %v1900_v1  ;;  %v4862_v42 = vpack.i.bf16 %v1902_v60, %v1896_v12 }
 0x3c7   :  { %4828 = vrot.lane.b32.xlu1 %v4827_v35, %s8090_s15  ;;  %s8267_s15 = smov 56  }
 0x3c8   :  { %4833 = vrot.lane.b32.xlu0 %v4827_v35, %s8084_s16 }
 0x3cb   :  { %4843 = vrot.lane.b32.xlu1 %v4842_v36, %s8086_s14  ;;  %s8262_s14 = smov 60  }
 0x3cc   :  { %4838 = vrot.lane.b32.xlu0 %v4837_v48, %s8076_s3  ;;  %v597_v48 = vld [vmem:[%s7993_s5 + $0x8] sm:$0xff] }
 0x3cf   :  { %4848 = vrot.lane.b32.xlu1 %v6551_v22, %s8088_s17 }
 0x3d0   :  { %4863 = vrot.lane.b32.xlu0 %v4862_v42, %s8092_s20  ;;  %s8264_s20 = smov 40  }
 0x3d3   :  { %4853 = vrot.lane.b32.xlu1 %v4862_v42, %s4942_s18 }
 0x3d4   :  { %4868 = vrot.lane.b32.xlu0 %v4862_v42, %s8094_s21  ;;  %s4963_s21 = smov 48  }
 0x3d7   :  { %4858 = vrot.lane.b32.xlu1 %v6551_v22, %s8078_s19 }
 0x3de   :  { %v3705_v58 = vpop.f32.mrb[24].mxu1 }
 0x3df   :  { %v2051_v51 = vadd.f32 %v3705_v58, %v3538_v62  ;;  %v2045_v0 = vpop.f32.mrb[25].mxu1 }
 0x3e0   :  { %v2046_v10 = vadd.f32 %v3535_v5, %v2045_v0  ;;  %v4815_v5 = vunpack.i.l.bf16 %v4814_v55 }
 0x3e1   :  { %v4872_v6 = vpack.i.bf16 %v2051_v51, %v1902_v60 }
 0x3e2   :  { %v4897_v47 = vpack.i.bf16 %v2051_v51, %v2046_v10  ;;  %v4877_v27 = vpack.i.bf16 %v2046_v10, %v1896_v12  ;;  %v4304_v25 = vpack.c.bf16 %v4816_v17, %v4815_v5 }
 0x3e3   :  { %4873 = vrot.lane.b32.xlu1 %v4872_v6, %s8096_s0 }
 0x3e4   :  { %4878 = vrot.lane.b32.xlu0 %v4877_v27, %s8096_s0  ;;  %s8257_s0 = smov 44  }
 0x3e7   :  { %4888 = vrot.lane.b32.xlu1 %v4887_v32, %s8082_s24  ;;  %v4811_v32 = vunpack.i.h.bf16 %v4809_v37 }
 0x3e8   :  { %4883 = vrot.lane.b32.xlu0 %v6551_v22, %s8080_s25  ;;  %s4964_s25 = smov 84  }
 0x3eb   :  { %4898 = vrot.lane.b32.xlu1 %v4897_v47, %s4949_s26 }
 0x3ec   :  { %4893 = vrot.lane.b32.xlu0 %v4892_v21, %s8082_s24  ;;  %v2078_v21 = vsel %vm1082_vm2, %v4810_v45, %v4811_v32  ;;  %v1301_v32 = vlaneseq  ;;  %s8258_s24 = smov 80  }
 0x3ef   :  { %1193 = vperm.xlu1 %4902, %v597_v48  }
 0x3f0   :  { %1188 = vperm.xlu0 %4711, %v596_v7  }
 0x436   :  { %v4824_v56 = vpop.permute.xlu0 %4823 }
 0x437   :  { %v4826_v52 = vunpack.i.h.bf16 %v4824_v56  ;;  %v4825_v39 = vunpack.i.l.bf16 %v4824_v56 }
 0x439   :  { %v4829_v63 = vpop.permute.xlu1 %4828  ;;  %v2136_v57 = vsel %vm1142_vm1, %v4825_v39, %v4826_v52 }
 0x43a   :  { %v4831_v22 = vunpack.i.h.bf16 %v4829_v63  ;;  %v4830_v9 = vunpack.i.l.bf16 %v4829_v63  ;;  %v4834_v18 = vpop.permute.xlu0 %4833 }
 0x43b   :  { %v4836_v19 = vunpack.i.h.bf16 %v4834_v18  ;;  %v4835_v31 = vunpack.i.l.bf16 %v4834_v18 }
 0x43c   :  { %v4298_v28 = vpack.c.bf16 %v4831_v22, %v4830_v9 }
 0x43d   :  { %v4302_v33 = vpack.c.bf16 %v4836_v19, %v4835_v31  ;;  %v4844_v49 = vpop.permute.xlu1 %4843 }
 0x43e   :  { %v4846_v62 = vunpack.i.h.bf16 %v4844_v49  ;;  %v4845_v41 = vunpack.i.l.bf16 %v4844_v49  ;;  %4299 = vmatprep.subr.bf16.mxu0 %v4298_v28  ;;  %v4839_v29 = vpop.permute.xlu0 %4838 }
 0x43f   :  { %4301 = vmatpush3.bf16.msra.mxu0 %v4300_v8  ;;  %v4841_v24 = vunpack.i.h.bf16 %v4839_v29  ;;  %v4840_v14 = vunpack.i.l.bf16 %v4839_v29 }
 0x440   :  { %4303 = vmatprep.subr.bf16.mxu0 %v4302_v33  ;;  %v2137_v30 = vsel %vm1142_vm1, %v4845_v41, %v4846_v62  ;;  %vm1354_vm1 = vcmask 1008320  }
 0x441   :  { %v4849_v16 = vpop.permute.xlu1 %4848  ;;  %v4306_v20 = vpack.c.bf16 %v2137_v30, %v2136_v57  ;;  %v2079_v43 = vsel %vm1082_vm2, %v4840_v14, %v4841_v24  ;;  %vm6769_vm2 = vmor %vm1365_vm15, %vm1364_vm14  ;;  %vm8100_vm14 = vcmask 844320  }
 0x442   :  { %v4864_v12 = vpop.permute.xlu0 %4863  ;;  %v4312_v42 = vpack.c.bf16 %v2079_v43, %v2078_v21  ;;  %v4851_v58 = vunpack.i.h.bf16 %v4849_v16  ;;  %v4850_v51 = vunpack.i.l.bf16 %v4849_v16 }
 0x443   :  { %4305 = vmatpush3.bf16.msra.mxu0 %v4304_v25  ;;  %v4866_v8 = vunpack.i.h.bf16 %v4864_v12  ;;  %v4865_v1 = vunpack.i.l.bf16 %v4864_v12 }
 0x444   :  { %4307 = vmatprep.subr.bf16.mxu0 %v4306_v20  ;;  %v4316_v27 = vpack.c.bf16 %v4851_v58, %v4850_v51  ;;  %v4950_v20 = vmov 1983009808  }
 0x445   :  { %v4854_v50 = vpop.permute.xlu1 %4853  ;;  %v4314_v0 = vpack.c.bf16 %v4866_v8, %v4865_v1  ;;  %v1299_v12 = vunpack.c.l.s4 %v4950_v20  ;;  %v2526_v20 = vld [vmem:[%s7994_s6 + $0x58] sm:$0xff] }
 0x446   :  { %v4856_v23 = vunpack.i.h.bf16 %v4854_v50  ;;  %v4855_v60 = vunpack.i.l.bf16 %v4854_v50  ;;  %v4869_v35 = vpop.permute.xlu0 %4868 }
 0x447   :  { %4309 = vmatpush3.bf16.msra.mxu0 %v4308_v38  ;;  %v4871_v10 = vunpack.i.h.bf16 %v4869_v35  ;;  %v4870_v6 = vunpack.i.l.bf16 %v4869_v35  ;;  %v1300_v45 = vunpack.c.0.s8 %v1299_v12  ;;  %v6693_v38 = vshrl.u32 %v1301_v32, 7  ;;  %v2523_v12 = vld [vmem:[%s7994_s6 + $0x40] sm:$0xff] }
 0x448   :  { %v4310_v36 = vpack.c.bf16 %v4856_v23, %v4855_v60 }
 0x449   :  { %v4859_v47 = vpop.permute.xlu1 %4858  ;;  %v4318_v37 = vpack.c.bf16 %v4871_v10, %v4870_v6 }
 0x44a   :  { %4311 = vmatprep.subr.bf16.mxu0 %v4310_v36  ;;  %v4861_v48 = vunpack.i.h.bf16 %v4859_v47  ;;  %v4860_v7 = vunpack.i.l.bf16 %v4859_v47 }
 0x44b   :  { %4313 = vmatpush3.bf16.msra.mxu0 %v4312_v42 }
 0x44c   :  { %4315 = vmatprep.subr.bf16.mxu0 %v4314_v0  ;;  %v4320_v3 = vpack.c.bf16 %v4861_v48, %v4860_v7 }
 0x44f   :  { %4317 = vmatpush3.bf16.msra.mxu0 %v4316_v27 }
 0x450   :  { %4319 = vmatprep.subr.bf16.mxu0 %v4318_v37 }
 0x453   :  { %4321 = vmatpush3.bf16.msra.mxu0 %v4320_v3  ;;  %v2516_v3 = vld [vmem:[%s7994_s6 + $0x8] sm:$0xff] }
 0x455   :  { %v4874_v55 = vpop.permute.xlu1 %4873 }
 0x456   :  { %v4876_v56 = vunpack.i.h.bf16 %v4874_v55  ;;  %v4875_v63 = vunpack.i.l.bf16 %v4874_v55  ;;  %v4879_v22 = vpop.permute.xlu0 %4878  ;;  %v2518_v55 = vld [vmem:[%s7994_s6 + $0x18] sm:$0xff] }
 0x457   :  { %v4881_v9 = vunpack.i.h.bf16 %v4879_v22  ;;  %v4880_v18 = vunpack.i.l.bf16 %v4879_v22  ;;  %v2517_v22 = vld [vmem:[%s7994_s6 + $0x10] sm:$0xff] }
 0x458   :  { %v2169_v19 = vsel %vm1175_vm3, %v4875_v63, %v4876_v56  ;;  %v2515_v56 = vld [vmem:[%s7994_s6] sm:$0xff]  ;;  %v4330_v63 = vpack.c.bf16 %v2518_v55, %v2516_v3 }
 0x459   :  { %v4889_v31 = vpop.permute.xlu1 %4888  ;;  %v2168_v52 = vsel %vm1175_vm3, %v4880_v18, %v4881_v9  ;;  %v2520_v9 = vld [vmem:[%s7994_s6 + $0x28] sm:$0xff]  ;;  %v2522_v18 = vld [vmem:[%s7994_s6 + $0x38] sm:$0xff]  ;;  %vm1379_vm3 = vcmask 549120  }
 0x45a   :  { %v4884_v39 = vpop.permute.xlu0 %4883  ;;  %v4322_v28 = vpack.c.bf16 %v2169_v19, %v2168_v52  ;;  %v4891_v33 = vunpack.i.h.bf16 %v4889_v31  ;;  %v4890_v49 = vunpack.i.l.bf16 %v4889_v31  ;;  %v4332_v31 = vpack.c.bf16 %v2517_v22, %v2515_v56  ;;  %4331 = vmatprep.subr.bf16.mxu1 %v4330_v63  ;;  %v2538_v63 = vld [vmem:[%s7994_s6 + $0xb8] sm:$0xff] }
 0x45b   :  { %v4886_v17 = vunpack.i.h.bf16 %v4884_v39  ;;  %v4885_v5 = vunpack.i.l.bf16 %v4884_v39  ;;  %v4334_v52 = vpack.c.bf16 %v2522_v18, %v2520_v9  ;;  %v2519_v39 = vld [vmem:[%s7994_s6 + $0x20] sm:$0xff]  ;;  %v2537_v18 = vld [vmem:[%s7994_s6 + $0xb0] sm:$0xff] }
 0x45c   :  { %4323 = vmatprep.subr.bf16.mxu0 %v4322_v28  ;;  %v2110_v24 = vsel %vm1115_vm4, %v4890_v49, %v4891_v33  ;;  %v2521_v28 = vld [vmem:[%s7994_s6 + $0x30] sm:$0xff]  ;;  %4333 = vmatpush1.bf16.msra.mxu1 %v4332_v31  ;;  %v2535_v9 = vld [vmem:[%s7994_s6 + $0xa0] sm:$0xff] }
 0x45d   :  { %v4324_v62 = vpack.c.bf16 %v4886_v17, %v4885_v5  ;;  %v4899_v41 = vpop.permute.xlu1 %4898  ;;  %v4336_v5 = vpack.c.bf16 %v2521_v28, %v2519_v39  ;;  %4335 = vmatprep.subr.bf16.mxu1 %v4334_v52  ;;  %v4352_v39 = vpack.c.bf16 %v2537_v18, %v2535_v9  ;;  %v2540_v28 = vld [vmem:[%s7994_s6 + $0xc8] sm:$0xff]  ;;  %v2566_v9 = vld [vmem:[%s7994_s6 + $0x198] sm:$0xff] }
 0x45e   :  { %v4901_v29 = vunpack.i.h.bf16 %v4899_v41  ;;  %v4900_v15 = vunpack.i.l.bf16 %v4899_v41  ;;  %v4894_v4 = vpop.permute.xlu0 %4893 }
 0x45f   :  { %v4896_v57 = vunpack.i.h.bf16 %v4894_v4  ;;  %v4895_v30 = vunpack.i.l.bf16 %v4894_v4  ;;  %4325 = vmatpush3.bf16.msra.mxu0 %v4324_v62 }
 0x460   :  { %v4326_v25 = vpack.c.bf16 %v4901_v29, %v4900_v15  ;;  %4337 = vmatpush1.bf16.msra.mxu1 %v4336_v5  ;;  %v2539_v5 = vld [vmem:[%s7994_s6 + $0xc0] sm:$0xff] }
 0x461   :  { %v2111_v14 = vsel %vm1115_vm4, %v4895_v30, %v4896_v57  ;;  %vm1395_vm4 = vcmask 1041216  }
 0x462   :  { %v4328_v16 = vpack.c.bf16 %v2111_v14, %v2110_v24  ;;  %4327 = vmatprep.subr.bf16.mxu0 %v4326_v25  ;;  %vm6778_vm15 = vmor %vm1396_vm7, %vm1395_vm4  ;;  %vm1433_vm4 = vcmask 1041344   ;;  %vm1434_vm7 = vcmask 223234  }
 0x464   :  { %4329 = vmatpush3.bf16.msra.mxu0 %v4328_v16  ;;  %v2524_v16 = vld [vmem:[%s7994_s6 + $0x48] sm:$0xff] }
 0x467   :  { %2243 = vmatmul.mubr.f32.vlgmr.msra.gmra.mrb[30].mxu0 %v6564_v34  ;;  %v6704_v34 = vsub.s32 %v1300_v45, %v6693_v38  ;;  %v4338_v45 = vpack.c.bf16 %v2526_v20, %v2524_v16 }
 0x468   :  { %2247 = vmatprep.mubr.f32.mxu0 %v6570_v11 }
 0x469   :  { %4339 = vmatprep.subr.bf16.mxu1 %v4338_v45  ;;  %v2550_v45 = vld [vmem:[%s7994_s6 + $0x118] sm:$0xff] }
 0x46b   :  { %2248 = vmatmul.mubr.f32.gmra.mrb[32].mxu0 %v6578_v61 }
 0x46c   :  { %2252 = vmatprep.mubr.f32.mxu0 %v6584_v59 }
 0x46e   :  { %v6696_v43 = vpop.permute.xlu1 %1193 }
 0x46f   :  { %v1278_v50 = vadd.f32 %v6643_v44, %v6696_v43  ;;  %v6700_v8 = vpop.permute.xlu0 %1188  ;;  %2253 = vmatmul.mubr.f32.gmra.mrb[34].mxu0 %v6592_v2 }
 0x470   :  { %v1273_v11 = vadd.f32 %v6641_v13, %v6700_v8  ;;  %2257 = vmatprep.mubr.f32.mxu0 %v6598_v26 }
 0x471   :  { %v1292_v61 = vmax.f32 %v1278_v50, 0.0  ;;  %v2525_v50 = vld [vmem:[%s7994_s6 + $0x50] sm:$0xff] }
 0x472   :  { %v1291_v59 = vmax.f32 %v1273_v11, 0.0 }
 0x473   :  { %2258 = vmatmul.mubr.f32.gmra.mrb[36].mxu0 %v6606_v46  ;;  %v1406_v23 = vcombine.high %v1292_v61, %v1292_v61  ;;  %v1375_v58 = vrot.slane %v1292_v61, %v6704_v34  ;;  %v4340_v61 = vpack.c.bf16 %v2525_v50, %v2523_v12 }
 0x474   :  { %v1304_v1 = vrot.slane %v1291_v59, %v6704_v34  ;;  %v1330_v44 = vcombine.high %v1291_v59, %v1291_v59  ;;  %1296 = vst.msk [vmem:[#allocation2] sm:$0x1] %vm1295_vm5, %v1291_v59 }
 0x475   :  { %v6714_v13 = vrot.slane %v1406_v23, %v6704_v34  ;;  %v1388_v51 = vcombine.high %v1375_v58, %v1375_v58  ;;  %v3371_v0 = vrot.slane %v1375_v58, 9  ;;  %4341 = vmatpush1.bf16.msra.mxu1 %v4340_v61  ;;  %v2527_v23 = vld [vmem:[%s7994_s6 + $0x60] sm:$0xff]  ;;  %v598_v61 = vld [vmem:[%s7993_s5 + $0x10] sm:$0xff] }
 0x476   :  { %v1337_v2 = vrot.slane %v1330_v44, %v6704_v34  ;;  %v1312_v60 = vcombine.high %v1304_v1, %v1304_v1  ;;  %v3367_v46 = vrot.slane %v1304_v1, 9  ;;  %v2528_v1 = vld [vmem:[%s7994_s6 + $0x68] sm:$0xff]  ;;  %v2530_v44 = vld [vmem:[%s7994_s6 + $0x78] sm:$0xff] }
 0x477   :  { %v6721_v36 = vcombine.high %v6714_v13, %v6714_v13  ;;  %v3372_v10 = vrot.slane %v1388_v51, 9  ;;  %v3373_v20 = vrot.slane %v6714_v13, 9 }
 0x478   :  { %v3368_v35 = vrot.slane %v1312_v60, 9  ;;  %v1350_v21 = vcombine.high %v1337_v2, %v1337_v2  ;;  %v3369_v42 = vrot.slane %v1337_v2, 9 }
 0x47a   :  { %1320 = vrot.lane.b32.xlu0 %v3368_v35, %s4951_s23  ;;  %v3370_v26 = vrot.slane %v1350_v21, 9  ;;  %v4342_v35 = vpack.c.bf16 %v2530_v44, %v2528_v1 }
 0x47c   :  { %1358 = vrot.lane.b32.xlu1 %v3370_v26, %s4952_s2  ;;  %4343 = vmatprep.subr.bf16.mxu1 %v4342_v35 }
 0x47e   :  { %1307 = vrot.lane.b32.xlu0 %v3367_v46, %s4953_s27 }
 0x480   :  { %1427 = vrot.lane.b32.xlu1 %v6721_v36, %s4954_s28 }
 0x482   :  { %1313 = vrot.lane.b32.xlu0 %v1312_v60, %s4955_s29 }
 0x486   :  { %1338 = vrot.lane.b32.xlu0 %v1337_v2, %s4956_s1 }
 0x48a   :  { %1345 = vrot.lane.b32.xlu0 %v3369_v42, %s4957_s4 }
 0x48e   :  { %1351 = vrot.lane.b32.xlu0 %v1350_v21, %s4958_s30  ;;  %v2529_v21 = vld [vmem:[%s7994_s6 + $0x70] sm:$0xff] }
 0x48f   :  { %v4344_v46 = vpack.c.bf16 %v2529_v21, %v2527_v23 }
 0x491   :  { %4345 = vmatpush1.bf16.msra.mxu1 %v4344_v46  ;;  %v2553_v46 = vld [vmem:[%s7994_s6 + $0x130] sm:$0xff] }
 0x492   :  { %1389 = vrot.lane.b32.xlu0 %v1388_v51, %s4959_s11  ;;  %v2532_v51 = vld [vmem:[%s7994_s6 + $0x88] sm:$0xff] }
 0x496   :  { %1376 = vrot.lane.b32.xlu0 %v1375_v58, %s4960_s22 }
 0x49a   :  { %1383 = vrot.lane.b32.xlu0 %v3371_v0, %s4961_s13 }
 0x49e   :  { %1401 = vrot.lane.b32.xlu0 %v3372_v10, %s4962_s12 }
 0x4ec   :  { %v1321_v6 = vpop.permute.xlu0 %1320 }
 0x4ed   :  { %v1322_v27 = vrot.slane %v1321_v6, 6 }
 0x4ee   :  { %v1359_v17 = vpop.permute.xlu1 %1358 }
 0x4ef   :  { %v1324_v37 = vsel %vm1323_vm9, %v1322_v27, %v1321_v6  ;;  %v1360_v49 = vrot.slane %v1359_v17, 6  ;;  %v2531_v27 = vld [vmem:[%s7994_s6 + $0x80] sm:$0xff] }
 0x4f0   :  { %v1308_v47 = vpop.permute.xlu0 %1307 }
 0x4f1   :  { %1311 = vst.msk [vmem:[#allocation2] sm:$0x1] %vm1310_vm6, %v1308_v47  ;;  %v1362_v29 = vsel %vm8098_vm0, %v1360_v49, %v1359_v17  ;;  %vm8099_vm0 = vcmask 385120   ;;  %v2542_v17 = vld [vmem:[%s7994_s6 + $0xd8] sm:$0xff]  ;;  %v2541_v49 = vld [vmem:[%s7994_s6 + $0xd0] sm:$0xff] }
 0x4f4   :  { %v1314_v7 = vpop.permute.xlu0 %1313 }
 0x4f5   :  { %1317 = vst.msk [vmem:[#allocation2] sm:$0x1] %vm1316_vm10, %v1314_v7  ;;  %v2533_v7 = vld [vmem:[%s7994_s6 + $0x90] sm:$0xff] }
 0x4f6   :  { %1329 = vst.msk [vmem:[#allocation2] sm:$0x5] %vm6735_vm11, %v1324_v37  ;;  %v4348_v37 = vpack.c.bf16 %v2533_v7, %v2531_v27  ;;  %v2560_v27 = vld [vmem:[%s7994_s6 + $0x168] sm:$0xff]  ;;  %v2562_v7 = vld [vmem:[%s7994_s6 + $0x178] sm:$0xff] }
 0x4f8   :  { %v1339_v19 = vpop.permute.xlu0 %1338 }
 0x4f9   :  { %1342 = vst.msk [vmem:[#allocation2 + $0x2] sm:$0x1] %vm1341_vm12, %v1339_v19 }
 0x4fc   :  { %v1346_v33 = vpop.permute.xlu0 %1345 }
 0x4fd   :  { %1349 = vst.msk [vmem:[#allocation2 + $0x2] sm:$0x1] %vm1348_vm13, %v1346_v33  ;;  %v4354_v33 = vpack.c.bf16 %v2542_v17, %v2540_v28 }
 0x500   :  { %v1352_v41 = vpop.permute.xlu0 %1351 }
 0x501   :  { %1355 = vst.msk [vmem:[#allocation2 + $0x2] sm:$0x1] %vm1354_vm1, %v1352_v41 }
 0x502   :  { %1367 = vst.msk [vmem:[#allocation2 + $0x2] sm:$0x5] %vm6769_vm2, %v1362_v29 }
 0x504   :  { %v1390_v15 = vpop.permute.xlu0 %1389 }
 0x505   :  { %v1391_v57 = vrot.slane %v1390_v15, 6 }
 0x507   :  { %v1393_v24 = vsel %vm8101_vm8, %v1391_v57, %v1390_v15  ;;  %v4356_v15 = vpack.c.bf16 %v2541_v49, %v2539_v5  ;;  %v2546_v57 = vld [vmem:[%s7994_s6 + $0xf8] sm:$0xff]  ;;  %v2572_v49 = vld [vmem:[%s7994_s6 + $0x1c8] sm:$0xff]  ;;  %vm7018_vm8 = vmor %vm1434_vm7, %vm1433_vm4  ;;  %vm1500_vm4 = vcmask 949248   ;;  %vm1493_vm7 = vcmask 942720  }
 0x508   :  { %v1377_v4 = vpop.permute.xlu0 %1376  ;;  %v2570_v5 = vld [vmem:[%s7994_s6 + $0x1b8] sm:$0xff] }
 0x509   :  { %1380 = vst.msk [vmem:[#allocation2 + $0x4] sm:$0x1] %vm1379_vm3, %v1377_v4  ;;  %v2544_v4 = vld [vmem:[%s7994_s6 + $0xe8] sm:$0xff] }
 0x50c   :  { %v1384_v25 = vpop.permute.xlu0 %1383 }
 0x50d   :  { %1387 = vst.msk [vmem:[#allocation2 + $0x4] sm:$0x1] %vm8100_vm14, %v1384_v25  ;;  %v4358_v25 = vpack.c.bf16 %v2546_v57, %v2544_v4  ;;  %v2571_v57 = vld [vmem:[%s7994_s6 + $0x1c0] sm:$0xff]  ;;  %vm1424_vm14 = vcmask 975520  }
 0x50e   :  { %1398 = vst.msk [vmem:[#allocation2 + $0x4] sm:$0x5] %vm6778_vm15, %v1393_v24  ;;  %v2543_v24 = vld [vmem:[%s7994_s6 + $0xe0] sm:$0xff] }
 0x510   :  { %v1402_v14 = vpop.permute.xlu0 %1401 }
 0x511   :  { %1405 = vst.msk [vmem:[#allocation2 + $0x6] sm:$0x1] %vm8099_vm0, %v1402_v14  ;;  %v2545_v14 = vld [vmem:[%s7994_s6 + $0xf0] sm:$0xff]  ;;  %vm1430_vm0 = vcmask 982016  }
 0x512   :  { %v4360_v12 = vpack.c.bf16 %v2545_v14, %v2543_v24  ;;  %v2576_v24 = vld [vmem:[%s7994_s6 + $0x1e8] sm:$0xff]  ;;  %v2578_v14 = vld [vmem:[%s7994_s6 + $0x1f8] sm:$0xff] }
 0x53a   :  { %v3589_v32 = vpop.f32.mrb[30].mxu0 }
 0x53b   :  { %v3590_v11 = vpop.f32.mrb[31].mxu0 }
 0x53c   :  { %v3591_v59 = vadd.f32 %v3590_v11, %v3589_v32  ;;  %v2548_v32 = vld [vmem:[%s7994_s6 + $0x108] sm:$0xff]  ;;  %v2549_v11 = vld [vmem:[%s7994_s6 + $0x110] sm:$0xff] }
 0x53d   :  { %v4362_v50 = vpack.c.bf16 %v2550_v45, %v2548_v32  ;;  %v2575_v32 = vld [vmem:[%s7994_s6 + $0x1e0] sm:$0xff]  ;;  %v2577_v45 = vld [vmem:[%s7994_s6 + $0x1f0] sm:$0xff] }
 0x53e   :  { %v2245_v2 = vadd.f32 %v3591_v59, %v6700_v8  ;;  %v3592_v60 = vpop.f32.mrb[32].mxu0  ;;  %v2534_v8 = vld [vmem:[%s7994_s6 + $0x98] sm:$0xff] }
 0x53f   :  { %v3593_v26 = vpop.f32.mrb[33].mxu0  ;;  %v4346_v47 = vpack.c.bf16 %v2534_v8, %v2532_v51  ;;  %v2558_v51 = vld [vmem:[%s7994_s6 + $0x158] sm:$0xff] }
 0x540   :  { %v2263_v42 = vmax.f32 %v2245_v2, 0.0  ;;  %v3594_v58 = vadd.f32 %v3593_v26, %v3592_v60  ;;  %v2552_v2 = vld [vmem:[%s7994_s6 + $0x128] sm:$0xff]  ;;  %v2554_v60 = vld [vmem:[%s7994_s6 + $0x138] sm:$0xff]  ;;  %v2551_v26 = vld [vmem:[%s7994_s6 + $0x120] sm:$0xff] }
 0x541   :  { %4347 = vmatprep.subr.bf16.mxu1 %v4346_v47  ;;  %v4366_v21 = vpack.c.bf16 %v2554_v60, %v2552_v2  ;;  %v1428_v60 = vpop.permute.xlu1 %1427 }
 0x542   :  { %2267 = vst.msk [vmem:[#allocation2 + $0x1] sm:$0x1] %vm1295_vm5, %v2263_v42  ;;  %v2250_v0 = vadd.f32 %v3594_v58, %v6696_v43  ;;  %v2275_v10 = vrot.slane %v2263_v42, %v6704_v34  ;;  %v2295_v6 = vcombine.high %v2263_v42, %v2263_v42  ;;  %4349 = vmatpush1.bf16.msra.mxu1 %v4348_v37  ;;  %v2536_v43 = vld [vmem:[%s7994_s6 + $0xa8] sm:$0xff]  ;;  %v3595_v1 = vpop.f32.mrb[34].mxu0  ;;  %vm1417_vm5 = vcmask 680320  }
 0x543   :  { %v4350_v52 = vpack.c.bf16 %v2538_v63, %v2536_v43  ;;  %v3596_v23 = vpop.f32.mrb[35].mxu0  ;;  %v4368_v42 = vpack.c.bf16 %v2553_v46, %v2551_v26  ;;  %v2556_v58 = vld [vmem:[%s7994_s6 + $0x148] sm:$0xff]  ;;  %v4374_v37 = vpack.c.bf16 %v2562_v7, %v2560_v27 }
 0x544   :  { %v6827_v3 = vmax.f32 %v2250_v0, 0.0  ;;  %v3383_v55 = vrot.slane %v2275_v10, 9  ;;  %v2302_v56 = vrot.slane %v2295_v6, %v6704_v34  ;;  %v2282_v19 = vcombine.high %v2275_v10, %v2275_v10  ;;  %v2555_v0 = vld [vmem:[%s7994_s6 + $0x140] sm:$0xff]  ;;  %v2557_v10 = vld [vmem:[%s7994_s6 + $0x150] sm:$0xff]  ;;  %v2564_v63 = vld [vmem:[%s7994_s6 + $0x188] sm:$0xff] }
 0x545   :  { %4351 = vmatprep.subr.bf16.mxu1 %v4350_v52  ;;  %v6907_v35 = vadd.f32 %v3596_v23, %v3595_v1  ;;  %v4370_v8 = vpack.c.bf16 %v2558_v51, %v2556_v58  ;;  %v4372_v47 = vpack.c.bf16 %v2557_v10, %v2555_v0  ;;  %v4378_v18 = vpack.c.bf16 %v2566_v9, %v2564_v63  ;;  %v2565_v52 = vld [vmem:[%s7994_s6 + $0x190] sm:$0xff]  ;;  %v599_v23 = vld [vmem:[%s7993_s5 + $0x18] sm:$0xff]  ;;  %s4965_s5 = smov 28  }
 0x546   :  { %v6838_v22 = vrot.slane %v6827_v3, %v6704_v34  ;;  %2278 = vrot.lane.b32.xlu1 %v3383_v55, %s4953_s27  ;;  %2303 = vrot.lane.b32.xlu0 %v2302_v56, %s4956_s1  ;;  %v3384_v41 = vrot.slane %v2282_v19, 9  ;;  %v3385_v16 = vrot.slane %v2302_v56, 9  ;;  %v2313_v59 = vcombine.high %v2302_v56, %v2302_v56  ;;  %v2559_v55 = vld [vmem:[%s7994_s6 + $0x160] sm:$0xff]  ;;  %v2561_v56 = vld [vmem:[%s7994_s6 + $0x170] sm:$0xff]  ;;  %s8256_s27 = smov 8  }
 0x547   :  { %4353 = vmatpush1.bf16.msra.mxu1 %v4352_v39  ;;  %v4376_v43 = vpack.c.bf16 %v2561_v56, %v2559_v55  ;;  %v2357_v39 = vcombine.high %v6827_v3, %v6827_v3  ;;  %v2567_v3 = vld [vmem:[%s7994_s6 + $0x1a0] sm:$0xff] }
 0x548   :  { %v6850_v31 = vcombine.high %v6838_v22, %v6838_v22  ;;  %4355 = vmatprep.subr.bf16.mxu1 %v4354_v33  ;;  %v3386_v6 = vrot.slane %v2313_v59, 9  ;;  %v3387_v28 = vrot.slane %v6838_v22, 9 }
 0x54a   :  { %2283 = vrot.lane.b32.xlu1 %v2282_v19, %s4955_s29  ;;  %1414 = vrot.lane.b32.xlu0 %v6714_v13, %s4963_s21  ;;  %v3388_v29 = vrot.slane %v6850_v31, 9  ;;  %v2547_v13 = vld [vmem:[%s7994_s6 + $0x100] sm:$0xff] }
 0x54b   :  { %4357 = vmatpush1.bf16.msra.mxu1 %v4356_v15  ;;  %v4364_v44 = vpack.c.bf16 %v2549_v11, %v2547_v13  ;;  %v2563_v19 = vld [vmem:[%s7994_s6 + $0x180] sm:$0xff]  ;;  %v2580_v13 = vld [vmem:[%s7994_s6 + $0x208] sm:$0xff]  ;;  %v2582_v11 = vld [vmem:[%s7994_s6 + $0x218] sm:$0xff] }
 0x54c   :  { %4359 = vmatprep.subr.bf16.mxu1 %v4358_v25  ;;  %v4380_v17 = vpack.c.bf16 %v2565_v52, %v2563_v19  ;;  %v2573_v25 = vld [vmem:[%s7994_s6 + $0x1d0] sm:$0xff]  ;;  %v4394_v1 = vpack.c.bf16 %v2582_v11, %v2580_v13  ;;  %v2583_v13 = vld [vmem:[%s7994_s6 + $0x220] sm:$0xff] }
 0x54d   :  { %v2585_v11 = vld [vmem:[%s7994_s6 + $0x230] sm:$0xff] }
 0x54e   :  { %2289 = vrot.lane.b32.xlu1 %v3384_v41, %s4951_s23  ;;  %2353 = vrot.lane.b32.xlu0 %v3388_v29, %s4962_s12  ;;  %v2574_v41 = vld [vmem:[%s7994_s6 + $0x1d8] sm:$0xff]  ;;  %v2364_v29 = vrot.slane %v2357_v39, %v6704_v34  ;;  %s8261_s12 = smov 24   ;;  %s8266_s23 = smov 20  }
 0x54f   :  { %4361 = vmatpush1.bf16.msra.mxu1 %v4360_v12  ;;  %v4386_v4 = vpack.c.bf16 %v2574_v41, %v2572_v49  ;;  %v4390_v12 = vpack.c.bf16 %v2578_v14, %v2576_v24  ;;  %v2584_v14 = vld [vmem:[%s7994_s6 + $0x228] sm:$0xff] }
 0x550   :  { %4363 = vmatprep.subr.bf16.mxu1 %v4362_v50  ;;  %v3598_v50 = vpop.f32.mrb[36].mxu0 }
 0x552   :  { %2309 = vrot.lane.b32.xlu1 %v3385_v16, %s4957_s4  ;;  %1421 = vrot.lane.b32.xlu0 %v3373_v20, %s4964_s25  ;;  %v6992_v16 = vcombine.high %v2364_v29, %v2364_v29  ;;  %v4388_v20 = vpack.c.bf16 %v2573_v25, %v2571_v57  ;;  %v2581_v57 = vld [vmem:[%s7994_s6 + $0x210] sm:$0xff]  ;;  %s8259_s4 = smov 96  }
 0x553   :  { %4365 = vmatpush1.bf16.msra.mxu1 %v4364_v44  ;;  %v3599_v44 = vpop.f32.mrb[37].mxu0 }
 0x554   :  { %4367 = vmatprep.subr.bf16.mxu1 %v4366_v21  ;;  %v7012_v2 = vadd.f32 %v3599_v44, %v3598_v50  ;;  %v4400_v44 = vpack.c.bf16 %v2585_v11, %v2583_v13 }
 0x556   :  { %2314 = vrot.lane.b32.xlu1 %v2313_v59, %s4958_s30  ;;  %1198 = vperm.xlu0 %4711, %v598_v61   ;;  %v3389_v61 = vrot.slane %v2364_v29, 9  ;;  %v4392_v59 = vpack.c.bf16 %v2577_v45, %v2575_v32  ;;  %s8263_s30 = smov 4  }
 0x557   :  { %4369 = vmatpush1.bf16.msra.mxu1 %v4368_v42 }
 0x558   :  { %4371 = vmatprep.subr.bf16.mxu1 %v4370_v8  ;;  %v1429_v8 = vrot.slane %v1428_v60, 6 }
 0x55a   :  { %2334 = vrot.lane.b32.xlu1 %v6838_v22, %s4960_s22  ;;  %v2569_v22 = vld [vmem:[%s7994_s6 + $0x1b0] sm:$0xff]  ;;  %v1431_v7 = vsel %vm1430_vm0, %v1429_v8, %v1428_v60  ;;  %s8260_s22 = smov 112  }
 0x55b   :  { %4373 = vmatpush1.bf16.msra.mxu1 %v4372_v47  ;;  %v4384_v15 = vpack.c.bf16 %v2569_v22, %v2567_v3  ;;  %v3374_v22 = vrot.slane %v6721_v36, 9 }
 0x55c   :  { %4375 = vmatprep.subr.bf16.mxu1 %v4374_v37 }
 0x55e   :  { %2320 = vrot.lane.b32.xlu1 %v3386_v6, %s4952_s2  ;;  %v2591_v6 = vld [vmem:[%s7994_s6 + $0x260] sm:$0xff] }
 0x55f   :  { %4377 = vmatpush1.bf16.msra.mxu1 %v4376_v43 }
 0x560   :  { %4379 = vmatprep.subr.bf16.mxu1 %v4378_v18 }
 0x562   :  { %2345 = vrot.lane.b32.xlu1 %v6850_v31, %s4959_s11  ;;  %v2568_v31 = vld [vmem:[%s7994_s6 + $0x1a8] sm:$0xff] }
 0x563   :  { %v4382_v33 = vpack.c.bf16 %v2570_v5, %v2568_v31  ;;  %4381 = vmatpush1.bf16.msra.mxu1 %v4380_v17 }
 0x565   :  { %4383 = vmatprep.subr.bf16.mxu1 %v4382_v33 }
 0x566   :  { %2340 = vrot.lane.b32.xlu1 %v3387_v28, %s4961_s13  ;;  %s8268_s13 = smov 92  }
 0x567   :  { %4385 = vmatpush1.bf16.msra.mxu1 %v4384_v15 }
 0x568   :  { %4387 = vmatprep.subr.bf16.mxu1 %v4386_v4  ;;  %v2579_v4 = vld [vmem:[%s7994_s6 + $0x200] sm:$0xff] }
 0x569   :  { %v4396_v32 = vpack.c.bf16 %v2581_v57, %v2579_v4  ;;  %v3390_v57 = vrot.slane %v6992_v16, 9 }
 0x56a   :  { %2365 = vrot.lane.b32.xlu1 %v2364_v29, %s4963_s21 }
 0x56b   :  { %4389 = vmatpush1.bf16.msra.mxu1 %v4388_v20  ;;  %v2586_v20 = vld [vmem:[%s7994_s6 + $0x238] sm:$0xff] }
 0x56c   :  { %4391 = vmatprep.subr.bf16.mxu1 %v4390_v12  ;;  %v4398_v50 = vpack.c.bf16 %v2586_v20, %v2584_v14  ;;  %v2609_v14 = vld [vmem:[%s7994_s6 + $0x2f0] sm:$0xff] }
 0x56e   :  { %2376 = vrot.lane.b32.xlu1 %v6992_v16, %s4954_s28  ;;  %v2612_v16 = vld [vmem:[%s7994_s6 + $0x308] sm:$0xff] }
 0x56f   :  { %4393 = vmatpush1.bf16.msra.mxu1 %v4392_v59  ;;  %v2588_v59 = vld [vmem:[%s7994_s6 + $0x248] sm:$0xff] }
 0x570   :  { %4395 = vmatprep.subr.bf16.mxu1 %v4394_v1  ;;  %v2590_v1 = vld [vmem:[%s7994_s6 + $0x258] sm:$0xff] }
 0x571   :  { %v4402_v60 = vpack.c.bf16 %v2590_v1, %v2588_v59  ;;  %v2613_v59 = vld [vmem:[%s7994_s6 + $0x310] sm:$0xff] }
 0x572   :  { %2371 = vrot.lane.b32.xlu1 %v3389_v61, %s4964_s25  ;;  %s4966_s25 = smov 64  }
 0x576   :  { %1203 = vperm.xlu1 %4902, %v599_v23  }
 0x5b8   :  { %v2279_v21 = vpop.permute.xlu1 %2278  ;;  %v2304_v26 = vpop.permute.xlu0 %2303 }
 0x5b9   :  { %2281 = vst.msk [vmem:[#allocation2 + $0x1] sm:$0x1] %vm1310_vm6, %v2279_v21  ;;  %vm8252_vm6 = vcmask 1014784   ;;  %v2587_v21 = vld [vmem:[%s7994_s6 + $0x240] sm:$0xff] }
 0x5bc   :  { %v2284_v46 = vpop.permute.xlu1 %2283  ;;  %v1415_v42 = vpop.permute.xlu0 %1414 }
 0x5bd   :  { %2286 = vst.msk [vmem:[#allocation2 + $0x1] sm:$0x1] %vm1316_vm10, %v2284_v46  ;;  %vm8254_vm10 = vcmask 844320  }
 0x5be   :  { %1418 = vst.msk [vmem:[#allocation2 + $0x6] sm:$0x1] %vm1417_vm5, %v1415_v42  ;;  %v2592_v42 = vld [vmem:[%s7994_s6 + $0x268] sm:$0xff] }
 0x5c0   :  { %v2290_v58 = vpop.permute.xlu1 %2289  ;;  %v2354_v51 = vpop.permute.xlu0 %2353 }
 0x5c1   :  { %v2291_v0 = vrot.slane %v2290_v58, 6 }
 0x5c3   :  { %v2292_v10 = vsel %vm1323_vm9, %v2291_v0, %v2290_v58  ;;  %vm8253_vm9 = vcmask 850944   ;;  %v2594_v58 = vld [vmem:[%s7994_s6 + $0x278] sm:$0xff] }
 0x5c4   :  { %2294 = vst.msk [vmem:[#allocation2 + $0x1] sm:$0x5] %vm6735_vm11, %v2292_v10  ;;  %v2310_v47 = vpop.permute.xlu1 %2309  ;;  %v1422_v27 = vpop.permute.xlu0 %1421  ;;  %vm8255_vm11 = vcmask 385120   ;;  %v4406_v10 = vpack.c.bf16 %v2594_v58, %v2592_v42  ;;  %v2615_v42 = vld [vmem:[%s7994_s6 + $0x320] sm:$0xff]  ;;  %v2617_v58 = vld [vmem:[%s7994_s6 + $0x330] sm:$0xff] }
 0x5c5   :  { %2306 = vst.msk [vmem:[#allocation2 + $0x3] sm:$0x1] %vm1341_vm12, %v2304_v26  ;;  %v2589_v26 = vld [vmem:[%s7994_s6 + $0x250] sm:$0xff]  ;;  %vm1442_vm12 = vcmask 516320  }
 0x5c6   :  { %1425 = vst.msk [vmem:[#allocation2 + $0x6] sm:$0x1] %vm1424_vm14, %v1422_v27  ;;  %v4404_v0 = vpack.c.bf16 %v2589_v26, %v2587_v21 }
 0x5c7   :  { %2312 = vst.msk [vmem:[#allocation2 + $0x3] sm:$0x1] %vm1348_vm13, %v2310_v47  ;;  %vm1465_vm13 = vcmask 1041184  }
 0x5c8   :  { %1436 = vst.msk [vmem:[#allocation2 + $0x6] sm:$0x5] %vm7018_vm8, %v1431_v7  ;;  %v2315_v37 = vpop.permute.xlu1 %2314  ;;  %v2598_v7 = vld [vmem:[%s7994_s6 + $0x298] sm:$0xff] }
 0x5c9   :  { %2317 = vst.msk [vmem:[#allocation2 + $0x3] sm:$0x1] %vm1354_vm1, %v2315_v37  ;;  %vm1462_vm1 = vcmask 818176  }
 0x5cc   :  { %v2335_v55 = vpop.permute.xlu1 %2334 }
 0x5d0   :  { %v2321_v56 = vpop.permute.xlu1 %2320 }
 0x5d1   :  { %v2322_v48 = vrot.slane %v2321_v56, 6 }
 0x5d3   :  { %v2323_v43 = vsel %vm8252_vm6, %v2322_v48, %v2321_v56 }
 0x5d4   :  { %2325 = vst.msk [vmem:[#allocation2 + $0x3] sm:$0x5] %vm6769_vm2, %v2323_v43  ;;  %v2346_v63 = vpop.permute.xlu1 %2345  ;;  %v2595_v43 = vld [vmem:[%s7994_s6 + $0x280] sm:$0xff]  ;;  %vm1455_vm2 = vcmask 811520  }
 0x5d5   :  { %2337 = vst.msk [vmem:[#allocation2 + $0x5] sm:$0x1] %vm1379_vm3, %v2335_v55  ;;  %v2347_v9 = vrot.slane %v2346_v63, 6  ;;  %v1199_v18 = vpop.permute.xlu0 %1198 }
 0x5d6   :  { %v1283_v19 = vadd.f32 %v6645_v53, %v1199_v18 }
 0x5d7   :  { %v2348_v28 = vsel %vm8253_vm9, %v2347_v9, %v2346_v63  ;;  %v2597_v63 = vld [vmem:[%s7994_s6 + $0x290] sm:$0xff]  ;;  %vm1511_vm9 = vcmask 483520  }
 0x5d8   :  { %v1293_v52 = vmax.f32 %v1283_v19, 0.0  ;;  %v2341_v39 = vpop.permute.xlu1 %2340  ;;  %v2602_v19 = vld [vmem:[%s7994_s6 + $0x2b8] sm:$0xff] }
 0x5d9   :  { %2343 = vst.msk [vmem:[#allocation2 + $0x5] sm:$0x1] %vm8254_vm10, %v2341_v39  ;;  %v4412_v39 = vpack.c.bf16 %v2597_v63, %v2595_v43  ;;  %v2623_v43 = vld [vmem:[%s7994_s6 + $0x360] sm:$0xff]  ;;  %v2625_v63 = vld [vmem:[%s7994_s6 + $0x370] sm:$0xff]  ;;  %vm1534_vm10 = vcmask 1041152  }
 0x5da   :  { %v1451_v17 = vrot.slane %v1293_v52, %v6704_v34  ;;  %v1482_v31 = vcombine.high %v1293_v52, %v1293_v52  ;;  %2350 = vst.msk [vmem:[#allocation2 + $0x5] sm:$0x5] %vm6778_vm15, %v2348_v28  ;;  %vm1503_vm15 = vcmask 1041312  }
 0x5db   :  { %2356 = vst.msk [vmem:[#allocation2 + $0x7] sm:$0x1] %vm8255_vm11, %v2354_v51  ;;  %v2255_v51 = vadd.f32 %v6907_v35, %v1199_v18  ;;  %v2596_v35 = vld [vmem:[%s7994_s6 + $0x288] sm:$0xff]  ;;  %vm1535_vm11 = vcmask 26626  }
 0x5dc   :  { %v7043_v62 = vrot.slane %v1482_v31, %v6704_v34  ;;  %v2366_v5 = vpop.permute.xlu1 %2365  ;;  %v3375_v33 = vrot.slane %v1451_v17, 9  ;;  %v1469_v29 = vcombine.high %v1451_v17, %v1451_v17  ;;  %v4410_v48 = vpack.c.bf16 %v2598_v7, %v2596_v35  ;;  %v2600_v18 = vld [vmem:[%s7994_s6 + $0x2a8] sm:$0xff]  ;;  %v2601_v31 = vld [vmem:[%s7994_s6 + $0x2b0] sm:$0xff] }
 0x5dd   :  { %2368 = vst.msk [vmem:[#allocation2 + $0x7] sm:$0x1] %vm1417_vm5, %v2366_v5  ;;  %v2265_v37 = vmax.f32 %v2255_v51, 0.0  ;;  %v4414_v28 = vpack.c.bf16 %v2602_v19, %v2600_v18  ;;  %v2604_v5 = vld [vmem:[%s7994_s6 + $0x2c8] sm:$0xff]  ;;  %v2630_v19 = vld [vmem:[%s7994_s6 + $0x398] sm:$0xff]  ;;  %vm1504_vm5 = vcmask 190466  }
 0x5de   :  { %1459 = vrot.lane.b32.xlu0 %v3375_v33, %s4949_s26  ;;  %v3377_v53 = vrot.slane %v7043_v62, 9  ;;  %v3376_v15 = vrot.slane %v1469_v29, 9  ;;  %v1507_v9 = vcombine.high %v7043_v62, %v7043_v62  ;;  %v2606_v33 = vld [vmem:[%s7994_s6 + $0x2d8] sm:$0xff]  ;;  %v2624_v7 = vld [vmem:[%s7994_s6 + $0x368] sm:$0xff]  ;;  %vm7500_vm6 = vmor %vm1504_vm5, %vm1503_vm15  ;;  %vm8102_vm5 = vcmask 319520  }
 0x5df   :  { %v2395_v52 = vrot.slane %v2265_v37, %v6704_v34  ;;  %v2419_v4 = vcombine.high %v2265_v37, %v2265_v37  ;;  %v2626_v37 = vld [vmem:[%s7994_s6 + $0x378] sm:$0xff]  ;;  %v2628_v18 = vld [vmem:[%s7994_s6 + $0x388] sm:$0xff]  ;;  %vm7533_vm15 = vmor %vm1535_vm11, %vm1534_vm10  ;;  %vm1549_vm10 = vcmask 614720   ;;  %vm1572_vm11 = vcmask 1041280  }
 0x5e0   :  { %v2377_v3 = vpop.permute.xlu1 %2376  ;;  %1497 = vrot.lane.b32.xlu1 %v3377_v53, %s4942_s18 }
 0x5e1   :  { %v2378_v30 = vrot.slane %v2377_v3, 6  ;;  %v3391_v53 = vrot.slane %v2395_v52, 9 }
 0x5e2   :  { %1439 = vrot.lane.b32.xlu0 %v3374_v22, %s4965_s5  ;;  %v4418_v22 = vpack.c.bf16 %v2606_v33, %v2604_v5  ;;  %v2632_v5 = vld [vmem:[%s7994_s6 + $0x3a8] sm:$0xff]  ;;  %v2634_v33 = vld [vmem:[%s7994_s6 + $0x3b8] sm:$0xff] }
 0x5e3   :  { %v2379_v41 = vsel %vm1430_vm0, %v2378_v30, %v2377_v3  ;;  %v2603_v30 = vld [vmem:[%s7994_s6 + $0x2c0] sm:$0xff]  ;;  %vm1466_vm0 = vcmask 59394  }
 0x5e4   :  { %v2372_v49 = vpop.permute.xlu1 %2371  ;;  %vm7454_vm3 = vmor %vm1466_vm0, %vm1465_vm13  ;;  %vm1531_vm13 = vcmask 785408   ;;  %vm1518_vm0 = vcmask 778720  }
 0x5e5   :  { %2374 = vst.msk [vmem:[#allocation2 + $0x7] sm:$0x1] %vm1424_vm14, %v2372_v49  ;;  %v2605_v49 = vld [vmem:[%s7994_s6 + $0x2d0] sm:$0xff]  ;;  %vm1480_vm14 = vcmask 647520  }
 0x5e6   :  { %2381 = vst.msk [vmem:[#allocation2 + $0x7] sm:$0x5] %vm7018_vm8, %v2379_v41  ;;  %1452 = vrot.lane.b32.xlu0 %v1451_v17, %s4966_s25  ;;  %v2599_v17 = vld [vmem:[%s7994_s6 + $0x2a0] sm:$0xff]  ;;  %vm1473_vm8 = vcmask 352320  }
 0x5e7   :  { %v4416_v3 = vpack.c.bf16 %v2601_v31, %v2599_v17  ;;  %v2627_v17 = vld [vmem:[%s7994_s6 + $0x380] sm:$0xff]  ;;  %v2629_v31 = vld [vmem:[%s7994_s6 + $0x390] sm:$0xff] }
 0x5ea   :  { %1470 = vrot.lane.b32.xlu0 %v1469_v29, %s8256_s27 }
 0x5ed   :  { %v2512_v36 = vld [vmem:[#allocation2] sm:$0xff] }
 0x5ee   :  { %1477 = vrot.lane.b32.xlu0 %v3376_v15, %s8257_s0  ;;  %v2825_v25 = vrot.slane %v2512_v36, %v6704_v34  ;;  %v2818_v24 = vcombine.high %v2512_v36, %v2512_v36  ;;  %v2608_v15 = vld [vmem:[%s7994_s6 + $0x2e8] sm:$0xff]  ;;  %v2610_v36 = vld [vmem:[%s7994_s6 + $0x2f8] sm:$0xff] }
 0x5f0   :  { %v2833_v12 = vcombine.high %v2825_v25, %v2825_v25  ;;  %v7072_v45 = vrot.slane %v2818_v24, %v6704_v34  ;;  %v2607_v24 = vld [vmem:[%s7994_s6 + $0x2e0] sm:$0xff] }
 0x5f1   :  { %v4424_v13 = vpack.c.bf16 %v2609_v14, %v2607_v24  ;;  %v2640_v24 = vld [vmem:[%s7994_s6 + $0x3e8] sm:$0xff]  ;;  %v2642_v14 = vld [vmem:[%s7994_s6 + $0x3f8] sm:$0xff] }
 0x5f2   :  { %1490 = vrot.lane.b32.xlu0 %v7043_v62, %s8258_s24  ;;  %2932 = vmatprep.mubr.f32.mxu1 %v2833_v12  ;;  %v2834_v61 = vcombine.high %v7072_v45, %v7072_v45  ;;  %v3378_v62 = vrot.slane %v1507_v9, 9  ;;  %v2408_v12 = vcombine.high %v2395_v52, %v2395_v52 }
 0x5f3   :  { %2933 = vmatmul.mubr.f32.vlgmr.msra.gmra.mrb[26].mxu1 %v2825_v25  ;;  %v4420_v25 = vpack.c.bf16 %v2605_v49, %v2603_v30  ;;  %v4446_v30 = vpack.c.bf16 %v2634_v33, %v2632_v5  ;;  %v2633_v49 = vld [vmem:[%s7994_s6 + $0x3b0] sm:$0xff]  ;;  %v2663_v5 = vld [vmem:[%s7994_s6 + $0x4a0] sm:$0xff] }
 0x5f4   :  { %4397 = vmatpush1.bf16.msra.mxu1 %v4396_v32  ;;  %3003 = vmatprep.mubr.f32.mxu1 %v2834_v61  ;;  %v2614_v32 = vld [vmem:[%s7994_s6 + $0x318] sm:$0xff]  ;;  %v2611_v61 = vld [vmem:[%s7994_s6 + $0x300] sm:$0xff]  ;;  %v2665_v33 = vld [vmem:[%s7994_s6 + $0x4b0] sm:$0xff] }
 0x5f5   :  { %v1204_v23 = vpop.permute.xlu1 %1203  ;;  %4399 = vmatprep.subr.bf16.mxu1 %v4398_v50  ;;  %v2426_v50 = vrot.slane %v2419_v4, %v6704_v34  ;;  %v4426_v11 = vpack.c.bf16 %v2614_v32, %v2612_v16  ;;  %v4428_v26 = vpack.c.bf16 %v2613_v59, %v2611_v61  ;;  %v4454_v16 = vpack.c.bf16 %v2642_v14, %v2640_v24  ;;  %v2639_v32 = vld [vmem:[%s7994_s6 + $0x3e0] sm:$0xff] }
 0x5f6   :  { %v1288_v46 = vadd.f32 %v6647_v40, %v1204_v23  ;;  %v2593_v40 = vld [vmem:[%s7994_s6 + $0x270] sm:$0xff]  ;;  %v2260_v41 = vadd.f32 %v7012_v2, %v1204_v23  ;;  %v4422_v2 = vpack.c.bf16 %v2610_v36, %v2608_v15  ;;  %v2616_v23 = vld [vmem:[%s7994_s6 + $0x328] sm:$0xff]  ;;  %v2638_v15 = vld [vmem:[%s7994_s6 + $0x3d8] sm:$0xff] }
 0x5f7   :  { %v4408_v56 = vpack.c.bf16 %v2593_v40, %v2591_v6  ;;  %v3393_v21 = vrot.slane %v2426_v50, 9  ;;  %v4432_v6 = vpack.c.bf16 %v2617_v58, %v2615_v42  ;;  %v2647_v58 = vld [vmem:[%s7994_s6 + $0x420] sm:$0xff] }
 0x5f8   :  { %v1294_v8 = vmax.f32 %v1288_v46, 0.0  ;;  %4401 = vmatpush1.bf16.msra.mxu1 %v4400_v44  ;;  %v7179_v20 = vmax.f32 %v2260_v41, 0.0 }
 0x5f9   :  { %4403 = vmatprep.subr.bf16.mxu1 %v4402_v60  ;;  %v2618_v60 = vld [vmem:[%s7994_s6 + $0x338] sm:$0xff] }
 0x5fa   :  { %v1558_v47 = vcombine.high %v1294_v8, %v1294_v8  ;;  %v7111_v27 = vrot.slane %v1294_v8, %v6704_v34  ;;  %v7198_v1 = vrot.slane %v7179_v20, %v6704_v34  ;;  %v4430_v46 = vpack.c.bf16 %v2618_v60, %v2616_v23  ;;  %v2620_v8 = vld [vmem:[%s7994_s6 + $0x348] sm:$0xff]  ;;  %v2645_v23 = vld [vmem:[%s7994_s6 + $0x410] sm:$0xff] }
 0x5fb   :  { %v2648_v60 = vld [vmem:[%s7994_s6 + $0x428] sm:$0xff] }
 0x5fc   :  { %4405 = vmatpush1.bf16.msra.mxu1 %v4404_v0  ;;  %1528 = vrot.lane.b32.xlu0 %v7111_v27, %s8259_s4  ;;  %v7122_v55 = vrot.slane %v1558_v47, %v6704_v34  ;;  %v3379_v29 = vrot.slane %v7111_v27, 9  ;;  %v1545_v44 = vcombine.high %v7111_v27, %v7111_v27  ;;  %v3395_v51 = vrot.slane %v7198_v1, 9  ;;  %v2622_v0 = vld [vmem:[%s7994_s6 + $0x358] sm:$0xff]  ;;  %v2619_v47 = vld [vmem:[%s7994_s6 + $0x340] sm:$0xff]  ;;  %v2621_v27 = vld [vmem:[%s7994_s6 + $0x350] sm:$0xff] }
 0x5fd   :  { %4407 = vmatprep.subr.bf16.mxu1 %v4406_v10  ;;  %v3392_v10 = vrot.slane %v2408_v12, 9  ;;  %v4434_v40 = vpack.c.bf16 %v2622_v0, %v2620_v8  ;;  %v2652_v8 = vld [vmem:[%s7994_s6 + $0x448] sm:$0xff]  ;;  %v2654_v0 = vld [vmem:[%s7994_s6 + $0x458] sm:$0xff] }
 0x5fe   :  { %1566 = vrot.lane.b32.xlu1 %v7122_v55, %s8260_s22  ;;  %v3380_v35 = vrot.slane %v1545_v44, 9 }
 0x600   :  { %4409 = vmatpush1.bf16.msra.mxu1 %v4408_v56  ;;  %1508 = vrot.lane.b32.xlu0 %v1507_v9, %s8261_s12  ;;  %v4436_v56 = vpack.c.bf16 %v2621_v27, %v2619_v47  ;;  %v3381_v9 = vrot.slane %v7122_v55, 9  ;;  %v2651_v47 = vld [vmem:[%s7994_s6 + $0x440] sm:$0xff]  ;;  %v2653_v27 = vld [vmem:[%s7994_s6 + $0x450] sm:$0xff] }
 0x601   :  { %4411 = vmatprep.subr.bf16.mxu1 %v4410_v48  ;;  %v4438_v48 = vpack.c.bf16 %v2626_v37, %v2624_v7  ;;  %v4468_v37 = vpack.c.bf16 %v2653_v27, %v2651_v47  ;;  %v2687_v47 = vld [vmem:[%s7994_s6 + $0x560] sm:$0xff]  ;;  %v2689_v27 = vld [vmem:[%s7994_s6 + $0x570] sm:$0xff] }
 0x602   :  { %2396 = vrot.lane.b32.xlu1 %v2395_v52, %s4966_s25  ;;  %v2439_v52 = vcombine.high %v2426_v50, %v2426_v50 }
 0x604   :  { %4413 = vmatpush1.bf16.msra.mxu1 %v4412_v39  ;;  %1515 = vrot.lane.b32.xlu0 %v3378_v62, %s8262_s14  ;;  %v4440_v39 = vpack.c.bf16 %v2625_v63, %v2623_v43  ;;  %v1583_v62 = vcombine.high %v7122_v55, %v7122_v55  ;;  %v2631_v55 = vld [vmem:[%s7994_s6 + $0x3a0] sm:$0xff]  ;;  %v2657_v43 = vld [vmem:[%s7994_s6 + $0x470] sm:$0xff]  ;;  %v2660_v63 = vld [vmem:[%s7994_s6 + $0x488] sm:$0xff] }
 0x605   :  { %4415 = vmatprep.subr.bf16.mxu1 %v4414_v28  ;;  %v4442_v28 = vpack.c.bf16 %v2630_v19, %v2628_v18  ;;  %v4448_v4 = vpack.c.bf16 %v2633_v49, %v2631_v55  ;;  %v2667_v55 = vld [vmem:[%s7994_s6 + $0x4c0] sm:$0xff]  ;;  %v2669_v49 = vld [vmem:[%s7994_s6 + $0x4d0] sm:$0xff] }
 0x606   :  { %2402 = vrot.lane.b32.xlu1 %v3391_v53, %s4949_s26  ;;  %v2481_v53 = vcombine.high %v7179_v20, %v7179_v20  ;;  %v3382_v41 = vrot.slane %v1583_v62, 9  ;;  %v2470_v20 = vcombine.high %v7198_v1, %v7198_v1 }
 0x608   :  { %4417 = vmatpush1.bf16.msra.mxu1 %v4416_v3  ;;  %1540 = vrot.lane.b32.xlu0 %v3379_v29, %s8263_s30  ;;  %v3394_v3 = vrot.slane %v2439_v52, 9  ;;  %v2636_v29 = vld [vmem:[%s7994_s6 + $0x3c8] sm:$0xff]  ;;  %v2488_v36 = vrot.slane %v2481_v53, %v6704_v34  ;;  %v3396_v61 = vrot.slane %v2470_v20, 9 }
 0x609   :  { %4419 = vmatprep.subr.bf16.mxu1 %v4418_v22  ;;  %v4444_v22 = vpack.c.bf16 %v2629_v31, %v2627_v17  ;;  %v2666_v17 = vld [vmem:[%s7994_s6 + $0x4b8] sm:$0xff]  ;;  %v2668_v53 = vld [vmem:[%s7994_s6 + $0x4c8] sm:$0xff] }
 0x60a   :  { %2384 = vrot.lane.b32.xlu1 %v3390_v57, %s4965_s5  ;;  %v4450_v57 = vpack.c.bf16 %v2638_v15, %v2636_v29  ;;  %v2674_v29 = vld [vmem:[%s7994_s6 + $0x4f8] sm:$0xff]  ;;  %v4484_v15 = vpack.c.bf16 %v2669_v49, %v2667_v55  ;;  %v2699_v55 = vld [vmem:[%s7994_s6 + $0x5c0] sm:$0xff]  ;;  %v2701_v49 = vld [vmem:[%s7994_s6 + $0x5d0] sm:$0xff] }
 0x60c   :  { %4421 = vmatpush1.bf16.msra.mxu1 %v4420_v25  ;;  %2409 = vrot.lane.b32.xlu0 %v2408_v12, %s8256_s27  ;;  %s8265_s27 = smov 76   ;;  %v2635_v25 = vld [vmem:[%s7994_s6 + $0x3c0] sm:$0xff] }
 0x60d   :  { %4423 = vmatprep.subr.bf16.mxu1 %v4422_v2  ;;  %v2637_v2 = vld [vmem:[%s7994_s6 + $0x3d0] sm:$0xff] }
 0x60e   :  { %2427 = vrot.lane.b32.xlu1 %v2426_v50, %s8258_s24  ;;  %v4452_v12 = vpack.c.bf16 %v2637_v2, %v2635_v25  ;;  %v2641_v50 = vld [vmem:[%s7994_s6 + $0x3f0] sm:$0xff]  ;;  %v2676_v25 = vld [vmem:[%s7994_s6 + $0x508] sm:$0xff]  ;;  %v2678_v2 = vld [vmem:[%s7994_s6 + $0x518] sm:$0xff] }
 0x60f   :  { %v4456_v59 = vpack.c.bf16 %v2641_v50, %v2639_v32  ;;  %v4490_v14 = vpack.c.bf16 %v2678_v2, %v2676_v25  ;;  %v2682_v32 = vld [vmem:[%s7994_s6 + $0x538] sm:$0xff]  ;;  %v2708_v25 = vld [vmem:[%s7994_s6 + $0x608] sm:$0xff] }
 0x610   :  { %4425 = vmatpush1.bf16.msra.mxu1 %v4424_v13  ;;  %1546 = vrot.lane.b32.xlu0 %v1545_v44, %s8264_s20  ;;  %v2644_v13 = vld [vmem:[%s7994_s6 + $0x408] sm:$0xff]  ;;  %v2643_v44 = vld [vmem:[%s7994_s6 + $0x400] sm:$0xff]  ;;  %v2710_v2 = vld [vmem:[%s7994_s6 + $0x618] sm:$0xff] }
 0x611   :  { %4427 = vmatprep.subr.bf16.mxu1 %v4426_v11  ;;  %v2646_v11 = vld [vmem:[%s7994_s6 + $0x418] sm:$0xff] }
 0x612   :  { %2433 = vrot.lane.b32.xlu1 %v3393_v21, %s4942_s18  ;;  %v2650_v21 = vld [vmem:[%s7994_s6 + $0x438] sm:$0xff] }
 0x613   :  { %v4462_v42 = vpack.c.bf16 %v2650_v21, %v2648_v60 }
 0x614   :  { %4429 = vmatpush1.bf16.msra.mxu1 %v4428_v26  ;;  %2466 = vrot.lane.b32.xlu0 %v3395_v51, %s8263_s30  ;;  %v3397_v26 = vrot.slane %v2488_v36, 9  ;;  %v2649_v51 = vld [vmem:[%s7994_s6 + $0x430] sm:$0xff] }
 0x615   :  { %4431 = vmatprep.subr.bf16.mxu1 %v4430_v46  ;;  %v4460_v46 = vpack.c.bf16 %v2645_v23, %v2643_v44  ;;  %v2686_v44 = vld [vmem:[%s7994_s6 + $0x558] sm:$0xff] }
 0x616   :  { %2415 = vrot.lane.b32.xlu1 %v3392_v10, %s8257_s0  ;;  %v2501_v10 = vcombine.high %v2488_v36, %v2488_v36 }
 0x618   :  { %4433 = vmatpush1.bf16.msra.mxu1 %v4432_v6  ;;  %1553 = vrot.lane.b32.xlu0 %v3380_v35, %s8265_s27  ;;  %v4464_v6 = vpack.c.bf16 %v2649_v51, %v2647_v58  ;;  %v2656_v35 = vld [vmem:[%s7994_s6 + $0x468] sm:$0xff]  ;;  %v3398_v7 = vrot.slane %v2501_v10, 9  ;;  %v2690_v51 = vld [vmem:[%s7994_s6 + $0x578] sm:$0xff] }
 0x619   :  { %4435 = vmatprep.subr.bf16.mxu1 %v4434_v40  ;;  %v4466_v40 = vpack.c.bf16 %v2654_v0, %v2652_v8  ;;  %v2688_v58 = vld [vmem:[%s7994_s6 + $0x568] sm:$0xff] }
 0x61a   :  { %2458 = vrot.lane.b32.xlu1 %v7198_v1, %s8259_s4  ;;  %v4458_v1 = vpack.c.bf16 %v2646_v11, %v2644_v13 }
 0x61c   :  { %4437 = vmatpush1.bf16.msra.mxu1 %v4436_v56  ;;  %1578 = vrot.lane.b32.xlu0 %v3381_v9, %s8266_s23  ;;  %v2662_v9 = vld [vmem:[%s7994_s6 + $0x498] sm:$0xff] }
 0x61d   :  { %4439 = vmatprep.subr.bf16.mxu1 %v4438_v48  ;;  %v2655_v48 = vld [vmem:[%s7994_s6 + $0x460] sm:$0xff]  ;;  %v4474_v19 = vpack.c.bf16 %v2662_v9, %v2660_v63  ;;  %v2696_v9 = vld [vmem:[%s7994_s6 + $0x5a8] sm:$0xff] }
 0x61e   :  { %2440 = vrot.lane.b32.xlu1 %v2439_v52, %s8261_s12  ;;  %v4472_v18 = vpack.c.bf16 %v2657_v43, %v2655_v48  ;;  %v2659_v52 = vld [vmem:[%s7994_s6 + $0x480] sm:$0xff]  ;;  %v2693_v43 = vld [vmem:[%s7994_s6 + $0x590] sm:$0xff] }
 0x61f   :  { %v2691_v48 = vld [vmem:[%s7994_s6 + $0x580] sm:$0xff] }
 0x620   :  { %4441 = vmatpush1.bf16.msra.mxu1 %v4440_v39  ;;  %1584 = vrot.lane.b32.xlu0 %v1583_v62, %s8267_s15  ;;  %v2661_v39 = vld [vmem:[%s7994_s6 + $0x490] sm:$0xff] }
 0x621   :  { %4443 = vmatprep.subr.bf16.mxu1 %v4442_v28  ;;  %v2664_v28 = vld [vmem:[%s7994_s6 + $0x4a8] sm:$0xff]  ;;  %v4476_v31 = vpack.c.bf16 %v2661_v39, %v2659_v52  ;;  %v4508_v52 = vpack.c.bf16 %v2693_v43, %v2691_v48 }
 0x622   :  { %2446 = vrot.lane.b32.xlu1 %v3394_v3, %s8262_s14  ;;  %v4478_v62 = vpack.c.bf16 %v2666_v17, %v2664_v28  ;;  %v2670_v3 = vld [vmem:[%s7994_s6 + $0x4d8] sm:$0xff]  ;;  %v2695_v17 = vld [vmem:[%s7994_s6 + $0x5a0] sm:$0xff]  ;;  %v3226_v43 = vld [vmem:[%s7996_s8 + $0x8] sm:$0xff] }
 0x624   :  { %4445 = vmatpush1.bf16.msra.mxu1 %v4444_v22  ;;  %1591 = vrot.lane.b32.xlu0 %v3382_v41, %s8268_s13  ;;  %v4480_v22 = vpack.c.bf16 %v2665_v33, %v2663_v5  ;;  %v2672_v41 = vld [vmem:[%s7994_s6 + $0x4e8] sm:$0xff]  ;;  %v2702_v5 = vld [vmem:[%s7994_s6 + $0x5d8] sm:$0xff] }
 0x625   :  { %4447 = vmatprep.subr.bf16.mxu1 %v4446_v30  ;;  %v4482_v30 = vpack.c.bf16 %v2670_v3, %v2668_v53 }
 0x626   :  { %2489 = vrot.lane.b32.xlu1 %v2488_v36, %s8260_s22  ;;  %v4486_v36 = vpack.c.bf16 %v2674_v29, %v2672_v41  ;;  %v2704_v41 = vld [vmem:[%s7994_s6 + $0x5e8] sm:$0xff]  ;;  %v2706_v29 = vld [vmem:[%s7994_s6 + $0x5f8] sm:$0xff] }
 0x628   :  { %4449 = vmatpush1.bf16.msra.mxu1 %v4448_v4  ;;  %v2671_v4 = vld [vmem:[%s7994_s6 + $0x4e0] sm:$0xff] }
 0x629   :  { %4451 = vmatprep.subr.bf16.mxu1 %v4450_v57  ;;  %v2673_v57 = vld [vmem:[%s7994_s6 + $0x4f0] sm:$0xff] }
 0x62a   :  { %2471 = vrot.lane.b32.xlu1 %v2470_v20, %s8264_s20  ;;  %v4488_v24 = vpack.c.bf16 %v2673_v57, %v2671_v4  ;;  %v2675_v20 = vld [vmem:[%s7994_s6 + $0x500] sm:$0xff]  ;;  %v2705_v57 = vld [vmem:[%s7994_s6 + $0x5f0] sm:$0xff] }
 0x62b   :  { %v2703_v4 = vld [vmem:[%s7994_s6 + $0x5e0] sm:$0xff] }
 0x62c   :  { %4453 = vmatpush1.bf16.msra.mxu1 %v4452_v12  ;;  %v2677_v12 = vld [vmem:[%s7994_s6 + $0x510] sm:$0xff] }
 0x62d   :  { %4455 = vmatprep.subr.bf16.mxu1 %v4454_v16  ;;  %v2680_v16 = vld [vmem:[%s7994_s6 + $0x528] sm:$0xff]  ;;  %v4492_v13 = vpack.c.bf16 %v2677_v12, %v2675_v20 }
 0x62e   :  { %2477 = vrot.lane.b32.xlu1 %v3396_v61, %s8265_s27  ;;  %v4494_v11 = vpack.c.bf16 %v2682_v32, %v2680_v16  ;;  %v2679_v61 = vld [vmem:[%s7994_s6 + $0x520] sm:$0xff] }
 0x630   :  { %4457 = vmatpush1.bf16.msra.mxu1 %v4456_v59  ;;  %v2681_v59 = vld [vmem:[%s7994_s6 + $0x530] sm:$0xff] }
 0x631   :  { %4459 = vmatprep.subr.bf16.mxu1 %v4458_v1  ;;  %v2684_v1 = vld [vmem:[%s7994_s6 + $0x548] sm:$0xff]  ;;  %v4496_v60 = vpack.c.bf16 %v2681_v59, %v2679_v61 }
 0x632   :  { %2497 = vrot.lane.b32.xlu1 %v3397_v26, %s8266_s23  ;;  %v4498_v26 = vpack.c.bf16 %v2686_v44, %v2684_v1 }
 0x633   :  { %3004 = vmatmul.mubr.f32.vlgmr.msra.gmra.mrb[26].mxu1 %v7072_v45  ;;  %v2658_v45 = vld [vmem:[%s7994_s6 + $0x478] sm:$0xff] }
 0x634   :  { %4461 = vmatpush1.bf16.msra.mxu1 %v4460_v46  ;;  %v4470_v56 = vpack.c.bf16 %v2658_v45, %v2656_v35  ;;  %v2683_v46 = vld [vmem:[%s7994_s6 + $0x540] sm:$0xff]  ;;  %v2692_v35 = vld [vmem:[%s7994_s6 + $0x588] sm:$0xff]  ;;  %v2694_v45 = vld [vmem:[%s7994_s6 + $0x598] sm:$0xff] }
 0x635   :  { %4463 = vmatprep.subr.bf16.mxu1 %v4462_v42  ;;  %v2685_v42 = vld [vmem:[%s7994_s6 + $0x550] sm:$0xff] }
 0x636   :  { %2502 = vrot.lane.b32.xlu1 %v2501_v10, %s8267_s15  ;;  %v4500_v10 = vpack.c.bf16 %v2685_v42, %v2683_v46 }
 0x638   :  { %4465 = vmatpush1.bf16.msra.mxu1 %v4464_v6 }
 0x639   :  { %4467 = vmatprep.subr.bf16.mxu1 %v4466_v40  ;;  %v4502_v40 = vpack.c.bf16 %v2690_v51, %v2688_v58 }
 0x63a   :  { %2508 = vrot.lane.b32.xlu1 %v3398_v7, %s8268_s13 }
 0x63c   :  { %4469 = vmatpush1.bf16.msra.mxu1 %v4468_v37  ;;  %v4504_v37 = vpack.c.bf16 %v2689_v27, %v2687_v47 }
 0x63d   :  { %4471 = vmatprep.subr.bf16.mxu1 %v4470_v56  ;;  %v4506_v56 = vpack.c.bf16 %v2694_v45, %v2692_v35  ;;  %v3241_v45 = vld [vmem:[%s7996_s8 + $0x80] sm:$0xff] }
 0x640   :  { %4473 = vmatpush1.bf16.msra.mxu1 %v4472_v18  ;;  %v2698_v18 = vld [vmem:[%s7994_s6 + $0x5b8] sm:$0xff] }
 0x641   :  { %4475 = vmatprep.subr.bf16.mxu1 %v4474_v19  ;;  %v4510_v28 = vpack.c.bf16 %v2698_v18, %v2696_v9  ;;  %v3244_v9 = vld [vmem:[%s7996_s8 + $0x98] sm:$0xff] }
 0x644   :  { %4477 = vmatpush1.bf16.msra.mxu1 %v4476_v31  ;;  %v2697_v31 = vld [vmem:[%s7994_s6 + $0x5b0] sm:$0xff] }
 0x645   :  { %4479 = vmatprep.subr.bf16.mxu1 %v4478_v62  ;;  %v2700_v62 = vld [vmem:[%s7994_s6 + $0x5c8] sm:$0xff]  ;;  %v4512_v3 = vpack.c.bf16 %v2697_v31, %v2695_v17  ;;  %v3245_v17 = vld [vmem:[%s7996_s8 + $0xa0] sm:$0xff] }
 0x648   :  { %4481 = vmatpush1.bf16.msra.mxu1 %v4480_v22 }
 0x649   :  { %4483 = vmatprep.subr.bf16.mxu1 %v4482_v30  ;;  %v4514_v30 = vpack.c.bf16 %v2702_v5, %v2700_v62  ;;  %v3246_v62 = vld [vmem:[%s7996_s8 + $0xa8] sm:$0xff] }
 0x64c   :  { %4485 = vmatpush1.bf16.msra.mxu1 %v4484_v15  ;;  %v4516_v15 = vpack.c.bf16 %v2701_v49, %v2699_v55  ;;  %v3247_v55 = vld [vmem:[%s7996_s8 + $0xb0] sm:$0xff]  ;;  %v3248_v49 = vld [vmem:[%s7996_s8 + $0xb8] sm:$0xff] }
 0x64d   :  { %4487 = vmatprep.subr.bf16.mxu1 %v4486_v36  ;;  %v4518_v36 = vpack.c.bf16 %v2706_v29, %v2704_v41 }
 0x650   :  { %v1460_v50 = vpop.permute.xlu0 %1459  ;;  %4489 = vmatpush1.bf16.msra.mxu1 %v4488_v24  ;;  %v4520_v24 = vpack.c.bf16 %v2705_v57, %v2703_v4  ;;  %v3231_v4 = vld [vmem:[%s7996_s8 + $0x30] sm:$0xff]  ;;  %v3232_v57 = vld [vmem:[%s7996_s8 + $0x38] sm:$0xff] }
 0x651   :  { %4491 = vmatprep.subr.bf16.mxu1 %v4490_v14  ;;  %v1461_v21 = vrot.slane %v1460_v50, 6  ;;  %v4522_v14 = vpack.c.bf16 %v2710_v2, %v2708_v25  ;;  %v3249_v25 = vld [vmem:[%s7996_s8 + $0xc0] sm:$0xff]  ;;  %v3250_v2 = vld [vmem:[%s7996_s8 + $0xc8] sm:$0xff] }
 0x652   :  { %v1498_v63 = vpop.permute.xlu1 %1497 }
 0x653   :  { %v1463_v6 = vsel %vm1462_vm1, %v1461_v21, %v1460_v50  ;;  %v1499_v39 = vrot.slane %v1498_v63, 6 }
 0x654   :  { %v1440_v23 = vpop.permute.xlu0 %1439  ;;  %4493 = vmatpush1.bf16.msra.mxu1 %v4492_v13  ;;  %v3252_v13 = vld [vmem:[%s7996_s8 + $0xd8] sm:$0xff] }
 0x655   :  { %1443 = vst.msk [vmem:[#allocation2 + $0x8] sm:$0x1] %vm1442_vm12, %v1440_v23  ;;  %4495 = vmatprep.subr.bf16.mxu1 %v4494_v11  ;;  %v1501_v22 = vsel %vm1500_vm4, %v1499_v39, %v1498_v63  ;;  %v3243_v63 = vld [vmem:[%s7996_s8 + $0x90] sm:$0xff] }
 0x656   :  { %v3227_v39 = vld [vmem:[%s7996_s8 + $0x10] sm:$0xff] }
 0x658   :  { %v1453_v0 = vpop.permute.xlu0 %1452  ;;  %4497 = vmatpush1.bf16.msra.mxu1 %v4496_v60 }
 0x659   :  { %1456 = vst.msk [vmem:[#allocation2 + $0x8] sm:$0x1] %vm1455_vm2, %v1453_v0  ;;  %4499 = vmatprep.subr.bf16.mxu1 %v4498_v26 }
 0x65a   :  { %1468 = vst.msk [vmem:[#allocation2 + $0x8] sm:$0x5] %vm7454_vm3, %v1463_v6 }
 0x65c   :  { %v1471_v7 = vpop.permute.xlu0 %1470  ;;  %4501 = vmatpush1.bf16.msra.mxu1 %v4500_v10 }
 0x65d   :  { %1474 = vst.msk [vmem:[#allocation2 + $0xa] sm:$0x1] %vm1473_vm8, %v1471_v7  ;;  %4503 = vmatprep.subr.bf16.mxu1 %v4502_v40  ;;  %v3242_v7 = vld [vmem:[%s7996_s8 + $0x88] sm:$0xff] }
 0x65e   :  { %v4618_v48 = vpack.c.bf16 %v3242_v7, %v3241_v45 }
 0x660   :  { %v1478_v19 = vpop.permute.xlu0 %1477  ;;  %4505 = vmatpush1.bf16.msra.mxu1 %v4504_v37  ;;  %v3225_v37 = vld [vmem:[%s7996_s8] sm:$0xff]  ;;  %4619 = vmatprep.subr.bf16.mxu0 %v4618_v48  ;;  %v2713_v48 = vld [vmem:[%s7994_s6 + $0x630] sm:$0xff] }
 0x661   :  { %1481 = vst.msk [vmem:[#allocation2 + $0xa] sm:$0x1] %vm1480_vm14, %v1478_v19  ;;  %4507 = vmatprep.subr.bf16.mxu1 %v4506_v56  ;;  %v4620_v19 = vpack.c.bf16 %v3226_v43, %v3225_v37 }
 0x663   :  { %4621 = vmatpush3.bf16.msra.mxu0 %v4620_v19  ;;  %v2715_v19 = vld [vmem:[%s7994_s6 + $0x640] sm:$0xff] }
 0x664   :  { %v1491_v53 = vpop.permute.xlu0 %1490  ;;  %4509 = vmatpush1.bf16.msra.mxu1 %v4508_v52  ;;  %v4622_v52 = vpack.c.bf16 %v3244_v9, %v3243_v63  ;;  %v2718_v63 = vld [vmem:[%s7994_s6 + $0x658] sm:$0xff] }
 0x665   :  { %1494 = vst.msk [vmem:[#allocation2 + $0xa] sm:$0x1] %vm1493_vm7, %v1491_v53  ;;  %4511 = vmatprep.subr.bf16.mxu1 %v4510_v28  ;;  %v3228_v28 = vld [vmem:[%s7996_s8 + $0x18] sm:$0xff]  ;;  %v4626_v53 = vpack.c.bf16 %v3246_v62, %v3245_v17  ;;  %v2719_v62 = vld [vmem:[%s7994_s6 + $0x660] sm:$0xff] }
 0x666   :  { %1506 = vst.msk [vmem:[#allocation2 + $0xa] sm:$0x5] %vm7500_vm6, %v1501_v22  ;;  %v4624_v5 = vpack.c.bf16 %v3228_v28, %v3227_v39  ;;  %4623 = vmatprep.subr.bf16.mxu0 %v4622_v52  ;;  %v3230_v22 = vld [vmem:[%s7996_s8 + $0x28] sm:$0xff]  ;;  %v2717_v52 = vld [vmem:[%s7994_s6 + $0x650] sm:$0xff]  ;;  %v2722_v28 = vld [vmem:[%s7994_s6 + $0x678] sm:$0xff] }
 0x667   :  { %v2720_v39 = vld [vmem:[%s7994_s6 + $0x668] sm:$0xff]  ;;  %v4532_v17 = vpack.c.bf16 %v2717_v52, %v2715_v19  ;;  %v2757_v19 = vld [vmem:[%s7994_s6 + $0x790] sm:$0xff] }
 0x668   :  { %4513 = vmatpush1.bf16.msra.mxu1 %v4512_v3  ;;  %v3229_v3 = vld [vmem:[%s7996_s8 + $0x20] sm:$0xff]  ;;  %4625 = vmatpush3.bf16.msra.mxu0 %v4624_v5  ;;  %v2721_v5 = vld [vmem:[%s7994_s6 + $0x670] sm:$0xff]  ;;  %v2760_v52 = vld [vmem:[%s7994_s6 + $0x7a8] sm:$0xff] }
 0x669   :  { %4515 = vmatprep.subr.bf16.mxu1 %v4514_v30  ;;  %v4628_v29 = vpack.c.bf16 %v3230_v22, %v3229_v3  ;;  %4627 = vmatprep.subr.bf16.mxu0 %v4626_v53  ;;  %v2726_v53 = vld [vmem:[%s7994_s6 + $0x698] sm:$0xff]  ;;  %v4536_v3 = vpack.c.bf16 %v2721_v5, %v2719_v62  ;;  %v2761_v62 = vld [vmem:[%s7994_s6 + $0x7b0] sm:$0xff]  ;;  %v2764_v5 = vld [vmem:[%s7994_s6 + $0x7c8] sm:$0xff] }
 0x66c   :  { %4517 = vmatpush1.bf16.msra.mxu1 %v4516_v15  ;;  %4629 = vmatpush3.bf16.msra.mxu0 %v4628_v29 }
 0x66d   :  { %4519 = vmatprep.subr.bf16.mxu1 %v4518_v36  ;;  %v4630_v36 = vpack.c.bf16 %v3248_v49, %v3247_v55  ;;  %v2725_v55 = vld [vmem:[%s7994_s6 + $0x690] sm:$0xff]  ;;  %v2728_v49 = vld [vmem:[%s7994_s6 + $0x6a8] sm:$0xff] }
 0x66e   :  { %v1529_v20 = vpop.permute.xlu0 %1528 }
 0x66f   :  { %v1530_v32 = vrot.slane %v1529_v20, 6  ;;  %4631 = vmatprep.subr.bf16.mxu0 %v4630_v36  ;;  %v2727_v36 = vld [vmem:[%s7994_s6 + $0x6a0] sm:$0xff] }
 0x670   :  { %v1567_v12 = vpop.permute.xlu1 %1566  ;;  %4521 = vmatpush1.bf16.msra.mxu1 %v4520_v24  ;;  %v4632_v24 = vpack.c.bf16 %v3232_v57, %v3231_v4  ;;  %v2729_v4 = vld [vmem:[%s7994_s6 + $0x6b0] sm:$0xff]  ;;  %v2732_v57 = vld [vmem:[%s7994_s6 + $0x6c8] sm:$0xff] }
 0x671   :  { %4523 = vmatprep.subr.bf16.mxu1 %v4522_v14  ;;  %v1532_v61 = vsel %vm1531_vm13, %v1530_v32, %v1529_v20  ;;  %v1568_v0 = vrot.slane %v1567_v12, 6  ;;  %v4634_v20 = vpack.c.bf16 %v3250_v2, %v3249_v25  ;;  %v2734_v25 = vld [vmem:[%s7994_s6 + $0x6d8] sm:$0xff]  ;;  %v4544_v2 = vpack.c.bf16 %v2729_v4, %v2727_v36  ;;  %v2769_v36 = vld [vmem:[%s7994_s6 + $0x7f0] sm:$0xff]  ;;  %v2772_v4 = vld [vmem:[%s7994_s6 + $0x808] sm:$0xff] }
 0x672   :  { %v1509_v16 = vpop.permute.xlu0 %1508  ;;  %4633 = vmatpush3.bf16.msra.mxu0 %v4632_v24  ;;  %v4546_v24 = vpack.c.bf16 %v2734_v25, %v2732_v57  ;;  %v2774_v57 = vld [vmem:[%s7994_s6 + $0x818] sm:$0xff] }
 0x673   :  { %1512 = vst.msk [vmem:[#allocation2 + $0xc] sm:$0x1] %vm1511_vm9, %v1509_v16  ;;  %v3234_v16 = vld [vmem:[%s7996_s8 + $0x48] sm:$0xff]  ;;  %4635 = vmatprep.subr.bf16.mxu0 %v4634_v20  ;;  %v2733_v20 = vld [vmem:[%s7994_s6 + $0x6d0] sm:$0xff] }
 0x674   :  { %v2397_v50 = vpop.permute.xlu1 %2396 }
 0x676   :  { %v1516_v11 = vpop.permute.xlu0 %1515 }
 0x677   :  { %1519 = vst.msk [vmem:[#allocation2 + $0xc] sm:$0x1] %vm1518_vm0, %v1516_v11 }
 0x678   :  { %v2403_v59 = vpop.permute.xlu1 %2402  ;;  %1537 = vst.msk [vmem:[#allocation2 + $0xc] sm:$0x5] %vm7533_vm15, %v1532_v61 }
 0x679   :  { %v2404_v1 = vrot.slane %v2403_v59, 6 }
 0x67a   :  { %v1541_v44 = vpop.permute.xlu0 %1540 }
 0x67b   :  { %1544 = vst.msk [vmem:[#allocation2 + $0xe] sm:$0x1] %vm8102_vm5, %v1541_v44  ;;  %v2405_v60 = vsel %vm1462_vm1, %v2404_v1, %v2403_v59  ;;  %vm1569_vm1 = vcmask 916480   ;;  %v3235_v1 = vld [vmem:[%s7996_s8 + $0x50] sm:$0xff]  ;;  %v3236_v44 = vld [vmem:[%s7996_s8 + $0x58] sm:$0xff] }
 0x67c   :  { %v2385_v23 = vpop.permute.xlu1 %2384  ;;  %v1570_v47 = vsel %vm1569_vm1, %v1568_v0, %v1567_v12  ;;  %v3233_v12 = vld [vmem:[%s7996_s8 + $0x40] sm:$0xff] }
 0x67d   :  { %2387 = vst.msk [vmem:[#allocation2 + $0x9] sm:$0x1] %vm1442_vm12, %v2385_v23  ;;  %vm1573_vm12 = vcmask 157698   ;;  %v4636_v11 = vpack.c.bf16 %v3234_v16, %v3233_v12  ;;  %v2707_v0 = vld [vmem:[%s7994_s6 + $0x600] sm:$0xff]  ;;  %v2736_v12 = vld [vmem:[%s7994_s6 + $0x6e8] sm:$0xff]  ;;  %v2738_v16 = vld [vmem:[%s7994_s6 + $0x6f8] sm:$0xff] }
 0x67e   :  { %2399 = vst.msk [vmem:[#allocation2 + $0x9] sm:$0x1] %vm1455_vm2, %v2397_v50  ;;  %v2410_v21 = vpop.permute.xlu0 %2409  ;;  %vm1556_vm2 = vcmask 909920   ;;  %vm7550_vm5 = vmor %vm1573_vm12, %vm1572_vm11  ;;  %v3251_v50 = vld [vmem:[%s7996_s8 + $0xd0] sm:$0xff] }
 0x67f   :  { %2407 = vst.msk [vmem:[#allocation2 + $0x9] sm:$0x5] %vm7454_vm3, %v2405_v60  ;;  %vm1581_vm3 = vcmask 450720   ;;  %v4638_v59 = vpack.c.bf16 %v3252_v13, %v3251_v50  ;;  %v3253_v60 = vld [vmem:[%s7996_s8 + $0xe0] sm:$0xff]  ;;  %4637 = vmatpush3.bf16.msra.mxu0 %v4636_v11  ;;  %v4550_v50 = vpack.c.bf16 %v2738_v16, %v2736_v12  ;;  %v2737_v11 = vld [vmem:[%s7994_s6 + $0x6f0] sm:$0xff]  ;;  %v2778_v12 = vld [vmem:[%s7994_s6 + $0x838] sm:$0xff] }
 0x680   :  { %2412 = vst.msk [vmem:[#allocation2 + $0xb] sm:$0x1] %vm1473_vm8, %v2410_v21  ;;  %v2428_v26 = vpop.permute.xlu1 %2427  ;;  %vm1587_vm8 = vcmask 745920   ;;  %v3254_v21 = vld [vmem:[%s7996_s8 + $0xe8] sm:$0xff]  ;;  %v2735_v13 = vld [vmem:[%s7994_s6 + $0x6e0] sm:$0xff] }
 0x681   :  { %4639 = vmatprep.subr.bf16.mxu0 %v4638_v59  ;;  %v2742_v59 = vld [vmem:[%s7994_s6 + $0x718] sm:$0xff] }
 0x682   :  { %v1547_v46 = vpop.permute.xlu0 %1546 }
 0x683   :  { %1550 = vst.msk [vmem:[#allocation2 + $0xe] sm:$0x1] %vm1549_vm10, %v1547_v46 }
 0x684   :  { %v2434_v42 = vpop.permute.xlu1 %2433 }
 0x685   :  { %v2435_v58 = vrot.slane %v2434_v42, 6 }
 0x686   :  { %v2467_v51 = vpop.permute.xlu0 %2466 }
 0x687   :  { %v2436_v6 = vsel %vm1500_vm4, %v2435_v58, %v2434_v42  ;;  %vm8277_vm4 = vcmask 319520   ;;  %v4642_v42 = vpack.c.bf16 %v3254_v21, %v3253_v60  ;;  %v2741_v60 = vld [vmem:[%s7994_s6 + $0x710] sm:$0xff]  ;;  %v2744_v21 = vld [vmem:[%s7994_s6 + $0x728] sm:$0xff] }
 0x688   :  { %v2416_v10 = vpop.permute.xlu1 %2415 }
 0x689   :  { %2418 = vst.msk [vmem:[#allocation2 + $0xb] sm:$0x1] %vm1480_vm14, %v2416_v10  ;;  %vm1594_vm14 = vcmask 1041120   ;;  %v2709_v10 = vld [vmem:[%s7994_s6 + $0x610] sm:$0xff] }
 0x68a   :  { %2430 = vst.msk [vmem:[#allocation2 + $0xb] sm:$0x1] %vm1493_vm7, %v2428_v26  ;;  %v1554_v40 = vpop.permute.xlu0 %1553  ;;  %v4640_v26 = vpack.c.bf16 %v3236_v44, %v3235_v1  ;;  %v4524_v45 = vpack.c.bf16 %v2709_v10, %v2707_v0  ;;  %v4552_v1 = vpack.c.bf16 %v2737_v11, %v2735_v13  ;;  %v2748_v0 = vld [vmem:[%s7994_s6 + $0x748] sm:$0xff]  ;;  %v2750_v10 = vld [vmem:[%s7994_s6 + $0x758] sm:$0xff]  ;;  %v2777_v13 = vld [vmem:[%s7994_s6 + $0x830] sm:$0xff]  ;;  %vm3334_vm7 = vcmask 9216  }
 0x68b   :  { %2438 = vst.msk [vmem:[#allocation2 + $0xb] sm:$0x5] %vm7500_vm6, %v2436_v6  ;;  %v2780_v11 = vld [vmem:[%s7994_s6 + $0x848] sm:$0xff] }
 0x68c   :  { %1557 = vst.msk [vmem:[#allocation2 + $0xe] sm:$0x1] %vm1556_vm2, %v1554_v40  ;;  %v2459_v27 = vpop.permute.xlu1 %2458  ;;  %4641 = vmatpush3.bf16.msra.mxu0 %v4640_v26  ;;  %v2712_v40 = vld [vmem:[%s7994_s6 + $0x628] sm:$0xff]  ;;  %v2746_v26 = vld [vmem:[%s7994_s6 + $0x738] sm:$0xff] }
 0x68d   :  { %1575 = vst.msk [vmem:[#allocation2 + $0xe] sm:$0x5] %vm7550_vm5, %v1570_v47  ;;  %v2460_v18 = vrot.slane %v2459_v27, 6  ;;  %4643 = vmatprep.subr.bf16.mxu0 %v4642_v42  ;;  %v2714_v47 = vld [vmem:[%s7994_s6 + $0x638] sm:$0xff]  ;;  %v4558_v42 = vpack.c.bf16 %v2746_v26, %v2744_v21  ;;  %v2783_v26 = vld [vmem:[%s7994_s6 + $0x860] sm:$0xff] }
 0x68e   :  { %v1579_v35 = vpop.permute.xlu0 %1578  ;;  %v4526_v37 = vpack.c.bf16 %v2714_v47, %v2712_v40  ;;  %v2747_v40 = vld [vmem:[%s7994_s6 + $0x740] sm:$0xff]  ;;  %v2749_v47 = vld [vmem:[%s7994_s6 + $0x750] sm:$0xff] }
 0x68f   :  { %1582 = vst.msk [vmem:[#allocation2 + $0x10] sm:$0x1] %vm1581_vm3, %v1579_v35  ;;  %v2461_v30 = vsel %vm1531_vm13, %v2460_v18, %v2459_v27 }
 0x690   :  { %v2441_v56 = vpop.permute.xlu1 %2440 }
 0x691   :  { %2443 = vst.msk [vmem:[#allocation2 + $0xd] sm:$0x1] %vm1511_vm9, %v2441_v56  ;;  %v2711_v56 = vld [vmem:[%s7994_s6 + $0x620] sm:$0xff] }
 0x692   :  { %v1585_v31 = vpop.permute.xlu0 %1584  ;;  %v4528_v9 = vpack.c.bf16 %v2713_v48, %v2711_v56  ;;  %v2751_v56 = vld [vmem:[%s7994_s6 + $0x760] sm:$0xff]  ;;  %v2753_v48 = vld [vmem:[%s7994_s6 + $0x770] sm:$0xff] }
 0x693   :  { %1588 = vst.msk [vmem:[#allocation2 + $0x10] sm:$0x1] %vm1587_vm8, %v1585_v31  ;;  %v4534_v31 = vpack.c.bf16 %v2722_v28, %v2720_v39  ;;  %v2762_v39 = vld [vmem:[%s7994_s6 + $0x7b8] sm:$0xff] }
 0x694   :  { %v2447_v33 = vpop.permute.xlu1 %2446 }
 0x695   :  { %2449 = vst.msk [vmem:[#allocation2 + $0xd] sm:$0x1] %vm1518_vm0, %v2447_v33  ;;  %v2724_v33 = vld [vmem:[%s7994_s6 + $0x688] sm:$0xff] }
 0x696   :  { %2463 = vst.msk [vmem:[#allocation2 + $0xd] sm:$0x5] %vm7533_vm15, %v2461_v30  ;;  %v1592_v41 = vpop.permute.xlu0 %1591  ;;  %v4538_v22 = vpack.c.bf16 %v2726_v53, %v2724_v33  ;;  %v2723_v30 = vld [vmem:[%s7994_s6 + $0x680] sm:$0xff]  ;;  %v2766_v33 = vld [vmem:[%s7994_s6 + $0x7d8] sm:$0xff] }
 0x697   :  { %2469 = vst.msk [vmem:[#allocation2 + $0xf] sm:$0x1] %vm8277_vm4, %v2467_v51  ;;  %v4540_v29 = vpack.c.bf16 %v2725_v55, %v2723_v30  ;;  %v2765_v30 = vld [vmem:[%s7994_s6 + $0x7d0] sm:$0xff]  ;;  %v2768_v55 = vld [vmem:[%s7994_s6 + $0x7e8] sm:$0xff] }
 0x698   :  { %1595 = vst.msk [vmem:[#allocation2 + $0x10] sm:$0x1] %vm1594_vm14, %v1592_v41  ;;  %v2490_v15 = vpop.permute.xlu1 %2489  ;;  %v2730_v41 = vld [vmem:[%s7994_s6 + $0x6b8] sm:$0xff] }
 0x699   :  { %v2491_v32 = vrot.slane %v2490_v15, 6 }
 0x69b   :  { %v2492_v23 = vsel %vm1569_vm1, %v2491_v32, %v2490_v15  ;;  %v4542_v15 = vpack.c.bf16 %v2730_v41, %v2728_v49  ;;  %v2770_v49 = vld [vmem:[%s7994_s6 + $0x7f8] sm:$0xff] }
 0x69c   :  { %v2472_v14 = vpop.permute.xlu1 %2471 }
 0x69d   :  { %2474 = vst.msk [vmem:[#allocation2 + $0xf] sm:$0x1] %vm1549_vm10, %v2472_v14  ;;  %v2731_v14 = vld [vmem:[%s7994_s6 + $0x6c0] sm:$0xff] }
 0x69e   :  { %v4548_v32 = vpack.c.bf16 %v2733_v20, %v2731_v14  ;;  %v2773_v14 = vld [vmem:[%s7994_s6 + $0x810] sm:$0xff]  ;;  %v2776_v20 = vld [vmem:[%s7994_s6 + $0x828] sm:$0xff] }
 0x6a0   :  { %v2478_v61 = vpop.permute.xlu1 %2477 }
 0x6a1   :  { %2480 = vst.msk [vmem:[#allocation2 + $0xf] sm:$0x1] %vm1556_vm2, %v2478_v61  ;;  %v2740_v61 = vld [vmem:[%s7994_s6 + $0x708] sm:$0xff] }
 0x6a2   :  { %2494 = vst.msk [vmem:[#allocation2 + $0xf] sm:$0x5] %vm7550_vm5, %v2492_v23  ;;  %v4554_v44 = vpack.c.bf16 %v2742_v59, %v2740_v61  ;;  %v2739_v23 = vld [vmem:[%s7994_s6 + $0x700] sm:$0xff]  ;;  %v2782_v61 = vld [vmem:[%s7994_s6 + $0x858] sm:$0xff] }
 0x6a4   :  { %v2498_v46 = vpop.permute.xlu1 %2497 }
 0x6a5   :  { %2500 = vst.msk [vmem:[#allocation2 + $0x11] sm:$0x1] %vm1581_vm3, %v2498_v46  ;;  %v4556_v46 = vpack.c.bf16 %v2741_v60, %v2739_v23  ;;  %v2781_v23 = vld [vmem:[%s7994_s6 + $0x850] sm:$0xff]  ;;  %v2784_v60 = vld [vmem:[%s7994_s6 + $0x868] sm:$0xff] }
 0x6a8   :  { %v2503_v58 = vpop.permute.xlu1 %2502 }
 0x6a9   :  { %2505 = vst.msk [vmem:[#allocation2 + $0x11] sm:$0x1] %vm1587_vm8, %v2503_v58  ;;  %v2513_v51 = vld [vmem:[#allocation2 + $0x8] sm:$0xff]  ;;  %v2743_v58 = vld [vmem:[%s7994_s6 + $0x720] sm:$0xff] }
 0x6aa   :  { %v2842_v8 = vrot.slane %v2513_v51, %v6704_v34  ;;  %v2835_v6 = vcombine.high %v2513_v51, %v2513_v51  ;;  %v2745_v51 = vld [vmem:[%s7994_s6 + $0x730] sm:$0xff] }
 0x6ac   :  { %v2509_v27 = vpop.permute.xlu1 %2508  ;;  %v2850_v35 = vcombine.high %v2842_v8, %v2842_v8  ;;  %v7670_v7 = vrot.slane %v2835_v6, %v6704_v34  ;;  %v2716_v34 = vld [vmem:[%s7994_s6 + $0x648] sm:$0xff]  ;;  %v4562_v6 = vpack.c.bf16 %v2750_v10, %v2748_v0  ;;  %v2787_v10 = vld [vmem:[%s7994_s6 + $0x880] sm:$0xff] }
 0x6ad   :  { %2511 = vst.msk [vmem:[#allocation2 + $0x11] sm:$0x1] %vm1594_vm14, %v2509_v27  ;;  %v4530_v18 = vpack.c.bf16 %v2718_v63, %v2716_v34  ;;  %v2752_v27 = vld [vmem:[%s7994_s6 + $0x768] sm:$0xff]  ;;  %v2758_v34 = vld [vmem:[%s7994_s6 + $0x798] sm:$0xff]  ;;  %v4568_v63 = vpack.c.bf16 %v2753_v48, %v2751_v56 }
 0x6ae   :  { %3074 = vmatprep.mubr.f32.mxu1 %v2850_v35  ;;  %v2851_v43 = vcombine.high %v7670_v7, %v7670_v7  ;;  %v2754_v35 = vld [vmem:[%s7994_s6 + $0x778] sm:$0xff] }
 0x6af   :  { %3075 = vmatmul.mubr.f32.vlgmr.msra.gmra.mrb[26].mxu1 %v2842_v8  ;;  %v4560_v8 = vpack.c.bf16 %v2745_v51, %v2743_v58  ;;  %v2790_v58 = vld [vmem:[%s7994_s6 + $0x898] sm:$0xff] }
 0x6b0   :  { %4525 = vmatpush1.bf16.msra.mxu1 %v4524_v45  ;;  %3145 = vmatprep.mubr.f32.mxu1 %v2851_v43  ;;  %v4564_v45 = vpack.c.bf16 %v2749_v47, %v2747_v40  ;;  %v2756_v43 = vld [vmem:[%s7994_s6 + $0x788] sm:$0xff]  ;;  %v2794_v40 = vld [vmem:[%s7994_s6 + $0x8b8] sm:$0xff] }
 0x6b1   :  { %4527 = vmatprep.subr.bf16.mxu1 %v4526_v37  ;;  %v4566_v37 = vpack.c.bf16 %v2754_v35, %v2752_v27  ;;  %v2791_v35 = vld [vmem:[%s7994_s6 + $0x8a0] sm:$0xff]  ;;  %v2798_v56 = vld [vmem:[%s7994_s6 + $0x8d8] sm:$0xff] }
 0x6b4   :  { %4529 = vmatpush1.bf16.msra.mxu1 %v4528_v9  ;;  %v4570_v9 = vpack.c.bf16 %v2758_v34, %v2756_v43  ;;  %v2795_v34 = vld [vmem:[%s7994_s6 + $0x8c0] sm:$0xff] }
 0x6b5   :  { %4531 = vmatprep.subr.bf16.mxu1 %v4530_v18  ;;  %v2755_v18 = vld [vmem:[%s7994_s6 + $0x780] sm:$0xff] }
 0x6b6   :  { %v4572_v28 = vpack.c.bf16 %v2757_v19, %v2755_v18  ;;  %v2802_v18 = vld [vmem:[%s7994_s6 + $0x8f8] sm:$0xff] }
 0x6b8   :  { %4533 = vmatpush1.bf16.msra.mxu1 %v4532_v17  ;;  %v4574_v17 = vpack.c.bf16 %v2762_v39, %v2760_v52  ;;  %v2799_v39 = vld [vmem:[%s7994_s6 + $0x8e0] sm:$0xff] }
 0x6b9   :  { %4535 = vmatprep.subr.bf16.mxu1 %v4534_v31  ;;  %v2759_v31 = vld [vmem:[%s7994_s6 + $0x7a0] sm:$0xff] }
 0x6ba   :  { %v4576_v53 = vpack.c.bf16 %v2761_v62, %v2759_v31  ;;  %v3399_v31 = vld.sshfl [vmem:[#allocation2 + $0x10] sm:$0x3 pattern:$0x76325410]  ;;  %v3237_v62 = vld [vmem:[%s7996_s8 + $0x60] sm:$0xff] }
 0x6bc   :  { %4537 = vmatpush1.bf16.msra.mxu1 %v4536_v3  ;;  %v4578_v3 = vpack.c.bf16 %v2766_v33, %v2764_v5  ;;  %v3238_v5 = vld [vmem:[%s7996_s8 + $0x68] sm:$0xff] }
 0x6bd   :  { %4539 = vmatprep.subr.bf16.mxu1 %v4538_v22  ;;  %v2763_v22 = vld [vmem:[%s7994_s6 + $0x7c0] sm:$0xff]  ;;  %v4644_v33 = vpack.c.bf16 %v3238_v5, %v3237_v62 }
 0x6be   :  { %v4580_v41 = vpack.c.bf16 %v2765_v30, %v2763_v22  ;;  %v3239_v30 = vld [vmem:[%s7996_s8 + $0x70] sm:$0xff] }
 0x6bf   :  { %4645 = vmatpush3.bf16.msra.mxu0 %v4644_v33 }
 0x6c0   :  { %4541 = vmatpush1.bf16.msra.mxu1 %v4540_v29  ;;  %v4582_v29 = vpack.c.bf16 %v2770_v49, %v2768_v55  ;;  %v3240_v55 = vld [vmem:[%s7996_s8 + $0x78] sm:$0xff] }
 0x6c1   :  { %4543 = vmatprep.subr.bf16.mxu1 %v4542_v15  ;;  %v2767_v15 = vld [vmem:[%s7994_s6 + $0x7e0] sm:$0xff]  ;;  %v4648_v49 = vpack.c.bf16 %v3240_v55, %v3239_v30 }
 0x6c2   :  { %v4584_v25 = vpack.c.bf16 %v2769_v36, %v2767_v15  ;;  %v2811_v15 = vsub.s32 1, %v6693_v38 }
 0x6c4   :  { %4545 = vmatpush1.bf16.msra.mxu1 %v4544_v2  ;;  %v4586_v2 = vpack.c.bf16 %v2774_v57, %v2772_v4 }
 0x6c5   :  { %4547 = vmatprep.subr.bf16.mxu1 %v4546_v24  ;;  %v2771_v24 = vld [vmem:[%s7994_s6 + $0x800] sm:$0xff] }
 0x6c6   :  { %v4588_v16 = vpack.c.bf16 %v2773_v14, %v2771_v24 }
 0x6c8   :  { %4549 = vmatpush1.bf16.msra.mxu1 %v4548_v32  ;;  %v4590_v32 = vpack.c.bf16 %v2778_v12, %v2776_v20 }
 0x6c9   :  { %4551 = vmatprep.subr.bf16.mxu1 %v4550_v50  ;;  %v2775_v50 = vld [vmem:[%s7994_s6 + $0x820] sm:$0xff] }
 0x6ca   :  { %v4592_v59 = vpack.c.bf16 %v2777_v13, %v2775_v50 }
 0x6cc   :  { %4553 = vmatpush1.bf16.msra.mxu1 %v4552_v1  ;;  %v4594_v1 = vpack.c.bf16 %v2782_v61, %v2780_v11 }
 0x6cd   :  { %4555 = vmatprep.subr.bf16.mxu1 %v4554_v44  ;;  %v2779_v44 = vld [vmem:[%s7994_s6 + $0x840] sm:$0xff] }
 0x6d0   :  { %4557 = vmatpush1.bf16.msra.mxu1 %v4556_v46  ;;  %v2785_v46 = vld [vmem:[%s7994_s6 + $0x870] sm:$0xff] }
 0x6d1   :  { %4559 = vmatprep.subr.bf16.mxu1 %v4558_v42  ;;  %v2788_v42 = vld [vmem:[%s7994_s6 + $0x888] sm:$0xff]  ;;  %v4600_v51 = vpack.c.bf16 %v2785_v46, %v2783_v26 }
 0x6d2   :  { %v4602_v0 = vpack.c.bf16 %v2790_v58, %v2788_v42 }
 0x6d4   :  { %4561 = vmatpush1.bf16.msra.mxu1 %v4560_v8  ;;  %v2789_v8 = vld [vmem:[%s7994_s6 + $0x890] sm:$0xff] }
 0x6d5   :  { %4563 = vmatprep.subr.bf16.mxu1 %v4562_v6  ;;  %v2792_v6 = vld [vmem:[%s7994_s6 + $0x8a8] sm:$0xff]  ;;  %v4604_v47 = vpack.c.bf16 %v2789_v8, %v2787_v10 }
 0x6d6   :  { %v4606_v27 = vpack.c.bf16 %v2794_v40, %v2792_v6 }
 0x6d8   :  { %4565 = vmatpush1.bf16.msra.mxu1 %v4564_v45  ;;  %v2793_v45 = vld [vmem:[%s7994_s6 + $0x8b0] sm:$0xff] }
 0x6d9   :  { %4567 = vmatprep.subr.bf16.mxu1 %v4566_v37  ;;  %v2796_v37 = vld [vmem:[%s7994_s6 + $0x8c8] sm:$0xff]  ;;  %v4608_v48 = vpack.c.bf16 %v2793_v45, %v2791_v35 }
 0x6da   :  { %v4610_v43 = vpack.c.bf16 %v2798_v56, %v2796_v37 }
 0x6dc   :  { %4569 = vmatpush1.bf16.msra.mxu1 %v4568_v63  ;;  %v2797_v63 = vld [vmem:[%s7994_s6 + $0x8d0] sm:$0xff] }
 0x6dd   :  { %4571 = vmatprep.subr.bf16.mxu1 %v4570_v9  ;;  %v2800_v9 = vld [vmem:[%s7994_s6 + $0x8e8] sm:$0xff]  ;;  %v4612_v19 = vpack.c.bf16 %v2797_v63, %v2795_v34 }
 0x6de   :  { %v4614_v52 = vpack.c.bf16 %v2802_v18, %v2800_v9 }
 0x6e0   :  { %4573 = vmatpush1.bf16.msra.mxu1 %v4572_v28  ;;  %v2801_v28 = vld [vmem:[%s7994_s6 + $0x8f0] sm:$0xff] }
 0x6e1   :  { %4575 = vmatprep.subr.bf16.mxu1 %v4574_v17  ;;  %v4616_v17 = vpack.c.bf16 %v2801_v28, %v2799_v39 }
 0x6e4   :  { %4577 = vmatpush1.bf16.msra.mxu1 %v4576_v53  ;;  %v3255_v53 = vld [vmem:[%s7996_s8 + $0xf0] sm:$0xff] }
 0x6e5   :  { %4579 = vmatprep.subr.bf16.mxu1 %v4578_v3  ;;  %v3256_v3 = vld [vmem:[%s7996_s8 + $0xf8] sm:$0xff] }
 0x6e6   :  { %v4646_v22 = vpack.c.bf16 %v3256_v3, %v3255_v53 }
 0x6e8   :  { %4581 = vmatpush1.bf16.msra.mxu1 %v4580_v41  ;;  %4647 = vmatprep.subr.bf16.mxu0 %v4646_v22  ;;  %v2807_v41 = vsub.s32 0, %v6693_v38 }
 0x6e9   :  { %4583 = vmatprep.subr.bf16.mxu1 %v4582_v29  ;;  %4649 = vmatpush3.bf16.msra.mxu0 %v4648_v49  ;;  %v2803_v29 = vld [vmem:[%s7995_s7] sm:$0x3]  ;;  %s4967_s7 = smov [#allocation3]  }
 0x6ea   :  { %v2808_v36 = vrot.slane %v2803_v29, %v2807_v41  ;;  %v2812_v4 = vrot.slane %v2803_v29, %v2811_v15  ;;  %s3353_s23 = sshll.u32 %s4967_s7, 4  ;;  %s3354_s23 = int_to_ptr.vmem [resolvable:$true] %s3353_s23 }
 0x6eb   :  { %p4914_p1 = scmp.lt.s32.totalorder %s3354_s23, %s3354_s23 }
 0x6ec   :  { %4585 = vmatpush1.bf16.msra.mxu1 %v4584_v25 }
 0x6ed   :  { %4587 = vmatprep.subr.bf16.mxu1 %v4586_v2 }
 0x6ef   :  { %3146 = vmatmul.mubr.f32.vlgmr.msra.gmra.mrb[26].mxu1 %v7670_v7  ;;  %v2786_v7 = vld [vmem:[%s7994_s6 + $0x878] sm:$0xff] }
 0x6f0   :  { %4589 = vmatpush1.bf16.msra.mxu1 %v4588_v16  ;;  %3216 = vmatprep.mubr.f32.mxu1 %v8121_v54  ;;  %v4596_v54 = vpack.c.bf16 %v2781_v23, %v2779_v44  ;;  %v4598_v21 = vpack.c.bf16 %v2786_v7, %v2784_v60  ;;  %v3400_v16 = vld [vmem:[%s7997_s9] ss:$0 sm:$0xff]  ;;  %s4909_s9 = scalar_lea.vmem %s3354_s23, 32 }
 0x6f1   :  { %4591 = vmatprep.subr.bf16.mxu1 %v4590_v32  ;;  %p4910_p0 = scmp.ne.s32.totalorder %s3354_s23, %s4909_s9  ;;  %p4915_p2 = scmp.lt.s32.totalorder %s4909_s9, %s4909_s9 }
 0x6f3   :  { %p4916_p3 = por %p4915_p2, %p4914_p1 }
 0x6f4   :  { %4593 = vmatpush1.bf16.msra.mxu1 %v4592_v59 }
 0x6f5   :  { %4595 = vmatprep.subr.bf16.mxu1 %v4594_v1  ;;  %p4917_p4 = pnand %p4916_p3, %p4910_p0 }
 0x6f8   :  { %4597 = vmatpush1.bf16.msra.mxu1 %v4596_v54 }
 0x6f9   :  { %4599 = vmatprep.subr.bf16.mxu1 %v4598_v21 }
 0x6fc   :  { %4601 = vmatpush1.bf16.msra.mxu1 %v4600_v51 }
 0x6fd   :  { %4603 = vmatprep.subr.bf16.mxu1 %v4602_v0 }
 0x700   :  { %4605 = vmatpush1.bf16.msra.mxu1 %v4604_v47 }
 0x701   :  { %4607 = vmatprep.subr.bf16.mxu1 %v4606_v27 }
 0x704   :  { %4609 = vmatpush1.bf16.msra.mxu1 %v4608_v48 }
 0x705   :  { %4611 = vmatprep.subr.bf16.mxu1 %v4610_v43 }
 0x708   :  { %4613 = vmatpush1.bf16.msra.mxu1 %v4612_v19 }
 0x709   :  { %4615 = vmatprep.subr.bf16.mxu1 %v4614_v52 }
 0x70c   :  { %4617 = vmatpush1.bf16.msra.mxu1 %v4616_v17 }
 0x70f   :  { %3217 = vmatmul.mubr.f32.vlgmr.msra.gmra.mrb[26].mxu1 %v3399_v31 }
 0x7e2   :  { %v3218_v57 = vpop.f32.mrb[26].mxu1 }
 0x7e3   :  { %v4658_v25 = vadd.f32 %v3218_v57, %v2808_v36  ;;  %v3220_v2 = vpop.f32.mrb[27].mxu1 }
 0x7e4   :  { %v4659_v24 = vadd.f32 %v3220_v2, %v2812_v4 }
 0x7e5   :  { %v3223_v20 = vmax.f32 %v4658_v25, 0.0 }
 0x7e6   :  { %v3224_v14 = vmax.f32 %v4659_v24, 0.0 }
 0x7e8   :  { %3328 = vmatprep.mubr.f32.mxu0 %v3224_v14 }
 0x7e9   :  { %3329 = vmatmul.mubr.f32.vlgmr.msra.gmra.mrb[38].mxu0 %v3223_v20 }
 0x8bc   :  { %v3633_v12 = vpop.f32.mrb[38].mxu0 }
 0x8bd   :  { %v3634_v32 = vpop.f32.mrb[39].mxu0 }
 0x8be   :  { %v3635_v50 = vadd.f32 %v3634_v32, %v3633_v12 }
 0x8c0   :  { %v3331_v13 = vadd.f32 %v3635_v50, %v3400_v16 }
 0x8c2   :  { %v3335_v38 = vsel %vm3334_vm7, %v3331_v13, -inf }
 0x8c3   :  { %3336 = vmax.xlane.f32.xlu0 %v3335_v38 }
 0x950   :  { %v3337_v11 = vpop.xlane.xlu0 %3336 }
 0x951   :  { %v3338_v61 = vsub.f32 %v3331_v13, %v3337_v11 }
 0x953   :  { %v3339_v59 = vmul.f32 1.442695, %v3338_v61 }
 0x955   :  { %4905 = vpow2.f32 %v3339_v59 }
 0x95f   :  { %v4906_v1 = vpop.eup %4905 }
 0x960   :  { %v3341_v44 = vsel %vm3334_vm7, %v4906_v1, 0.0 }
 0x961   :  { %3342 = vadd.xlane.f32.xlu1 %v3341_v44 }
 0x9ee   :  { %v3343_v23 = vpop.xlane.xlu1 %3342 }
 0x9ef   :  { %4907 = vrcp.f32 %v3343_v23 }
 0x9f9   :  { %v4908_v60 = vpop.eup %4907 }
 0x9fa   :  { %v3345_v7 = vmul.f32 %v4908_v60, %v4906_v1 }
 0x9fc   :  { %3346 = vst.msk [vmem:[#allocation3] sm:$0x3] %vm3334_vm7, %v3345_v7 }
 0x9fd   :  { %4920 = shalt.err (!%p4917_p4)
}
 0x9fe   :  { %s4921_s12 = scalar_lea.hbm %s7998_s10, 32 }
 0x9ff   :  { %p4922_p5 = scmp.ne.s32.totalorder %s7998_s10, %s4921_s12  ;;  %p4925_p6 = scmp.lt.u32.totalorder %s4921_s12, %s7998_s10 }
 0xa01   :  { %p4927_p7 = pnand %p4925_p6, %p4922_p5 }
 0xa03   :  { %4930 = shalt.err (!%p4927_p7)
}
 0xa04   :  { %3356 = dma.vmem_to_hbm [thread:$0]  %s3354_s23, 32, %s7998_s10, [#allocation4]  }
 0xa05   :  { %4931 = dma.done.wait [#allocation4], 32  }
 0xa06   :  { %4932 = vsyncadd [#allocation4], 4294967264 }
 0xa07   :  { %3360 = vsyncpa [#allocation4], 1 }

</bundles_post_ra>
